<compile_context>
chip_gen: v7x
topology: tpu7x:2x2x1
jax: 0.10.0
libtpu: 0.0.40
codegen_flags: <defaults>
</compile_context>

<pallas_src>
import functools
import math

import jax
import jax.numpy as jnp
from jax.experimental import pallas as pl
from jax.experimental.pallas import tpu as pltpu

EPS = 1e-5


def _residual_block_kernel(x_ref, w1_ref, w2_ref, o_ref, pad_ref, *, h, w):
    nb, c, hw = x_ref.shape

    def reflect_pad_to_scratch(y_flat):
        # ReflectionPad2d(1): fill the persistent (C, H+2, W+2) VMEM scratch.
        y = y_flat.reshape(c, h, w)
        pad_ref[:, 1:h + 1, 1:w + 1] = y
        pad_ref[:, 1:h + 1, 0:1] = y[:, :, 1:2]                   # left  <- col 1
        pad_ref[:, 1:h + 1, w + 1:w + 2] = y[:, :, w - 2:w - 1]   # right <- col W-2
        # Top/bottom rows copied from already-padded rows (corners included).
        pad_ref[:, 0:1, :] = pad_ref[:, 2:3, :]
        pad_ref[:, h + 1:h + 2, :] = pad_ref[:, h - 1:h, :]

    def conv3x3(y_flat, w_ref):
        # 9-tap accumulation: acc += w[tap] @ shifted_view, all on the MXU,
        # chained into a single f32 accumulator (MRB in-place acc on v7x).
        reflect_pad_to_scratch(y_flat)
        acc = jnp.zeros((c, hw), jnp.float32)
        for di in range(3):
            for dj in range(3):
                tap = pad_ref[:, di:di + h, dj:dj + w].reshape(c, hw)
                acc = acc + jnp.dot(
                    w_ref[di * 3 + dj], tap.astype(w_ref.dtype),
                    preferred_element_type=jnp.float32)
        return acc

    def instance_norm(y):
        # Single pass: sum and sum-of-squares together (biased var, eps=1e-5).
        inv_n = 1.0 / float(hw)
        s = jnp.sum(y, axis=1, keepdims=True)
        ss = jnp.sum(y * y, axis=1, keepdims=True)
        mean = s * inv_n
        var = jnp.maximum(ss * inv_n - mean * mean, 0.0)
        return (y - mean) * jax.lax.rsqrt(var + EPS)

    for i in range(nb):  # nb is static -> unrolled
        x = x_ref[i].astype(jnp.float32)                  # (C, H*W)
        y = conv3x3(x, w1_ref)
        y = jnp.maximum(instance_norm(y), 0.0)            # InstanceNorm + ReLU
        y = instance_norm(conv3x3(y, w2_ref))
        o_ref[i] = (x + y).astype(o_ref.dtype)


def _choose_nb(n, c, h, w, itemsize):
    """Images per grid step: fill a modest VMEM budget but keep >= 2 steps."""
    budget = 8 << 20
    per_image = c * h * w * (2 * itemsize + 6 * 4)  # in+out blocks + f32 temps
    cap = max(1, budget // max(per_image, 1))
    best = 1
    for nb in range(1, n + 1):
        if n % nb == 0 and nb <= cap and (n // nb >= 2 or n == 1):
            best = nb
    return best


def residual_block(x, w1, b1=None, w2=None, b2=None):
    """Forward pass of the PyTorch ResidualBlock.

    b1/b2 are accepted for API parity but are a mathematical no-op: each conv
    is immediately followed by InstanceNorm2d without affine, which subtracts
    the per-channel mean and cancels the bias exactly.
    """
    n, c, h, w = x.shape
    assert h >= 2 and w >= 2, "ReflectionPad2d(1) needs H, W >= 2"
    assert w1.shape == (c, c, 3, 3) and w2.shape == (c, c, 3, 3), \
        "conv weights must be square (O == I == channels)"

    hw = h * w
    nb = _choose_nb(n, c, h, w, x.dtype.itemsize)

    # Conv weights (O, I, 3, 3) -> (9, O, I), tap index = di*3 + dj.
    w1r = jnp.transpose(w1, (2, 3, 0, 1)).reshape(9, c, c)
    w2r = jnp.transpose(w2, (2, 3, 0, 1)).reshape(9, c, c)

    x_flat = x.reshape(n, c, hw)  # lane-dense activation layout

    est = (2 * nb * c * hw * 2 * x.dtype.itemsize        # double-buffered in+out
           + 2 * 2 * 9 * c * c * w1.dtype.itemsize       # double-buffered weights
           + c * (h + 2) * (w + 2) * 4                   # pad scratch
           + 6 * c * hw * 4)                             # f32 intermediates
    vmem_limit = int(min(max(2 * est, 32 << 20), 48 << 20))

    kernel = functools.partial(_residual_block_kernel, h=h, w=w)

    out_flat = pl.pallas_call(
        kernel,
        out_shape=jax.ShapeDtypeStruct((n, c, hw), x.dtype),
        grid_spec=pltpu.PrefetchScalarGridSpec(
            num_scalar_prefetch=0,
            grid=(n // nb,),
            in_specs=[
                pl.BlockSpec((nb, c, hw), lambda i: (i, 0, 0)),
                pl.BlockSpec((9, c, c), lambda i: (0, 0, 0)),
                pl.BlockSpec((9, c, c), lambda i: (0, 0, 0)),
            ],
            out_specs=pl.BlockSpec((nb, c, hw), lambda i: (i, 0, 0)),
            scratch_shapes=[pltpu.VMEM((c, h + 2, w + 2), jnp.float32)],
        ),
        compiler_params=pltpu.CompilerParams(
            dimension_semantics=("parallel",),
            vmem_limit_bytes=vmem_limit),
    )(x_flat, w1r, w2r)

    return out_flat.reshape(n, c, h, w)


def reference_forward(x, w1, b1, w2, b2):
    """Pure-JAX reference matching the PyTorch module (bias included)."""
    def conv(y, w, b):
        yp = jnp.pad(y, ((0, 0), (0, 0), (1, 1), (1, 1)), mode="reflect")
        out = jax.lax.conv_general_dilated(
            yp, w, (1, 1), "VALID", dimension_numbers=("NCHW", "OIHW", "NCHW"))
        return out + b[None, :, None, None]

    def inorm(y):
        m = jnp.mean(y, axis=(2, 3), keepdims=True)
        v = jnp.mean((y - m) ** 2, axis=(2, 3), keepdims=True)
        return (y - m) * jax.lax.rsqrt(v + EPS)

    h = jnp.maximum(inorm(conv(x, w1, b1)), 0.0)
    h = inorm(conv(h, w2, b2))
    return x + h


if __name__ == "__main__":
    N, C, H, W = 2, 4, 16, 16
    key = jax.random.PRNGKey(0)
    kx, kw1, kb1, kw2, kb2 = jax.random.split(key, 5)

    x = jax.random.normal(kx, (N, C, H, W), dtype=jnp.float32)

    # Deterministic init mimicking PyTorch Conv2d default (uniform +- 1/sqrt(fan_in)).
    fan_in = C * 3 * 3
    bound = 1.0 / math.sqrt(fan_in)
    w1 = jax.random.uniform(kw1, (C, C, 3, 3), jnp.float32, -bound, bound)
    b1 = jax.random.uniform(kb1, (C,), jnp.float32, -bound, bound)
    w2 = jax.random.uniform(kw2, (C, C, 3, 3), jnp.float32, -bound, bound)
    b2 = jax.random.uniform(kb2, (C,), jnp.float32, -bound, bound)

    out = jax.block_until_ready(residual_block(x, w1, b1, w2, b2))
    ref = jax.block_until_ready(reference_forward(x, w1, b1, w2, b2))

    assert out.shape == (N, C, H, W) and out.dtype == jnp.float32
    assert jnp.allclose(out, ref, atol=2e-3, rtol=2e-3), (
        f"max abs err {jnp.max(jnp.abs(out - ref))}")

    print("KERNEL_OK")
</pallas_src>

<mosaic_0001>
module attributes {stable_mosaic.version = 11 : i64} {
  func.func @_residual_block_kernel(%arg0: i32, %arg1: memref<1x4x256xf32, #tpu.memory_space<vmem>>, %arg2: memref<9x4x4xf32, #tpu.memory_space<vmem>>, %arg3: memref<9x4x4xf32, #tpu.memory_space<vmem>>, %arg4: memref<1x4x256xf32, #tpu.memory_space<vmem>>, %arg5: memref<4x18x18xf32, #tpu.memory_space<vmem>>) attributes {dimension_semantics = [#tpu.dimension_semantics<parallel>], iteration_bounds = array<i64: 2>, scalar_prefetch = 0 : i64, scratch_operands = 1 : i64, tpu.core_type = #tpu.core_type<tc>, window_params = [{transform_indices = @transform_0, window_bounds = array<i64: 1, 4, 256>}, {pipeline_mode = #tpu.pipeline_mode<synchronous>, transform_indices = @transform_1, window_bounds = array<i64: 9, 4, 4>}, {pipeline_mode = #tpu.pipeline_mode<synchronous>, transform_indices = @transform_2, window_bounds = array<i64: 9, 4, 4>}, {transform_indices = @transform_3, window_bounds = array<i64: 1, 4, 256>}]} {
    %c0 = arith.constant 0 : index
    %c0_0 = arith.constant 0 : index
    %c0_1 = arith.constant 0 : index
    %0 = vector.load %arg1[%c0, %c0_0, %c0_1] : memref<1x4x256xf32, #tpu.memory_space<vmem>>, vector<1x4x256xf32>
    %1 = vector.shape_cast %0 : vector<1x4x256xf32> to vector<4x256xf32>
    %2 = vector.shape_cast %1 : vector<4x256xf32> to vector<4x16x16xf32>
    %c0_2 = arith.constant 0 : index
    %c1 = arith.constant 1 : index
    %c1_3 = arith.constant 1 : index
    %3 = vector.load %arg5[%c0_2, %c1, %c1_3] : memref<4x18x18xf32, #tpu.memory_space<vmem>>, vector<4x16x16xf32>
    tpu.vector_store %arg5[%c0_2, %c1, %c1_3], %2 {strides = array<i32>} : memref<4x18x18xf32, #tpu.memory_space<vmem>>, vector<4x16x16xf32>,
    %4 = vector.extract_strided_slice %2 {offsets = [0, 0, 1], sizes = [4, 16, 1], strides = [1, 1, 1]} : vector<4x16x16xf32> to vector<4x16x1xf32>
    %c0_4 = arith.constant 0 : index
    %c1_5 = arith.constant 1 : index
    %c0_6 = arith.constant 0 : index
    %5 = vector.load %arg5[%c0_4, %c1_5, %c0_6] : memref<4x18x18xf32, #tpu.memory_space<vmem>>, vector<4x16x1xf32>
    tpu.vector_store %arg5[%c0_4, %c1_5, %c0_6], %4 {strides = array<i32>} : memref<4x18x18xf32, #tpu.memory_space<vmem>>, vector<4x16x1xf32>,
    %6 = vector.extract_strided_slice %2 {offsets = [0, 0, 14], sizes = [4, 16, 1], strides = [1, 1, 1]} : vector<4x16x16xf32> to vector<4x16x1xf32>
    %c0_7 = arith.constant 0 : index
    %c1_8 = arith.constant 1 : index
    %c17 = arith.constant 17 : index
    %7 = vector.load %arg5[%c0_7, %c1_8, %c17] : memref<4x18x18xf32, #tpu.memory_space<vmem>>, vector<4x16x1xf32>
    tpu.vector_store %arg5[%c0_7, %c1_8, %c17], %6 {strides = array<i32>} : memref<4x18x18xf32, #tpu.memory_space<vmem>>, vector<4x16x1xf32>,
    %c0_9 = arith.constant 0 : index
    %c2 = arith.constant 2 : index
    %c0_10 = arith.constant 0 : index
    %8 = vector.load %arg5[%c0_9, %c2, %c0_10] : memref<4x18x18xf32, #tpu.memory_space<vmem>>, vector<4x1x18xf32>
    %c0_11 = arith.constant 0 : index
    %c0_12 = arith.constant 0 : index
    %c0_13 = arith.constant 0 : index
    %9 = vector.load %arg5[%c0_11, %c0_12, %c0_13] : memref<4x18x18xf32, #tpu.memory_space<vmem>>, vector<4x1x18xf32>
    tpu.vector_store %arg5[%c0_11, %c0_12, %c0_13], %8 {strides = array<i32>} : memref<4x18x18xf32, #tpu.memory_space<vmem>>, vector<4x1x18xf32>,
    %c0_14 = arith.constant 0 : index
    %c15 = arith.constant 15 : index
    %c0_15 = arith.constant 0 : index
    %10 = vector.load %arg5[%c0_14, %c15, %c0_15] : memref<4x18x18xf32, #tpu.memory_space<vmem>>, vector<4x1x18xf32>
    %c0_16 = arith.constant 0 : index
    %c17_17 = arith.constant 17 : index
    %c0_18 = arith.constant 0 : index
    %11 = vector.load %arg5[%c0_16, %c17_17, %c0_18] : memref<4x18x18xf32, #tpu.memory_space<vmem>>, vector<4x1x18xf32>
    tpu.vector_store %arg5[%c0_16, %c17_17, %c0_18], %10 {strides = array<i32>} : memref<4x18x18xf32, #tpu.memory_space<vmem>>, vector<4x1x18xf32>,
    %cst = arith.constant 0.000000e+00 : f32
    %12 = vector.broadcast %cst : f32 to vector<4x256xf32>
    %c0_19 = arith.constant 0 : index
    %c0_20 = arith.constant 0 : index
    %c0_21 = arith.constant 0 : index
    %13 = vector.load %arg5[%c0_19, %c0_20, %c0_21] : memref<4x18x18xf32, #tpu.memory_space<vmem>>, vector<4x16x16xf32>
    %14 = vector.shape_cast %13 : vector<4x16x16xf32> to vector<4x256xf32>
    %c0_22 = arith.constant 0 : index
    %c0_23 = arith.constant 0 : index
    %c0_24 = arith.constant 0 : index
    %15 = vector.load %arg2[%c0_22, %c0_23, %c0_24] : memref<9x4x4xf32, #tpu.memory_space<vmem>>, vector<1x4x4xf32>
    %16 = vector.shape_cast %15 : vector<1x4x4xf32> to vector<4x4xf32>
    %cst_25 = arith.constant dense<0.000000e+00> : vector<4x256xf32>
    %17 = tpu.matmul %16, %14, %cst_25 {dimension_numbers = #tpu.dot_dimension_numbers<[1], [0], [0], [1], [0, 0, 1, 1], [], []>} : vector<4x4xf32>, vector<4x256xf32>, vector<4x256xf32> -> vector<4x256xf32>
    %18 = arith.addf %12, %17 : vector<4x256xf32>
    %c0_26 = arith.constant 0 : index
    %c0_27 = arith.constant 0 : index
    %c1_28 = arith.constant 1 : index
    %19 = vector.load %arg5[%c0_26, %c0_27, %c1_28] : memref<4x18x18xf32, #tpu.memory_space<vmem>>, vector<4x16x16xf32>
    %20 = vector.shape_cast %19 : vector<4x16x16xf32> to vector<4x256xf32>
    %c1_29 = arith.constant 1 : index
    %c0_30 = arith.constant 0 : index
    %c0_31 = arith.constant 0 : index
    %21 = vector.load %arg2[%c1_29, %c0_30, %c0_31] : memref<9x4x4xf32, #tpu.memory_space<vmem>>, vector<1x4x4xf32>
    %22 = vector.shape_cast %21 : vector<1x4x4xf32> to vector<4x4xf32>
    %cst_32 = arith.constant dense<0.000000e+00> : vector<4x256xf32>
    %23 = tpu.matmul %22, %20, %cst_32 {dimension_numbers = #tpu.dot_dimension_numbers<[1], [0], [0], [1], [0, 0, 1, 1], [], []>} : vector<4x4xf32>, vector<4x256xf32>, vector<4x256xf32> -> vector<4x256xf32>
    %24 = arith.addf %18, %23 : vector<4x256xf32>
    %c0_33 = arith.constant 0 : index
    %c0_34 = arith.constant 0 : index
    %c2_35 = arith.constant 2 : index
    %25 = vector.load %arg5[%c0_33, %c0_34, %c2_35] : memref<4x18x18xf32, #tpu.memory_space<vmem>>, vector<4x16x16xf32>
    %26 = vector.shape_cast %25 : vector<4x16x16xf32> to vector<4x256xf32>
    %c2_36 = arith.constant 2 : index
    %c0_37 = arith.constant 0 : index
    %c0_38 = arith.constant 0 : index
    %27 = vector.load %arg2[%c2_36, %c0_37, %c0_38] : memref<9x4x4xf32, #tpu.memory_space<vmem>>, vector<1x4x4xf32>
    %28 = vector.shape_cast %27 : vector<1x4x4xf32> to vector<4x4xf32>
    %cst_39 = arith.constant dense<0.000000e+00> : vector<4x256xf32>
    %29 = tpu.matmul %28, %26, %cst_39 {dimension_numbers = #tpu.dot_dimension_numbers<[1], [0], [0], [1], [0, 0, 1, 1], [], []>} : vector<4x4xf32>, vector<4x256xf32>, vector<4x256xf32> -> vector<4x256xf32>
    %30 = arith.addf %24, %29 : vector<4x256xf32>
    %c0_40 = arith.constant 0 : index
    %c1_41 = arith.constant 1 : index
    %c0_42 = arith.constant 0 : index
    %31 = vector.load %arg5[%c0_40, %c1_41, %c0_42] : memref<4x18x18xf32, #tpu.memory_space<vmem>>, vector<4x16x16xf32>
    %32 = vector.shape_cast %31 : vector<4x16x16xf32> to vector<4x256xf32>
    %c3 = arith.constant 3 : index
    %c0_43 = arith.constant 0 : index
    %c0_44 = arith.constant 0 : index
    %33 = vector.load %arg2[%c3, %c0_43, %c0_44] : memref<9x4x4xf32, #tpu.memory_space<vmem>>, vector<1x4x4xf32>
    %34 = vector.shape_cast %33 : vector<1x4x4xf32> to vector<4x4xf32>
    %cst_45 = arith.constant dense<0.000000e+00> : vector<4x256xf32>
    %35 = tpu.matmul %34, %32, %cst_45 {dimension_numbers = #tpu.dot_dimension_numbers<[1], [0], [0], [1], [0, 0, 1, 1], [], []>} : vector<4x4xf32>, vector<4x256xf32>, vector<4x256xf32> -> vector<4x256xf32>
    %36 = arith.addf %30, %35 : vector<4x256xf32>
    %c0_46 = arith.constant 0 : index
    %c1_47 = arith.constant 1 : index
    %c1_48 = arith.constant 1 : index
    %37 = vector.load %arg5[%c0_46, %c1_47, %c1_48] : memref<4x18x18xf32, #tpu.memory_space<vmem>>, vector<4x16x16xf32>
    %38 = vector.shape_cast %37 : vector<4x16x16xf32> to vector<4x256xf32>
    %c4 = arith.constant 4 : index
    %c0_49 = arith.constant 0 : index
    %c0_50 = arith.constant 0 : index
    %39 = vector.load %arg2[%c4, %c0_49, %c0_50] : memref<9x4x4xf32, #tpu.memory_space<vmem>>, vector<1x4x4xf32>
    %40 = vector.shape_cast %39 : vector<1x4x4xf32> to vector<4x4xf32>
    %cst_51 = arith.constant dense<0.000000e+00> : vector<4x256xf32>
    %41 = tpu.matmul %40, %38, %cst_51 {dimension_numbers = #tpu.dot_dimension_numbers<[1], [0], [0], [1], [0, 0, 1, 1], [], []>} : vector<4x4xf32>, vector<4x256xf32>, vector<4x256xf32> -> vector<4x256xf32>
    %42 = arith.addf %36, %41 : vector<4x256xf32>
    %c0_52 = arith.constant 0 : index
    %c1_53 = arith.constant 1 : index
    %c2_54 = arith.constant 2 : index
    %43 = vector.load %arg5[%c0_52, %c1_53, %c2_54] : memref<4x18x18xf32, #tpu.memory_space<vmem>>, vector<4x16x16xf32>
    %44 = vector.shape_cast %43 : vector<4x16x16xf32> to vector<4x256xf32>
    %c5 = arith.constant 5 : index
    %c0_55 = arith.constant 0 : index
    %c0_56 = arith.constant 0 : index
    %45 = vector.load %arg2[%c5, %c0_55, %c0_56] : memref<9x4x4xf32, #tpu.memory_space<vmem>>, vector<1x4x4xf32>
    %46 = vector.shape_cast %45 : vector<1x4x4xf32> to vector<4x4xf32>
    %cst_57 = arith.constant dense<0.000000e+00> : vector<4x256xf32>
    %47 = tpu.matmul %46, %44, %cst_57 {dimension_numbers = #tpu.dot_dimension_numbers<[1], [0], [0], [1], [0, 0, 1, 1], [], []>} : vector<4x4xf32>, vector<4x256xf32>, vector<4x256xf32> -> vector<4x256xf32>
    %48 = arith.addf %42, %47 : vector<4x256xf32>
    %c0_58 = arith.constant 0 : index
    %c2_59 = arith.constant 2 : index
    %c0_60 = arith.constant 0 : index
    %49 = vector.load %arg5[%c0_58, %c2_59, %c0_60] : memref<4x18x18xf32, #tpu.memory_space<vmem>>, vector<4x16x16xf32>
    %50 = vector.shape_cast %49 : vector<4x16x16xf32> to vector<4x256xf32>
    %c6 = arith.constant 6 : index
    %c0_61 = arith.constant 0 : index
    %c0_62 = arith.constant 0 : index
    %51 = vector.load %arg2[%c6, %c0_61, %c0_62] : memref<9x4x4xf32, #tpu.memory_space<vmem>>, vector<1x4x4xf32>
    %52 = vector.shape_cast %51 : vector<1x4x4xf32> to vector<4x4xf32>
    %cst_63 = arith.constant dense<0.000000e+00> : vector<4x256xf32>
    %53 = tpu.matmul %52, %50, %cst_63 {dimension_numbers = #tpu.dot_dimension_numbers<[1], [0], [0], [1], [0, 0, 1, 1], [], []>} : vector<4x4xf32>, vector<4x256xf32>, vector<4x256xf32> -> vector<4x256xf32>
    %54 = arith.addf %48, %53 : vector<4x256xf32>
    %c0_64 = arith.constant 0 : index
    %c2_65 = arith.constant 2 : index
    %c1_66 = arith.constant 1 : index
    %55 = vector.load %arg5[%c0_64, %c2_65, %c1_66] : memref<4x18x18xf32, #tpu.memory_space<vmem>>, vector<4x16x16xf32>
    %56 = vector.shape_cast %55 : vector<4x16x16xf32> to vector<4x256xf32>
    %c7 = arith.constant 7 : index
    %c0_67 = arith.constant 0 : index
    %c0_68 = arith.constant 0 : index
    %57 = vector.load %arg2[%c7, %c0_67, %c0_68] : memref<9x4x4xf32, #tpu.memory_space<vmem>>, vector<1x4x4xf32>
    %58 = vector.shape_cast %57 : vector<1x4x4xf32> to vector<4x4xf32>
    %cst_69 = arith.constant dense<0.000000e+00> : vector<4x256xf32>
    %59 = tpu.matmul %58, %56, %cst_69 {dimension_numbers = #tpu.dot_dimension_numbers<[1], [0], [0], [1], [0, 0, 1, 1], [], []>} : vector<4x4xf32>, vector<4x256xf32>, vector<4x256xf32> -> vector<4x256xf32>
    %60 = arith.addf %54, %59 : vector<4x256xf32>
    %c0_70 = arith.constant 0 : index
    %c2_71 = arith.constant 2 : index
    %c2_72 = arith.constant 2 : index
    %61 = vector.load %arg5[%c0_70, %c2_71, %c2_72] : memref<4x18x18xf32, #tpu.memory_space<vmem>>, vector<4x16x16xf32>
    %62 = vector.shape_cast %61 : vector<4x16x16xf32> to vector<4x256xf32>
    %c8 = arith.constant 8 : index
    %c0_73 = arith.constant 0 : index
    %c0_74 = arith.constant 0 : index
    %63 = vector.load %arg2[%c8, %c0_73, %c0_74] : memref<9x4x4xf32, #tpu.memory_space<vmem>>, vector<1x4x4xf32>
    %64 = vector.shape_cast %63 : vector<1x4x4xf32> to vector<4x4xf32>
    %cst_75 = arith.constant dense<0.000000e+00> : vector<4x256xf32>
    %65 = tpu.matmul %64, %62, %cst_75 {dimension_numbers = #tpu.dot_dimension_numbers<[1], [0], [0], [1], [0, 0, 1, 1], [], []>} : vector<4x4xf32>, vector<4x256xf32>, vector<4x256xf32> -> vector<4x256xf32>
    %66 = arith.addf %60, %65 : vector<4x256xf32>
    %cst_76 = arith.constant dense<0.000000e+00> : vector<4xf32>
    %67 = vector.multi_reduction <add>, %66, %cst_76 [1] : vector<4x256xf32> to vector<4xf32>
    %68 = vector.shape_cast %67 : vector<4xf32> to vector<4x1xf32>
    %69 = arith.mulf %66, %66 : vector<4x256xf32>
    %cst_77 = arith.constant dense<0.000000e+00> : vector<4xf32>
    %70 = vector.multi_reduction <add>, %69, %cst_77 [1] : vector<4x256xf32> to vector<4xf32>
    %71 = vector.shape_cast %70 : vector<4xf32> to vector<4x1xf32>
    %cst_78 = arith.constant 3.906250e-03 : f32
    %72 = vector.broadcast %cst_78 : f32 to vector<4x1xf32>
    %73 = arith.mulf %68, %72 : vector<4x1xf32>
    %cst_79 = arith.constant 3.906250e-03 : f32
    %74 = vector.broadcast %cst_79 : f32 to vector<4x1xf32>
    %75 = arith.mulf %71, %74 : vector<4x1xf32>
    %76 = arith.mulf %73, %73 : vector<4x1xf32>
    %77 = arith.subf %75, %76 : vector<4x1xf32>
    %cst_80 = arith.constant 0.000000e+00 : f32
    %78 = vector.broadcast %cst_80 : f32 to vector<4x1xf32>
    %79 = arith.maximumf %77, %78 : vector<4x1xf32>
    %80 = vector.broadcast %73 : vector<4x1xf32> to vector<4x256xf32>
    %81 = arith.subf %66, %80 : vector<4x256xf32>
    %cst_81 = arith.constant 9.99999974E-6 : f32
    %82 = vector.broadcast %cst_81 : f32 to vector<4x1xf32>
    %83 = arith.addf %79, %82 : vector<4x1xf32>
    %84 = math.rsqrt %83 : vector<4x1xf32>
    %85 = vector.broadcast %84 : vector<4x1xf32> to vector<4x256xf32>
    %86 = arith.mulf %81, %85 : vector<4x256xf32>
    %cst_82 = arith.constant 0.000000e+00 : f32
    %87 = vector.broadcast %cst_82 : f32 to vector<4x256xf32>
    %88 = arith.maximumf %86, %87 : vector<4x256xf32>
    %89 = vector.shape_cast %88 : vector<4x256xf32> to vector<4x16x16xf32>
    %c0_83 = arith.constant 0 : index
    %c1_84 = arith.constant 1 : index
    %c1_85 = arith.constant 1 : index
    %90 = vector.load %arg5[%c0_83, %c1_84, %c1_85] : memref<4x18x18xf32, #tpu.memory_space<vmem>>, vector<4x16x16xf32>
    tpu.vector_store %arg5[%c0_83, %c1_84, %c1_85], %89 {strides = array<i32>} : memref<4x18x18xf32, #tpu.memory_space<vmem>>, vector<4x16x16xf32>,
    %91 = vector.extract_strided_slice %89 {offsets = [0, 0, 1], sizes = [4, 16, 1], strides = [1, 1, 1]} : vector<4x16x16xf32> to vector<4x16x1xf32>
    %c0_86 = arith.constant 0 : index
    %c1_87 = arith.constant 1 : index
    %c0_88 = arith.constant 0 : index
    %92 = vector.load %arg5[%c0_86, %c1_87, %c0_88] : memref<4x18x18xf32, #tpu.memory_space<vmem>>, vector<4x16x1xf32>
    tpu.vector_store %arg5[%c0_86, %c1_87, %c0_88], %91 {strides = array<i32>} : memref<4x18x18xf32, #tpu.memory_space<vmem>>, vector<4x16x1xf32>,
    %93 = vector.extract_strided_slice %89 {offsets = [0, 0, 14], sizes = [4, 16, 1], strides = [1, 1, 1]} : vector<4x16x16xf32> to vector<4x16x1xf32>
    %c0_89 = arith.constant 0 : index
    %c1_90 = arith.constant 1 : index
    %c17_91 = arith.constant 17 : index
    %94 = vector.load %arg5[%c0_89, %c1_90, %c17_91] : memref<4x18x18xf32, #tpu.memory_space<vmem>>, vector<4x16x1xf32>
    tpu.vector_store %arg5[%c0_89, %c1_90, %c17_91], %93 {strides = array<i32>} : memref<4x18x18xf32, #tpu.memory_space<vmem>>, vector<4x16x1xf32>,
    %c0_92 = arith.constant 0 : index
    %c2_93 = arith.constant 2 : index
    %c0_94 = arith.constant 0 : index
    %95 = vector.load %arg5[%c0_92, %c2_93, %c0_94] : memref<4x18x18xf32, #tpu.memory_space<vmem>>, vector<4x1x18xf32>
    %c0_95 = arith.constant 0 : index
    %c0_96 = arith.constant 0 : index
    %c0_97 = arith.constant 0 : index
    %96 = vector.load %arg5[%c0_95, %c0_96, %c0_97] : memref<4x18x18xf32, #tpu.memory_space<vmem>>, vector<4x1x18xf32>
    tpu.vector_store %arg5[%c0_95, %c0_96, %c0_97], %95 {strides = array<i32>} : memref<4x18x18xf32, #tpu.memory_space<vmem>>, vector<4x1x18xf32>,
    %c0_98 = arith.constant 0 : index
    %c15_99 = arith.constant 15 : index
    %c0_100 = arith.constant 0 : index
    %97 = vector.load %arg5[%c0_98, %c15_99, %c0_100] : memref<4x18x18xf32, #tpu.memory_space<vmem>>, vector<4x1x18xf32>
    %c0_101 = arith.constant 0 : index
    %c17_102 = arith.constant 17 : index
    %c0_103 = arith.constant 0 : index
    %98 = vector.load %arg5[%c0_101, %c17_102, %c0_103] : memref<4x18x18xf32, #tpu.memory_space<vmem>>, vector<4x1x18xf32>
    tpu.vector_store %arg5[%c0_101, %c17_102, %c0_103], %97 {strides = array<i32>} : memref<4x18x18xf32, #tpu.memory_space<vmem>>, vector<4x1x18xf32>,
    %cst_104 = arith.constant 0.000000e+00 : f32
    %99 = vector.broadcast %cst_104 : f32 to vector<4x256xf32>
    %c0_105 = arith.constant 0 : index
    %c0_106 = arith.constant 0 : index
    %c0_107 = arith.constant 0 : index
    %100 = vector.load %arg5[%c0_105, %c0_106, %c0_107] : memref<4x18x18xf32, #tpu.memory_space<vmem>>, vector<4x16x16xf32>
    %101 = vector.shape_cast %100 : vector<4x16x16xf32> to vector<4x256xf32>
    %c0_108 = arith.constant 0 : index
    %c0_109 = arith.constant 0 : index
    %c0_110 = arith.constant 0 : index
    %102 = vector.load %arg3[%c0_108, %c0_109, %c0_110] : memref<9x4x4xf32, #tpu.memory_space<vmem>>, vector<1x4x4xf32>
    %103 = vector.shape_cast %102 : vector<1x4x4xf32> to vector<4x4xf32>
    %cst_111 = arith.constant dense<0.000000e+00> : vector<4x256xf32>
    %104 = tpu.matmul %103, %101, %cst_111 {dimension_numbers = #tpu.dot_dimension_numbers<[1], [0], [0], [1], [0, 0, 1, 1], [], []>} : vector<4x4xf32>, vector<4x256xf32>, vector<4x256xf32> -> vector<4x256xf32>
    %105 = arith.addf %99, %104 : vector<4x256xf32>
    %c0_112 = arith.constant 0 : index
    %c0_113 = arith.constant 0 : index
    %c1_114 = arith.constant 1 : index
    %106 = vector.load %arg5[%c0_112, %c0_113, %c1_114] : memref<4x18x18xf32, #tpu.memory_space<vmem>>, vector<4x16x16xf32>
    %107 = vector.shape_cast %106 : vector<4x16x16xf32> to vector<4x256xf32>
    %c1_115 = arith.constant 1 : index
    %c0_116 = arith.constant 0 : index
    %c0_117 = arith.constant 0 : index
    %108 = vector.load %arg3[%c1_115, %c0_116, %c0_117] : memref<9x4x4xf32, #tpu.memory_space<vmem>>, vector<1x4x4xf32>
    %109 = vector.shape_cast %108 : vector<1x4x4xf32> to vector<4x4xf32>
    %cst_118 = arith.constant dense<0.000000e+00> : vector<4x256xf32>
    %110 = tpu.matmul %109, %107, %cst_118 {dimension_numbers = #tpu.dot_dimension_numbers<[1], [0], [0], [1], [0, 0, 1, 1], [], []>} : vector<4x4xf32>, vector<4x256xf32>, vector<4x256xf32> -> vector<4x256xf32>
    %111 = arith.addf %105, %110 : vector<4x256xf32>
    %c0_119 = arith.constant 0 : index
    %c0_120 = arith.constant 0 : index
    %c2_121 = arith.constant 2 : index
    %112 = vector.load %arg5[%c0_119, %c0_120, %c2_121] : memref<4x18x18xf32, #tpu.memory_space<vmem>>, vector<4x16x16xf32>
    %113 = vector.shape_cast %112 : vector<4x16x16xf32> to vector<4x256xf32>
    %c2_122 = arith.constant 2 : index
    %c0_123 = arith.constant 0 : index
    %c0_124 = arith.constant 0 : index
    %114 = vector.load %arg3[%c2_122, %c0_123, %c0_124] : memref<9x4x4xf32, #tpu.memory_space<vmem>>, vector<1x4x4xf32>
    %115 = vector.shape_cast %114 : vector<1x4x4xf32> to vector<4x4xf32>
    %cst_125 = arith.constant dense<0.000000e+00> : vector<4x256xf32>
    %116 = tpu.matmul %115, %113, %cst_125 {dimension_numbers = #tpu.dot_dimension_numbers<[1], [0], [0], [1], [0, 0, 1, 1], [], []>} : vector<4x4xf32>, vector<4x256xf32>, vector<4x256xf32> -> vector<4x256xf32>
    %117 = arith.addf %111, %116 : vector<4x256xf32>
    %c0_126 = arith.constant 0 : index
    %c1_127 = arith.constant 1 : index
    %c0_128 = arith.constant 0 : index
    %118 = vector.load %arg5[%c0_126, %c1_127, %c0_128] : memref<4x18x18xf32, #tpu.memory_space<vmem>>, vector<4x16x16xf32>
    %119 = vector.shape_cast %118 : vector<4x16x16xf32> to vector<4x256xf32>
    %c3_129 = arith.constant 3 : index
    %c0_130 = arith.constant 0 : index
    %c0_131 = arith.constant 0 : index
    %120 = vector.load %arg3[%c3_129, %c0_130, %c0_131] : memref<9x4x4xf32, #tpu.memory_space<vmem>>, vector<1x4x4xf32>
    %121 = vector.shape_cast %120 : vector<1x4x4xf32> to vector<4x4xf32>
    %cst_132 = arith.constant dense<0.000000e+00> : vector<4x256xf32>
    %122 = tpu.matmul %121, %119, %cst_132 {dimension_numbers = #tpu.dot_dimension_numbers<[1], [0], [0], [1], [0, 0, 1, 1], [], []>} : vector<4x4xf32>, vector<4x256xf32>, vector<4x256xf32> -> vector<4x256xf32>
    %123 = arith.addf %117, %122 : vector<4x256xf32>
    %c0_133 = arith.constant 0 : index
    %c1_134 = arith.constant 1 : index
    %c1_135 = arith.constant 1 : index
    %124 = vector.load %arg5[%c0_133, %c1_134, %c1_135] : memref<4x18x18xf32, #tpu.memory_space<vmem>>, vector<4x16x16xf32>
    %125 = vector.shape_cast %124 : vector<4x16x16xf32> to vector<4x256xf32>
    %c4_136 = arith.constant 4 : index
    %c0_137 = arith.constant 0 : index
    %c0_138 = arith.constant 0 : index
    %126 = vector.load %arg3[%c4_136, %c0_137, %c0_138] : memref<9x4x4xf32, #tpu.memory_space<vmem>>, vector<1x4x4xf32>
    %127 = vector.shape_cast %126 : vector<1x4x4xf32> to vector<4x4xf32>
    %cst_139 = arith.constant dense<0.000000e+00> : vector<4x256xf32>
    %128 = tpu.matmul %127, %125, %cst_139 {dimension_numbers = #tpu.dot_dimension_numbers<[1], [0], [0], [1], [0, 0, 1, 1], [], []>} : vector<4x4xf32>, vector<4x256xf32>, vector<4x256xf32> -> vector<4x256xf32>
    %129 = arith.addf %123, %128 : vector<4x256xf32>
    %c0_140 = arith.constant 0 : index
    %c1_141 = arith.constant 1 : index
    %c2_142 = arith.constant 2 : index
    %130 = vector.load %arg5[%c0_140, %c1_141, %c2_142] : memref<4x18x18xf32, #tpu.memory_space<vmem>>, vector<4x16x16xf32>
    %131 = vector.shape_cast %130 : vector<4x16x16xf32> to vector<4x256xf32>
    %c5_143 = arith.constant 5 : index
    %c0_144 = arith.constant 0 : index
    %c0_145 = arith.constant 0 : index
    %132 = vector.load %arg3[%c5_143, %c0_144, %c0_145] : memref<9x4x4xf32, #tpu.memory_space<vmem>>, vector<1x4x4xf32>
    %133 = vector.shape_cast %132 : vector<1x4x4xf32> to vector<4x4xf32>
    %cst_146 = arith.constant dense<0.000000e+00> : vector<4x256xf32>
    %134 = tpu.matmul %133, %131, %cst_146 {dimension_numbers = #tpu.dot_dimension_numbers<[1], [0], [0], [1], [0, 0, 1, 1], [], []>} : vector<4x4xf32>, vector<4x256xf32>, vector<4x256xf32> -> vector<4x256xf32>
    %135 = arith.addf %129, %134 : vector<4x256xf32>
    %c0_147 = arith.constant 0 : index
    %c2_148 = arith.constant 2 : index
    %c0_149 = arith.constant 0 : index
    %136 = vector.load %arg5[%c0_147, %c2_148, %c0_149] : memref<4x18x18xf32, #tpu.memory_space<vmem>>, vector<4x16x16xf32>
    %137 = vector.shape_cast %136 : vector<4x16x16xf32> to vector<4x256xf32>
    %c6_150 = arith.constant 6 : index
    %c0_151 = arith.constant 0 : index
    %c0_152 = arith.constant 0 : index
    %138 = vector.load %arg3[%c6_150, %c0_151, %c0_152] : memref<9x4x4xf32, #tpu.memory_space<vmem>>, vector<1x4x4xf32>
    %139 = vector.shape_cast %138 : vector<1x4x4xf32> to vector<4x4xf32>
    %cst_153 = arith.constant dense<0.000000e+00> : vector<4x256xf32>
    %140 = tpu.matmul %139, %137, %cst_153 {dimension_numbers = #tpu.dot_dimension_numbers<[1], [0], [0], [1], [0, 0, 1, 1], [], []>} : vector<4x4xf32>, vector<4x256xf32>, vector<4x256xf32> -> vector<4x256xf32>
    %141 = arith.addf %135, %140 : vector<4x256xf32>
    %c0_154 = arith.constant 0 : index
    %c2_155 = arith.constant 2 : index
    %c1_156 = arith.constant 1 : index
    %142 = vector.load %arg5[%c0_154, %c2_155, %c1_156] : memref<4x18x18xf32, #tpu.memory_space<vmem>>, vector<4x16x16xf32>
    %143 = vector.shape_cast %142 : vector<4x16x16xf32> to vector<4x256xf32>
    %c7_157 = arith.constant 7 : index
    %c0_158 = arith.constant 0 : index
    %c0_159 = arith.constant 0 : index
    %144 = vector.load %arg3[%c7_157, %c0_158, %c0_159] : memref<9x4x4xf32, #tpu.memory_space<vmem>>, vector<1x4x4xf32>
    %145 = vector.shape_cast %144 : vector<1x4x4xf32> to vector<4x4xf32>
    %cst_160 = arith.constant dense<0.000000e+00> : vector<4x256xf32>
    %146 = tpu.matmul %145, %143, %cst_160 {dimension_numbers = #tpu.dot_dimension_numbers<[1], [0], [0], [1], [0, 0, 1, 1], [], []>} : vector<4x4xf32>, vector<4x256xf32>, vector<4x256xf32> -> vector<4x256xf32>
    %147 = arith.addf %141, %146 : vector<4x256xf32>
    %c0_161 = arith.constant 0 : index
    %c2_162 = arith.constant 2 : index
    %c2_163 = arith.constant 2 : index
    %148 = vector.load %arg5[%c0_161, %c2_162, %c2_163] : memref<4x18x18xf32, #tpu.memory_space<vmem>>, vector<4x16x16xf32>
    %149 = vector.shape_cast %148 : vector<4x16x16xf32> to vector<4x256xf32>
    %c8_164 = arith.constant 8 : index
    %c0_165 = arith.constant 0 : index
    %c0_166 = arith.constant 0 : index
    %150 = vector.load %arg3[%c8_164, %c0_165, %c0_166] : memref<9x4x4xf32, #tpu.memory_space<vmem>>, vector<1x4x4xf32>
    %151 = vector.shape_cast %150 : vector<1x4x4xf32> to vector<4x4xf32>
    %cst_167 = arith.constant dense<0.000000e+00> : vector<4x256xf32>
    %152 = tpu.matmul %151, %149, %cst_167 {dimension_numbers = #tpu.dot_dimension_numbers<[1], [0], [0], [1], [0, 0, 1, 1], [], []>} : vector<4x4xf32>, vector<4x256xf32>, vector<4x256xf32> -> vector<4x256xf32>
    %153 = arith.addf %147, %152 : vector<4x256xf32>
    %cst_168 = arith.constant dense<0.000000e+00> : vector<4xf32>
    %154 = vector.multi_reduction <add>, %153, %cst_168 [1] : vector<4x256xf32> to vector<4xf32>
    %155 = vector.shape_cast %154 : vector<4xf32> to vector<4x1xf32>
    %156 = arith.mulf %153, %153 : vector<4x256xf32>
    %cst_169 = arith.constant dense<0.000000e+00> : vector<4xf32>
    %157 = vector.multi_reduction <add>, %156, %cst_169 [1] : vector<4x256xf32> to vector<4xf32>
    %158 = vector.shape_cast %157 : vector<4xf32> to vector<4x1xf32>
    %cst_170 = arith.constant 3.906250e-03 : f32
    %159 = vector.broadcast %cst_170 : f32 to vector<4x1xf32>
    %160 = arith.mulf %155, %159 : vector<4x1xf32>
    %cst_171 = arith.constant 3.906250e-03 : f32
    %161 = vector.broadcast %cst_171 : f32 to vector<4x1xf32>
    %162 = arith.mulf %158, %161 : vector<4x1xf32>
    %163 = arith.mulf %160, %160 : vector<4x1xf32>
    %164 = arith.subf %162, %163 : vector<4x1xf32>
    %cst_172 = arith.constant 0.000000e+00 : f32
    %165 = vector.broadcast %cst_172 : f32 to vector<4x1xf32>
    %166 = arith.maximumf %164, %165 : vector<4x1xf32>
    %167 = vector.broadcast %160 : vector<4x1xf32> to vector<4x256xf32>
    %168 = arith.subf %153, %167 : vector<4x256xf32>
    %cst_173 = arith.constant 9.99999974E-6 : f32
    %169 = vector.broadcast %cst_173 : f32 to vector<4x1xf32>
    %170 = arith.addf %166, %169 : vector<4x1xf32>
    %171 = math.rsqrt %170 : vector<4x1xf32>
    %172 = vector.broadcast %171 : vector<4x1xf32> to vector<4x256xf32>
    %173 = arith.mulf %168, %172 : vector<4x256xf32>
    %174 = arith.addf %1, %173 : vector<4x256xf32>
    %c0_174 = arith.constant 0 : index
    %c0_175 = arith.constant 0 : index
    %c0_176 = arith.constant 0 : index
    %175 = vector.load %arg4[%c0_174, %c0_175, %c0_176] : memref<1x4x256xf32, #tpu.memory_space<vmem>>, vector<1x4x256xf32>
    %176 = vector.shape_cast %175 : vector<1x4x256xf32> to vector<4x256xf32>
    %177 = vector.shape_cast %174 : vector<4x256xf32> to vector<1x4x256xf32>
    tpu.vector_store %arg4[%c0_174, %c0_175, %c0_176], %177 {strides = array<i32>} : memref<1x4x256xf32, #tpu.memory_space<vmem>>, vector<1x4x256xf32>,
    return
  }
  func.func @transform_0(%arg0: i32) -> (i32, i32, i32) {
    %c0_i32 = arith.constant 0 : i32
    %c0_i32_0 = arith.constant 0 : i32
    %c0_i32_1 = arith.constant 0 : i32
    return %arg0, %c0_i32, %c0_i32_0 : i32, i32, i32
  }
  func.func @transform_1(%arg0: i32) -> (i32, i32, i32) {
    %c0_i32 = arith.constant 0 : i32
    %c0_i32_0 = arith.constant 0 : i32
    %c0_i32_1 = arith.constant 0 : i32
    %c0_i32_2 = arith.constant 0 : i32
    return %c0_i32, %c0_i32_0, %c0_i32_1 : i32, i32, i32
  }
  func.func @transform_2(%arg0: i32) -> (i32, i32, i32) {
    %c0_i32 = arith.constant 0 : i32
    %c0_i32_0 = arith.constant 0 : i32
    %c0_i32_1 = arith.constant 0 : i32
    %c0_i32_2 = arith.constant 0 : i32
    return %c0_i32, %c0_i32_0, %c0_i32_1 : i32, i32, i32
  }
  func.func @transform_3(%arg0: i32) -> (i32, i32, i32) {
    %c0_i32 = arith.constant 0 : i32
    %c0_i32_0 = arith.constant 0 : i32
    %c0_i32_1 = arith.constant 0 : i32
    return %arg0, %c0_i32, %c0_i32_0 : i32, i32, i32
  }
}

</mosaic_0001>

<bundles_post_ra>
// kernel: tpu_custom_call.1
= control target key start
LH: loop header
LB: loop body
LE: loop exit
PB: predicated region body
PF: predicated region fallthrough
CT: control target
= control target key end

     0   :  { %8 = vsyncpa [#allocation4], 0  ;;  %s10035_s0 = inlined_call_operand.vmem [shape: f32[2,4,256], index: 0, kind: input, shape index: {}]   ;;  %s10036_s1 = inlined_call_operand.vmem [shape: f32[9,4,4], index: 1, kind: input, shape index: {}]   ;;  %s10037_s2 = inlined_call_operand.vmem [shape: f32[9,4,4], index: 2, kind: input, shape index: {}]   ;;  %s10038_s3 = inlined_call_operand.hbm [shape: f32[2,4,256], index: 3, kind: output, shape index: {}]  }
   0x1   :  { %10 = vsyncpa [#allocation4 + $0x1], 0  ;;  %s6944_s12 = smov 0   ;;  %s6946_s13 = smov 0  }
   0x2   :  { %s6948_s14 = smov 0   ;;  %s6950_s15 = smov 0  }
   0x3 LB: > { %s6965_s16 = sadd.s32 4294967295, %s6907_s15   ;;  %s6643_s17 = sadd.s32 4294967294, %s6907_s15   ;;  %s6907_s15 = sphi %s6950_s15, %s10206_s15   ;;  %s6903_s14 = sphi %s6948_s14, %s10205_s14   ;;  %s6899_s13 = sphi %s6946_s13, %s10204_s13   ;;  %s6895_s12 = sphi %s6944_s12, %s10203_s12  }
   0x4   : > { %s6969_s18 = sadd.s32 1, %s6907_s15   ;;  %s91_s19 = sadd.s32 1, %s6903_s14 }
   0x5   : > { %s88_s20 = ssub.s32 %s6907_s15, %s6969_s18  ;;  %p101_p0 = scmp.ne.s32.totalorder %s6903_s14, %s6899_s13 }
   0x6   : > { %p89_p1 = scmp.eq.s32.totalorder %s88_s20, 0  ;;  %p102_p2 = scmp.eq.s32.totalorder %s6965_s16, 1 }
   0x7   : > { %p107_p3 = scmp.ne.s32.totalorder %s6899_s13, %s6895_s12  ;;  %p108_p4 = scmp.eq.s32.totalorder %s6643_s17, 1 }
   0x8   : > { %s6980_s21 = scalar_select %p89_p1, %s6903_s14, %s91_s19  }
   0x9   : > { %p6982_p5 = por %p102_p2, %p101_p0  ;;  %p6986_p6 = por %p108_p4, %p107_p3 }
   0xa   : > { %p6646_p7 = scmp.ge.s32.totalorder %s6907_s15, 1  ;;  %p140_p8 = scmp.lt.s32.totalorder %s6907_s15, 3 }
   0xc   : > { %p141_p9 = pnand %p6646_p7, %p140_p8 }
   0xe   : > { %144 = sbr.rel (%p141_p9) target bundleno = 2319 (0x90f), region = 32 }
  0x15   : > { %p164_p10 = scmp.lt.s32.totalorder %s6965_s16, 1  ;;  %s6909_s29 = smov 80   ;;  %v6916_v3 = vmov 1983009808   ;;  %v212_v5 = vlaneseq  ;;  %v6917_v11 = vmov 1934713408  }
  0x16   : > { %s6910_s30 = smov 112   ;;  %s6911_s4 = smov 64   ;;  %v210_v4 = vunpack.c.l.s4 %v6916_v3  ;;  %v227_v12 = vunpack.c.l.s4 %v6917_v11  ;;  %vm392_vm0 = vcmask 138248   ;;  %vm425_vm1 = vcmask 7168  }
  0x17   : > { %s165_s24 = scalar_select %p164_p10, %s6965_s16, 1  ;;  %v213_v9 = vshrl.u32 %v212_v5, 7  ;;  %vm458_vm2 = vcmask 146568   ;;  %vm471_vm3 = vcmask 139264   ;;  %vm684_vm4 = vcmask 130048  }
  0x18   : > { %s6912_s5 = smov 96   ;;  %s6913_s6 = smov 32   ;;  %v211_v8 = vunpack.c.0.s8 %v210_v4  ;;  %v228_v19 = vunpack.c.0.s8 %v227_v12  ;;  %vm686_vm5 = vcmask 261120   ;;  %vm688_vm6 = vcmask 392192  }
  0x19   : > { %s6729_s25 = sshll.u32 %s165_s24, 3  ;;  %s6914_s7 = smov 48   ;;  %vm690_vm7 = vcmask 523264   ;;  %vm692_vm8 = vcmask 654336   ;;  %vm694_vm9 = vcmask 785408   ;;  %vm950_vm10 = vcmask 1043456  }
  0x1a   : > { %s6997_s28 = scalar_lea.vmem %s10035_s0, %s6729_s25  ;;  %s6915_s8 = smov 16   ;;  %v7017_v15 = vsub.s32 %v211_v8, %v213_v9  ;;  %v7023_v26 = vsub.s32 %v228_v19, %v213_v9  ;;  %vm696_vm11 = vcmask 916480   ;;  %vm946_vm12 = vcmask 31744  }
  0x1b   : > { %v7000_v0 = vld [vmem:[%s6997_s28] sm:$0xff]  ;;  %s6918_s9 = smov 1   ;;  %s6919_s10 = smov 127  }
  0x1c   : > { %181 = vrot.lane.b32.xlu1 %v7000_v0, %s6909_s29  ;;  %173 = vrot.lane.b32.xlu0 %v7000_v0, %s6910_s30  ;;  %10066 = vst [vmem:[#allocation6_spill] sm:$0xff] %v7017_v15  ;;  %10067 = vst [vmem:[#allocation7_spill] sm:$0xff] %v7023_v26  ;;  %v171_v39 = vrot.slane %v7000_v0, 4  ;;  %s6920_s11 = smov 3   ;;  %s6922_s17 = smov 126  }
  0x20   : > { %185 = vrot.lane.b32.xlu1 %v7000_v0, %s6911_s4  ;;  %177 = vrot.lane.b32.xlu0 %v7000_v0, %s6912_s5 }
  0x24   : > { %193 = vrot.lane.b32.xlu1 %v7000_v0, %s6913_s6  ;;  %189 = vrot.lane.b32.xlu0 %v7000_v0, %s6914_s7 }
  0x28   : > { %197 = vrot.lane.b32.xlu0 %v7000_v0, %s6915_s8 }
  0x8e   : > { %v182_v1 = vpop.permute.xlu1 %181  ;;  %v174_v2 = vpop.permute.xlu0 %173 }
  0x8f   : > { %v216_v16 = vcombine.low %v174_v2, %v182_v1  ;;  %v183_v44 = vrot.slane %v182_v1, 4  ;;  %v175_v45 = vrot.slane %v174_v2, 4 }
  0x91   : > { %v223_v21 = vrot.slane %v216_v16, %v7017_v15  ;;  %v284_v49 = vcombine.low %v175_v45, %v183_v44 }
  0x92   : > { %v186_v6 = vpop.permute.xlu1 %185  ;;  %v178_v7 = vpop.permute.xlu0 %177 }
  0x93   : > { %v208_v10 = vcombine.low %v7000_v0, %v178_v7  ;;  %v187_v40 = vrot.slane %v186_v6, 4  ;;  %v179_v41 = vrot.slane %v178_v7, 4  ;;  %v291_v53 = vrot.slane %v284_v49, %v7017_v15 }
  0x94   : > { %v10039_v0 = vmov 0.0  }
  0x95   : > { %v215_v17 = vrot.slane %v208_v10, %v7017_v15  ;;  %v276_v47 = vcombine.low %v171_v39, %v179_v41  ;;  %1021 = vmatprep.mubr.f32.mxu0 %v10039_v0  ;;  %4207 = vmatprep.mubr.f32.mxu1 %v10039_v0 }
  0x96   : > { %v194_v13 = vpop.permute.xlu1 %193  ;;  %v190_v14 = vpop.permute.xlu0 %189 }
  0x97   : > { %v242_v18 = vcombine.low %v186_v6, %v194_v13  ;;  %v224_v23 = vcombine.low %v215_v17, %v223_v21  ;;  %v225_v29 = vcombine.high %v215_v17, %v223_v21  ;;  %v195_v42 = vrot.slane %v194_v13, 4 }
  0x98   : > { %v191_v43 = vrot.slane %v190_v14, 4  ;;  %v283_v51 = vrot.slane %v276_v47, %v7017_v15 }
  0x99   : > { %v249_v24 = vrot.slane %v242_v18, %v7017_v15  ;;  %v232_v30 = vrot.slane %v224_v23, %v7023_v26  ;;  %v239_v35 = vrot.slane %v225_v29, %v7023_v26  ;;  %v310_v48 = vcombine.low %v187_v40, %v195_v42 }
  0x9a   : > { %v198_v20 = vpop.permute.xlu0 %197  ;;  %v292_v55 = vcombine.low %v283_v51, %v291_v53  ;;  %v293_v59 = vcombine.high %v283_v51, %v291_v53 }
  0x9b   : > { %v250_v22 = vcombine.low %v190_v14, %v198_v20  ;;  %v199_v36 = vrot.slane %v198_v20, 4  ;;  %v317_v52 = vrot.slane %v310_v48, %v7017_v15 }
  0x9c   : > { %v300_v58 = vrot.slane %v292_v55, %v7023_v26  ;;  %v307_v63 = vrot.slane %v293_v59, %v7023_v26 }
  0x9d   : > { %v257_v25 = vrot.slane %v250_v22, %v7017_v15  ;;  %v318_v46 = vcombine.low %v191_v43, %v199_v36 }
  0x9f   : > { %v258_v27 = vcombine.low %v249_v24, %v257_v25  ;;  %v259_v28 = vcombine.high %v249_v24, %v257_v25  ;;  %v325_v50 = vrot.slane %v318_v46, %v7017_v15 }
  0xa1   : > { %v266_v31 = vrot.slane %v258_v27, %v7023_v26  ;;  %v273_v34 = vrot.slane %v259_v28, %v7023_v26  ;;  %v326_v54 = vcombine.low %v317_v52, %v325_v50  ;;  %v327_v57 = vcombine.high %v317_v52, %v325_v50 }
  0xa3   : > { %v6650_v32 = vcombine.high %v232_v30, %v266_v31  ;;  %v360_v33 = vcombine.low %v232_v30, %v266_v31  ;;  %v6652_v37 = vcombine.high %v239_v35, %v273_v34  ;;  %v364_v38 = vcombine.low %v239_v35, %v273_v34 }
  0xa4   : > { %v334_v56 = vrot.slane %v326_v54, %v7023_v26  ;;  %v341_v62 = vrot.slane %v327_v57, %v7023_v26 }
  0xa5   : > { %372 = vrot.lane.b32.xlu0 %v6650_v32, %s6918_s9  ;;  %368 = vrot.lane.b32.xlu1 %v360_v33, %s6918_s9 }
  0xa6   : > { %v6651_v60 = vcombine.high %v300_v58, %v334_v56  ;;  %v361_v61 = vcombine.low %v300_v58, %v334_v56  ;;  %v6653_v1 = vcombine.high %v307_v63, %v341_v62  ;;  %v365_v2 = vcombine.low %v307_v63, %v341_v62 }
  0xa9   : > { %380 = vrot.lane.b32.xlu0 %v6652_v37, %s6918_s9  ;;  %376 = vrot.lane.b32.xlu1 %v364_v38, %s6918_s9 }
  0xad   : > { %405 = vrot.lane.b32.xlu0 %v6650_v32, %s6919_s10  ;;  %401 = vrot.lane.b32.xlu1 %v360_v33, %s6919_s10 }
  0xb1   : > { %413 = vrot.lane.b32.xlu0 %v6652_v37, %s6919_s10  ;;  %409 = vrot.lane.b32.xlu1 %v364_v38, %s6919_s10 }
  0xb5   : > { %438 = vrot.lane.b32.xlu0 %v6650_v32, %s6920_s11  ;;  %434 = vrot.lane.b32.xlu1 %v360_v33, %s6920_s11 }
  0xb9   : > { %446 = vrot.lane.b32.xlu0 %v6652_v37, %s6920_s11  ;;  %442 = vrot.lane.b32.xlu1 %v364_v38, %s6920_s11 }
  0xbd   : > { %374 = vrot.lane.b32.xlu0 %v6651_v60, %s6918_s9  ;;  %370 = vrot.lane.b32.xlu1 %v361_v61, %s6918_s9 }
  0xc1   : > { %382 = vrot.lane.b32.xlu0 %v6653_v1, %s6918_s9  ;;  %378 = vrot.lane.b32.xlu1 %v365_v2, %s6918_s9 }
  0xc5   : > { %407 = vrot.lane.b32.xlu0 %v6651_v60, %s6919_s10  ;;  %403 = vrot.lane.b32.xlu1 %v361_v61, %s6919_s10 }
  0xc9   : > { %415 = vrot.lane.b32.xlu0 %v6653_v1, %s6919_s10  ;;  %411 = vrot.lane.b32.xlu1 %v365_v2, %s6919_s10 }
  0xcd   : > { %440 = vrot.lane.b32.xlu0 %v6651_v60, %s6920_s11  ;;  %436 = vrot.lane.b32.xlu1 %v361_v61, %s6920_s11 }
  0xd1   : > { %448 = vrot.lane.b32.xlu0 %v6653_v1, %s6920_s11  ;;  %444 = vrot.lane.b32.xlu1 %v365_v2, %s6920_s11 }
 0x117   : > { %v373_v3 = vpop.permute.xlu0 %372  ;;  %v369_v4 = vpop.permute.xlu1 %368 }
 0x118   : > { %395 = vst.msk [vmem:[#allocation2 + $0x19] sm:$0xff] %vm392_vm0, %v373_v3  ;;  %393 = vst.msk [vmem:[#allocation2 + $0x1] sm:$0xff] %vm392_vm0, %v369_v4 }
 0x11b   : > { %v381_v5 = vpop.permute.xlu0 %380  ;;  %v377_v6 = vpop.permute.xlu1 %376 }
 0x11c   : > { %399 = vst.msk [vmem:[#allocation2 + $0x49] sm:$0xff] %vm392_vm0, %v381_v5  ;;  %397 = vst.msk [vmem:[#allocation2 + $0x31] sm:$0xff] %vm392_vm0, %v377_v6 }
 0x11f   : > { %v406_v7 = vpop.permute.xlu0 %405  ;;  %v402_v8 = vpop.permute.xlu1 %401 }
 0x120   : > { %428 = vst.msk [vmem:[#allocation2 + $0x19] sm:$0xff] %vm425_vm1, %v406_v7  ;;  %426 = vst.msk [vmem:[#allocation2 + $0x1] sm:$0xff] %vm425_vm1, %v402_v8 }
 0x123   : > { %v414_v9 = vpop.permute.xlu0 %413  ;;  %v410_v10 = vpop.permute.xlu1 %409 }
 0x124   : > { %432 = vst.msk [vmem:[#allocation2 + $0x49] sm:$0xff] %vm425_vm1, %v414_v9  ;;  %430 = vst.msk [vmem:[#allocation2 + $0x31] sm:$0xff] %vm425_vm1, %v410_v10 }
 0x127   : > { %v439_v11 = vpop.permute.xlu0 %438  ;;  %v435_v12 = vpop.permute.xlu1 %434 }
 0x128   : > { %461 = vst.msk [vmem:[#allocation2 + $0x19] sm:$0xff] %vm458_vm2, %v439_v11  ;;  %459 = vst.msk [vmem:[#allocation2 + $0x1] sm:$0xff] %vm458_vm2, %v435_v12 }
 0x12b   : > { %v447_v13 = vpop.permute.xlu0 %446  ;;  %v443_v14 = vpop.permute.xlu1 %442 }
 0x12c   : > { %465 = vst.msk [vmem:[#allocation2 + $0x49] sm:$0xff] %vm458_vm2, %v447_v13  ;;  %463 = vst.msk [vmem:[#allocation2 + $0x31] sm:$0xff] %vm458_vm2, %v443_v14 }
 0x12f   : > { %v468_v16 = vld [vmem:[#allocation2 + $0x1a] sm:$0x1]  ;;  %v467_v17 = vld [vmem:[#allocation2 + $0x2] sm:$0x1]  ;;  %v375_v18 = vpop.permute.xlu0 %374  ;;  %v371_v19 = vpop.permute.xlu1 %370 }
 0x130   : > { %v7076_v20 = vld [vmem:[#allocation2 + $0x19] sm:$0xff]  ;;  %473 = vst.msk [vmem:[#allocation2 + $0x18] sm:$0x1] %vm471_vm3, %v468_v16  ;;  %472 = vst.msk [vmem:[#allocation2] sm:$0x1] %vm471_vm3, %v467_v17  ;;  %v7084_v21 = vld [vmem:[#allocation2 + $0x1] sm:$0xff] }
 0x131   : > { %396 = vst.msk [vmem:[#allocation2 + $0x21] sm:$0xff] %vm392_vm0, %v375_v18  ;;  %394 = vst.msk [vmem:[#allocation2 + $0x9] sm:$0xff] %vm392_vm0, %v371_v19  ;;  %1756 = vrot.lane.b32.xlu0 %v7076_v20, %s6919_s10  ;;  %1752 = vrot.lane.b32.xlu1 %v7084_v21, %s6919_s10 }
 0x133   : > { %v470_v22 = vld [vmem:[#allocation2 + $0x4a] sm:$0x1]  ;;  %v469_v23 = vld [vmem:[#allocation2 + $0x32] sm:$0x1]  ;;  %v383_v24 = vpop.permute.xlu0 %382  ;;  %v379_v25 = vpop.permute.xlu1 %378 }
 0x134   : > { %v7088_v27 = vld [vmem:[#allocation2 + $0x49] sm:$0xff]  ;;  %475 = vst.msk [vmem:[#allocation2 + $0x48] sm:$0x1] %vm471_vm3, %v470_v22  ;;  %474 = vst.msk [vmem:[#allocation2 + $0x30] sm:$0x1] %vm471_vm3, %v469_v23  ;;  %v7096_v28 = vld [vmem:[#allocation2 + $0x31] sm:$0xff] }
 0x135   : > { %400 = vst.msk [vmem:[#allocation2 + $0x51] sm:$0xff] %vm392_vm0, %v383_v24  ;;  %398 = vst.msk [vmem:[#allocation2 + $0x39] sm:$0xff] %vm392_vm0, %v379_v25  ;;  %1764 = vrot.lane.b32.xlu0 %v7088_v27, %s6919_s10  ;;  %1760 = vrot.lane.b32.xlu1 %v7096_v28, %s6919_s10  ;;  %v1446_v55 = vcombine.low %v7084_v21, %v7096_v28  ;;  %v1462_v56 = vcombine.low %v7076_v20, %v7088_v27 }
 0x136   : > { %v1447_v61 = vcombine.high %v7084_v21, %v7096_v28  ;;  %v1463_v62 = vcombine.high %v7076_v20, %v7088_v27 }
 0x137   : > { %v408_v29 = vpop.permute.xlu0 %407  ;;  %v404_v30 = vpop.permute.xlu1 %403  ;;  %v7192_v53 = vld [vmem:[#allocation2 + $0x18] sm:$0xff]  ;;  %v7196_v54 = vld [vmem:[#allocation2] sm:$0xff]  ;;  %v1454_v59 = vrot.slane %v1446_v55, %v7017_v15  ;;  %v1470_v60 = vrot.slane %v1462_v56, %v7017_v15 }
 0x138   : > { %429 = vst.msk [vmem:[#allocation2 + $0x21] sm:$0xff] %vm425_vm1, %v408_v29  ;;  %427 = vst.msk [vmem:[#allocation2 + $0x9] sm:$0xff] %vm425_vm1, %v404_v30  ;;  %v1461_v1 = vrot.slane %v1447_v61, %v7017_v15  ;;  %v1477_v2 = vrot.slane %v1463_v62, %v7017_v15 }
 0x139   : > { %2086 = vrot.lane.b32.xlu0 %v7076_v20, %s6922_s17  ;;  %2082 = vrot.lane.b32.xlu1 %v7084_v21, %s6922_s17  ;;  %v1479_v63 = vcombine.high %v1454_v59, %v1470_v60 }
 0x13a   : > { %v1494_v4 = vcombine.low %v1461_v1, %v1477_v2  ;;  %v1495_v7 = vcombine.high %v1461_v1, %v1477_v2 }
 0x13b   : > { %v416_v31 = vpop.permute.xlu0 %415  ;;  %v412_v32 = vpop.permute.xlu1 %411  ;;  %v7204_v57 = vld [vmem:[#allocation2 + $0x48] sm:$0xff]  ;;  %v7208_v58 = vld [vmem:[#allocation2 + $0x30] sm:$0xff]  ;;  %v1493_v3 = vrot.slane %v1479_v63, %v7023_v26 }
 0x13c   : > { %433 = vst.msk [vmem:[#allocation2 + $0x51] sm:$0xff] %vm425_vm1, %v416_v31  ;;  %431 = vst.msk [vmem:[#allocation2 + $0x39] sm:$0xff] %vm425_vm1, %v412_v32  ;;  %v1502_v6 = vrot.slane %v1494_v4, %v7023_v26  ;;  %v1509_v11 = vrot.slane %v1495_v7, %v7023_v26 }
 0x13d   : > { %2094 = vrot.lane.b32.xlu0 %v7088_v27, %s6922_s17  ;;  %2090 = vrot.lane.b32.xlu1 %v7096_v28, %s6922_s17  ;;  %v1478_v27 = vcombine.low %v1454_v59, %v1470_v60 }
 0x13e   : > { %v1512_v56 = vcombine.high %v1502_v6, %v10039_v0  ;;  %v1513_v4 = vcombine.high %v1509_v11, %v10039_v0 }
 0x13f   : > { %v441_v33 = vpop.permute.xlu0 %440  ;;  %v437_v34 = vpop.permute.xlu1 %436 }
 0x140   : > { %462 = vst.msk [vmem:[#allocation2 + $0x21] sm:$0xff] %vm458_vm2, %v441_v33  ;;  %460 = vst.msk [vmem:[#allocation2 + $0x9] sm:$0xff] %vm458_vm2, %v437_v34  ;;  %v7287_v34 = vrot.slane %v1478_v27, %v7023_v26 }
 0x142   : > { %10068 = vst [vmem:[#allocation8_spill] sm:$0xff] %v7287_v34 }
 0x143   : > { %v449_v35 = vpop.permute.xlu0 %448  ;;  %v445_v36 = vpop.permute.xlu1 %444 }
 0x144   : > { %466 = vst.msk [vmem:[#allocation2 + $0x51] sm:$0xff] %vm458_vm2, %v449_v35  ;;  %464 = vst.msk [vmem:[#allocation2 + $0x39] sm:$0xff] %vm458_vm2, %v445_v36 }
 0x147   : > { %v477_v37 = vld [vmem:[#allocation2 + $0x27] sm:$0x1]  ;;  %v476_v38 = vld [vmem:[#allocation2 + $0xf] sm:$0x1]  ;;  %v7168_v49 = vld [vmem:[#allocation2 + $0x1a] sm:$0xff] }
 0x148   : > { %v7116_v39 = vld [vmem:[#allocation2 + $0x20] sm:$0xff]  ;;  %481 = vst.msk [vmem:[#allocation2 + $0x29] sm:$0x1] %vm471_vm3, %v477_v37  ;;  %480 = vst.msk [vmem:[#allocation2 + $0x11] sm:$0x1] %vm471_vm3, %v476_v38  ;;  %v7122_v40 = vld [vmem:[#allocation2 + $0x8] sm:$0xff] }
 0x149   : > { %720 = vrot.lane.b32.xlu0 %v7116_v39, %s6919_s10  ;;  %716 = vrot.lane.b32.xlu1 %v7122_v40, %s6919_s10  ;;  %v7144_v45 = vld [vmem:[#allocation2 + $0x21] sm:$0xff]  ;;  %v7148_v46 = vld [vmem:[#allocation2 + $0x9] sm:$0xff] }
 0x14a   : > { %v7172_v50 = vld [vmem:[#allocation2 + $0x2] sm:$0xff] }
 0x14b   : > { %v479_v41 = vld [vmem:[#allocation2 + $0x57] sm:$0x1]  ;;  %v478_v42 = vld [vmem:[#allocation2 + $0x3f] sm:$0x1]  ;;  %v7176_v51 = vld [vmem:[#allocation2 + $0x4a] sm:$0xff] }
 0x14c   : > { %v7126_v43 = vld [vmem:[#allocation2 + $0x50] sm:$0xff]  ;;  %483 = vst.msk [vmem:[#allocation2 + $0x59] sm:$0x1] %vm471_vm3, %v479_v41  ;;  %482 = vst.msk [vmem:[#allocation2 + $0x41] sm:$0x1] %vm471_vm3, %v478_v42  ;;  %v7132_v44 = vld [vmem:[#allocation2 + $0x38] sm:$0xff]  ;;  %v2421_v63 = vcombine.high %v7168_v49, %v7176_v51 }
 0x14d   : > { %728 = vrot.lane.b32.xlu0 %v7126_v43, %s6919_s10  ;;  %724 = vrot.lane.b32.xlu1 %v7132_v44, %s6919_s10  ;;  %v7152_v47 = vld [vmem:[#allocation2 + $0x51] sm:$0xff]  ;;  %v7156_v48 = vld [vmem:[#allocation2 + $0x39] sm:$0xff]  ;;  %v560_v8 = vcombine.low %v7122_v40, %v7132_v44  ;;  %v576_v9 = vcombine.low %v7116_v39, %v7126_v43  ;;  %v561_v14 = vcombine.high %v7122_v40, %v7132_v44 }
 0x14e   : > { %v7180_v52 = vld [vmem:[#allocation2 + $0x32] sm:$0xff]  ;;  %v577_v16 = vcombine.high %v7116_v39, %v7126_v43  ;;  %v1514_v24 = vcombine.low %v7148_v46, %v7156_v48  ;;  %v1530_v25 = vcombine.low %v7144_v45, %v7152_v47  ;;  %v1515_v28 = vcombine.high %v7148_v46, %v7156_v48 }
 0x14f   : > { %v7230_v5 = vld [vmem:[#allocation2 + $0xa] sm:$0xff]  ;;  %v568_v12 = vrot.slane %v560_v8, %v7017_v15  ;;  %v584_v13 = vrot.slane %v576_v9, %v7017_v15  ;;  %v7254_v17 = vld [vmem:[#allocation2 + $0x22] sm:$0xff]  ;;  %v575_v19 = vrot.slane %v561_v14, %v7017_v15  ;;  %v1531_v29 = vcombine.high %v7144_v45, %v7152_v47 }
 0x150   : > { %v591_v20 = vrot.slane %v577_v16, %v7017_v15  ;;  %v7278_v32 = vrot.slane %v1514_v24, %v7017_v15  ;;  %v7281_v33 = vrot.slane %v1530_v25, %v7017_v15  ;;  %v1529_v37 = vrot.slane %v1515_v28, %v7017_v15 }
 0x151   : > { %1130 = vrot.lane.b32.xlu0 %v7116_v39, %s6922_s17  ;;  %1126 = vrot.lane.b32.xlu1 %v7122_v40, %s6922_s17  ;;  %v593_v18 = vcombine.high %v568_v12, %v584_v13  ;;  %v1545_v38 = vrot.slane %v1531_v29, %v7017_v15  ;;  %v1510_v39 = vcombine.high %v7287_v34, %v10039_v0 }
 0x152   : > { %v608_v23 = vcombine.low %v575_v19, %v591_v20  ;;  %v609_v31 = vcombine.high %v575_v19, %v591_v20  ;;  %v1547_v36 = vcombine.high %v7278_v32, %v7281_v33  ;;  %v592_v55 = vcombine.low %v568_v12, %v584_v13 }
 0x153   : > { %v7240_v10 = vld [vmem:[#allocation2 + $0x3a] sm:$0xff]  ;;  %v7262_v21 = vld [vmem:[#allocation2 + $0x52] sm:$0xff]  ;;  %v607_v22 = vrot.slane %v593_v18, %v7023_v26  ;;  %v1562_v41 = vcombine.low %v1529_v37, %v1545_v38  ;;  %v2405_v62 = vcombine.high %v7172_v50, %v7180_v52  ;;  %v1546_v18 = vcombine.low %v7278_v32, %v7281_v33 }
 0x154   : > { %v616_v30 = vrot.slane %v608_v23, %v7023_v26  ;;  %v623_v35 = vrot.slane %v609_v31, %v7023_v26  ;;  %v7300_v40 = vrot.slane %v1547_v36, %v7023_v26  ;;  %v492_v36 = vcombine.low %v7196_v54, %v7208_v58 }
 0x155   : > { %1138 = vrot.lane.b32.xlu0 %v7126_v43, %s6922_s17  ;;  %1134 = vrot.lane.b32.xlu1 %v7132_v44, %s6922_s17  ;;  %v1511_v44 = vcombine.high %v1493_v3, %v10039_v0  ;;  %v7375_v28 = vrot.slane %v1546_v18, %v7023_v26 }
 0x156   : > { %v626_v20 = vcombine.high %v616_v30, %v10039_v0  ;;  %v627_v27 = vcombine.high %v623_v35, %v10039_v0 }
 0x157   : > { %10070 = vst [vmem:[#allocation10_spill] sm:$0xff] %v7375_v28  ;;  %v1578_v32 = vcombine.high %v7375_v28, %v10039_v0 }
 0x159   : > { %1758 = vrot.lane.b32.xlu0 %v7144_v45, %s6919_s10  ;;  %1754 = vrot.lane.b32.xlu1 %v7148_v46, %s6919_s10 }
 0x15d   : > { %1766 = vrot.lane.b32.xlu0 %v7152_v47, %s6919_s10  ;;  %1762 = vrot.lane.b32.xlu1 %v7156_v48, %s6919_s10 }
 0x161   : > { %2088 = vrot.lane.b32.xlu0 %v7144_v45, %s6922_s17  ;;  %2084 = vrot.lane.b32.xlu1 %v7148_v46, %s6922_s17  ;;  %v2404_v45 = vcombine.low %v7172_v50, %v7180_v52  ;;  %v2420_v46 = vcombine.low %v7168_v49, %v7176_v51 }
 0x163   : > { %v2412_v60 = vrot.slane %v2404_v45, %v7017_v15  ;;  %v2428_v61 = vrot.slane %v2420_v46, %v7017_v15  ;;  %v493_v45 = vcombine.high %v7196_v54, %v7208_v58  ;;  %v509_v46 = vcombine.high %v7192_v53, %v7204_v57 }
 0x165   : > { %2096 = vrot.lane.b32.xlu0 %v7152_v47, %s6922_s17  ;;  %2092 = vrot.lane.b32.xlu1 %v7156_v48, %s6922_s17  ;;  %v7315_v47 = vrot.slane %v1562_v41, %v7023_v26  ;;  %v1563_v48 = vcombine.high %v1529_v37, %v1545_v38  ;;  %v2436_v13 = vcombine.low %v2412_v60, %v2428_v61 }
 0x166   : > { %v508_v37 = vcombine.low %v7192_v53, %v7204_v57  ;;  %v1579_v38 = vcombine.high %v7300_v40, %v10039_v0  ;;  %v2472_v41 = vcombine.low %v7230_v5, %v7240_v10 }
 0x167   : > { %v7332_v2 = vrot.slane %v1563_v48, %v7023_v26  ;;  %v7369_v24 = vrot.slane %v2436_v13, %v7023_v26 }
 0x169   : > { %2714 = vrot.lane.b32.xlu0 %v7168_v49, %s6919_s10  ;;  %2710 = vrot.lane.b32.xlu1 %v7172_v50, %s6919_s10  ;;  %10069 = vst [vmem:[#allocation9_spill] sm:$0xff] %v7369_v24 }
 0x16d   : > { %2722 = vrot.lane.b32.xlu0 %v7176_v51, %s6919_s10  ;;  %2718 = vrot.lane.b32.xlu1 %v7180_v52, %s6919_s10 }
 0x171   : > { %3044 = vrot.lane.b32.xlu0 %v7168_v49, %s6922_s17  ;;  %3040 = vrot.lane.b32.xlu1 %v7172_v50, %s6922_s17  ;;  %v2419_v50 = vrot.slane %v2405_v62, %v7017_v15  ;;  %v2435_v49 = vrot.slane %v2421_v63, %v7017_v15  ;;  %v2480_v62 = vrot.slane %v2472_v41, %v7017_v15 }
 0x173   : > { %v2452_v9 = vcombine.low %v2419_v50, %v2435_v49  ;;  %v2453_v16 = vcombine.high %v2419_v50, %v2435_v49  ;;  %v1581_v50 = vcombine.high %v7332_v2, %v10039_v0 }
 0x175   : > { %3052 = vrot.lane.b32.xlu0 %v7176_v51, %s6922_s17  ;;  %3048 = vrot.lane.b32.xlu1 %v7180_v52, %s6922_s17  ;;  %v2460_v14 = vrot.slane %v2452_v9, %v7023_v26  ;;  %v2467_v23 = vrot.slane %v2453_v16, %v7023_v26 }
 0x177   : > { %v2470_v48 = vcombine.high %v2460_v14, %v10039_v0 }
 0x179   : > { %718 = vrot.lane.b32.xlu0 %v7192_v53, %s6919_s10  ;;  %714 = vrot.lane.b32.xlu1 %v7196_v54, %s6919_s10 }
 0x17d   : > { %726 = vrot.lane.b32.xlu0 %v7204_v57, %s6919_s10  ;;  %722 = vrot.lane.b32.xlu1 %v7208_v58, %s6919_s10 }
 0x181   : > { %1128 = vrot.lane.b32.xlu0 %v7192_v53, %s6922_s17  ;;  %1124 = vrot.lane.b32.xlu1 %v7196_v54, %s6922_s17  ;;  %v2473_v53 = vcombine.high %v7230_v5, %v7240_v10 }
 0x185   : > { %1136 = vrot.lane.b32.xlu0 %v7204_v57, %s6922_s17  ;;  %1132 = vrot.lane.b32.xlu1 %v7208_v58, %s6922_s17  ;;  %v2489_v57 = vcombine.high %v7254_v17, %v7262_v21 }
 0x189   : > { %1587 = vrot.lane.b32.xlu0 %v1493_v3, %s6913_s6  ;;  %2712 = vrot.lane.b32.xlu1 %v7230_v5, %s6919_s10  ;;  %v7335_v3 = vrot.slane %v592_v55, %v7023_v26 }
 0x18b   : > { %v624_v51 = vcombine.high %v7335_v3, %v10039_v0 }
 0x18d   : > { %1595 = vrot.lane.b32.xlu0 %v1502_v6, %s6911_s4  ;;  %2720 = vrot.lane.b32.xlu1 %v7240_v10, %s6919_s10  ;;  %v2437_v6 = vcombine.high %v2412_v60, %v2428_v61  ;;  %v516_v60 = vrot.slane %v508_v37, %v7017_v15 }
 0x18f   : > { %v2451_v8 = vrot.slane %v2437_v6, %v7023_v26  ;;  %v523_v6 = vrot.slane %v509_v46, %v7017_v15 }
 0x191   : > { %1603 = vrot.lane.b32.xlu0 %v1509_v11, %s6912_s5  ;;  %3042 = vrot.lane.b32.xlu1 %v7230_v5, %s6922_s17  ;;  %v625_v11 = vcombine.high %v607_v22, %v10039_v0  ;;  %v2469_v33 = vcombine.high %v2451_v8, %v10039_v0 }
 0x195   : > { %2716 = vrot.lane.b32.xlu0 %v7254_v17, %s6919_s10  ;;  %3050 = vrot.lane.b32.xlu1 %v7240_v10, %s6922_s17 }
 0x199   : > { %2724 = vrot.lane.b32.xlu0 %v7262_v21, %s6919_s10  ;;  %661 = vrot.lane.b32.xlu1 %v607_v22, %s6913_s6 }
 0x19d   : > { %3046 = vrot.lane.b32.xlu0 %v7254_v17, %s6922_s17  ;;  %669 = vrot.lane.b32.xlu1 %v616_v30, %s6911_s4  ;;  %v2468_v30 = vcombine.high %v7369_v24, %v10039_v0 }
 0x1a1   : > { %3054 = vrot.lane.b32.xlu0 %v7262_v21, %s6922_s17  ;;  %677 = vrot.lane.b32.xlu1 %v623_v35, %s6912_s5 }
 0x1a3   : > { %v7302_v42 = vpop.permute.xlu0 %1756  ;;  %v7305_v43 = vpop.permute.xlu1 %1752 }
 0x1a5   : > { %1583 = vrot.lane.b32.xlu0 %v1510_v39, %s6915_s8  ;;  %1615 = vrot.lane.b32.xlu1 %v7300_v40, %s6913_s6  ;;  %v1580_v40 = vcombine.high %v7315_v47, %v10039_v0 }
 0x1a7   : > { %v7321_v59 = vpop.permute.xlu0 %1764  ;;  %v7329_v1 = vpop.permute.xlu1 %1760 }
 0x1a9   : > { %1591 = vrot.lane.b32.xlu0 %v1511_v44, %s6914_s7  ;;  %1623 = vrot.lane.b32.xlu1 %v7315_v47, %s6911_s4  ;;  %v2488_v44 = vcombine.low %v7254_v17, %v7262_v21  ;;  %v2471_v47 = vcombine.high %v2467_v23, %v10039_v0  ;;  %v2487_v17 = vrot.slane %v2473_v53, %v7017_v15 }
 0x1aa   : > { %v2503_v21 = vrot.slane %v2489_v57, %v7017_v15 }
 0x1ab   : > { %v7345_v52 = vpop.permute.xlu0 %2086  ;;  %v7348_v7 = vpop.permute.xlu1 %2082  ;;  %v2496_v54 = vrot.slane %v2488_v44, %v7017_v15 }
 0x1ad   : > { %1599 = vrot.lane.b32.xlu0 %v1512_v56, %s6909_s29  ;;  %1631 = vrot.lane.b32.xlu1 %v7332_v2, %s6912_s5  ;;  %v500_v56 = vrot.slane %v492_v36, %v7017_v15  ;;  %v2505_v10 = vcombine.high %v2480_v62, %v2496_v54 }
 0x1af   : > { %v7355_v12 = vpop.permute.xlu0 %2094  ;;  %v7360_v19 = vpop.permute.xlu1 %2090  ;;  %v525_v63 = vcombine.high %v500_v56, %v516_v60  ;;  %v2519_v2 = vrot.slane %v2505_v10, %v7023_v26  ;;  %v524_v18 = vcombine.low %v500_v56, %v516_v60  ;;  %v1776_v56 = vcombine.low %v7305_v43, %v7329_v1 }
 0x1b1   : > { %1607 = vrot.lane.b32.xlu0 %v1513_v4, %s6910_s30  ;;  %657 = vrot.lane.b32.xlu1 %v624_v51, %s6915_s8  ;;  %v507_v4 = vrot.slane %v493_v45, %v7017_v15  ;;  %v539_v51 = vrot.slane %v525_v63, %v7023_v26  ;;  %v7460_v36 = vrot.slane %v524_v18, %v7023_v26 }
 0x1b2   : > { %v1793_v63 = vcombine.high %v7302_v42, %v7321_v59  ;;  %v7505_v10 = vrot.slane %v1776_v56, %v7017_v15 }
 0x1b3   : > { %v541_v16 = vcombine.high %v507_v4, %v523_v6  ;;  %v556_v45 = vcombine.high %v7460_v36, %v10039_v0 }
 0x1b5   : > { %2545 = vrot.lane.b32.xlu0 %v2451_v8, %s6913_s6  ;;  %665 = vrot.lane.b32.xlu1 %v625_v11, %s6914_s7  ;;  %v540_v8 = vcombine.low %v507_v4, %v523_v6  ;;  %v2520_v11 = vcombine.low %v2487_v17, %v2503_v21  ;;  %v1777_v4 = vcombine.high %v7305_v43, %v7329_v1 }
 0x1b9   : > { %2553 = vrot.lane.b32.xlu0 %v2460_v14, %s6911_s4  ;;  %673 = vrot.lane.b32.xlu1 %v626_v20, %s6909_s29  ;;  %v548_v14 = vrot.slane %v540_v8, %v7023_v26  ;;  %v1807_v8 = vrot.slane %v1793_v63, %v7017_v15 }
 0x1bb   : > { %v7365_v22 = vpop.permute.xlu0 %720  ;;  %v7371_v25 = vpop.permute.xlu1 %716  ;;  %v558_v6 = vcombine.high %v548_v14, %v10039_v0 }
 0x1bd   : > { %2561 = vrot.lane.b32.xlu0 %v2467_v23, %s6912_s5  ;;  %681 = vrot.lane.b32.xlu1 %v627_v27, %s6910_s30  ;;  %v2528_v23 = vrot.slane %v2520_v11, %v7023_v26  ;;  %v2521_v27 = vcombine.high %v2487_v17, %v2503_v21 }
 0x1bf   : > { %v7379_v29 = vpop.permute.xlu0 %728  ;;  %v7383_v31 = vpop.permute.xlu1 %724 }
 0x1c0   : > { %v806_v53 = vcombine.low %v7371_v25, %v7383_v31  ;;  %v823_v17 = vcombine.high %v7365_v22, %v7379_v29  ;;  %v807_v21 = vcombine.high %v7371_v25, %v7383_v31 }
 0x1c1   : > { %2541 = vrot.lane.b32.xlu0 %v2468_v30, %s6915_s8  ;;  %1611 = vrot.lane.b32.xlu1 %v1578_v32, %s6915_s8  ;;  %v2504_v30 = vcombine.low %v2480_v62, %v2496_v54  ;;  %v557_v62 = vcombine.high %v539_v51, %v10039_v0  ;;  %v822_v54 = vcombine.low %v7365_v22, %v7379_v29 }
 0x1c2   : > { %v1791_v22 = vrot.slane %v1777_v4, %v7017_v15  ;;  %v837_v29 = vrot.slane %v823_v17, %v7017_v15  ;;  %v821_v31 = vrot.slane %v807_v21, %v7017_v15 }
 0x1c3   : > { %v7390_v35 = vpop.permute.xlu0 %1130  ;;  %v7398_v39 = vpop.permute.xlu1 %1126  ;;  %v7466_v41 = vrot.slane %v2504_v30, %v7023_v26  ;;  %v7514_v43 = vrot.slane %v822_v54, %v7017_v15  ;;  %v2106_v30 = vcombine.low %v7348_v7, %v7360_v19 }
 0x1c4   : > { %v1825_v54 = vcombine.high %v1791_v22, %v1807_v8  ;;  %v855_v17 = vcombine.high %v821_v31, %v837_v29 }
 0x1c5   : > { %2549 = vrot.lane.b32.xlu0 %v2469_v33, %s6914_s7  ;;  %1619 = vrot.lane.b32.xlu1 %v1579_v38, %s6914_s7  ;;  %v555_v33 = vrot.slane %v541_v16, %v7023_v26  ;;  %v2535_v38 = vrot.slane %v2521_v27, %v7023_v26  ;;  %10071 = vst [vmem:[#allocation11_spill] sm:$0xff] %v7466_v41 }
 0x1c6   : > { %v2122_v27 = vcombine.low %v7345_v52, %v7355_v12 }
 0x1c7   : > { %v7413_v55 = vpop.permute.xlu0 %1138  ;;  %v7417_v61 = vpop.permute.xlu1 %1134  ;;  %v559_v11 = vcombine.high %v555_v33, %v10039_v0  ;;  %v2539_v18 = vcombine.high %v2535_v38, %v10039_v0 }
 0x1c8   : > { %v7570_v4 = vrot.slane %v2122_v27, %v7017_v15 }
 0x1c9   : > { %2557 = vrot.lane.b32.xlu0 %v2470_v48, %s6909_s29  ;;  %1627 = vrot.lane.b32.xlu1 %v1580_v40, %s6909_s29  ;;  %v2536_v40 = vcombine.high %v7466_v41, %v10039_v0  ;;  %v1792_v48 = vcombine.low %v7302_v42, %v7321_v59  ;;  %v7517_v59 = vrot.slane %v806_v53, %v7017_v15 }
 0x1ca   : > { %v2123_v53 = vcombine.high %v7345_v52, %v7355_v12 }
 0x1cb   : > { %v7427_v58 = vpop.permute.xlu0 %1758  ;;  %v7434_v5 = vpop.permute.xlu1 %1754 }
 0x1cd   : > { %2565 = vrot.lane.b32.xlu0 %v2471_v47, %s6910_s30  ;;  %1635 = vrot.lane.b32.xlu1 %v1581_v50, %s6910_s30  ;;  %v2537_v47 = vcombine.high %v2519_v2, %v10039_v0  ;;  %v7502_v50 = vrot.slane %v1792_v48, %v7017_v15  ;;  %v1216_v48 = vcombine.low %v7398_v39, %v7417_v61 }
 0x1cf   : > { %v7440_v49 = vpop.permute.xlu0 %1766  ;;  %v7443_v9 = vpop.permute.xlu1 %1762  ;;  %v1809_v25 = vcombine.high %v7505_v10, %v7502_v50 }
 0x1d1   : > { %633 = vrot.lane.b32.xlu0 %v539_v51, %s6913_s6  ;;  %2573 = vrot.lane.b32.xlu1 %v2519_v2, %s6913_s6  ;;  %v2538_v51 = vcombine.high %v2528_v23, %v10039_v0 }
 0x1d3   : > { %v7448_v13 = vpop.permute.xlu0 %2088  ;;  %v7451_v20 = vpop.permute.xlu1 %2084 }
 0x1d5   : > { %641 = vrot.lane.b32.xlu0 %v548_v14, %s6911_s4  ;;  %2581 = vrot.lane.b32.xlu1 %v2528_v23, %s6911_s4  ;;  %v839_v14 = vcombine.high %v7517_v59, %v7514_v43  ;;  %v1824_v23 = vcombine.low %v1791_v22, %v1807_v8  ;;  %v2137_v22 = vrot.slane %v2123_v53, %v7017_v15 }
 0x1d6   : > { %v1808_v53 = vcombine.low %v7505_v10, %v7502_v50 }
 0x1d7   : > { %v7456_v32 = vpop.permute.xlu0 %2096  ;;  %v7462_v37 = vpop.permute.xlu1 %2092  ;;  %v7567_v63 = vrot.slane %v1824_v23, %v7023_v26 }
 0x1d9   : > { %649 = vrot.lane.b32.xlu0 %v555_v33, %s6912_s5  ;;  %2589 = vrot.lane.b32.xlu1 %v2535_v38, %s6912_s5  ;;  %v1232_v38 = vcombine.low %v7390_v35, %v7413_v55 }
 0x1db   : > { %v7470_v44 = vpop.permute.xlu0 %2714  ;;  %v7474_v46 = vpop.permute.xlu1 %2710  ;;  %v7583_v12 = vrot.slane %v1232_v38, %v7017_v15  ;;  %v1844_v38 = vcombine.low %v7434_v5, %v7443_v9 }
 0x1dd   : > { %629 = vrot.lane.b32.xlu0 %v556_v45, %s6915_s8  ;;  %2569 = vrot.lane.b32.xlu1 %v2536_v40, %s6915_s8  ;;  %v854_v45 = vcombine.low %v821_v31, %v837_v29  ;;  %v7547_v40 = vrot.slane %v1809_v25, %v7023_v26  ;;  %v7651_v50 = vrot.slane %v1844_v38, %v7017_v15  ;;  %v10076_v38 = vmov 0.0  }
 0x1df   : > { %v7484_v60 = vpop.permute.xlu0 %2722  ;;  %v7491_v57 = vpop.permute.xlu1 %2718  ;;  %v7578_v52 = vrot.slane %v854_v45, %v7023_v26  ;;  %v1860_v45 = vcombine.low %v7427_v58, %v7440_v49 }
 0x1e1   : > { %637 = vrot.lane.b32.xlu0 %v557_v62, %s6914_s7  ;;  %2577 = vrot.lane.b32.xlu1 %v2537_v47, %s6914_s7  ;;  %v7556_v62 = vrot.slane %v839_v14, %v7023_v26  ;;  %v2107_v47 = vcombine.high %v7348_v7, %v7360_v19  ;;  %v1233_v7 = vcombine.high %v7390_v35, %v7413_v55 }
 0x1e2   : > { %v1217_v19 = vcombine.high %v7398_v39, %v7417_v61  ;;  %v7603_v39 = vrot.slane %v1825_v54, %v7023_v26  ;;  %v7612_v14 = vrot.slane %v855_v17, %v7023_v26  ;;  %v1861_v17 = vcombine.high %v7427_v58, %v7440_v49 }
 0x1e3   : > { %v7511_v42 = vpop.permute.xlu0 %3044  ;;  %v7519_v1 = vpop.permute.xlu1 %3040  ;;  %v2121_v35 = vrot.slane %v2107_v47, %v7017_v15  ;;  %v1247_v61 = vrot.slane %v1233_v7, %v7017_v15  ;;  %v1845_v7 = vcombine.high %v7434_v5, %v7443_v9  ;;  %v7648_v0 = vrot.slane %v1860_v45, %v7017_v15 }
 0x1e4   : > { %v1231_v29 = vrot.slane %v1217_v19, %v7017_v15  ;;  %v1875_v58 = vrot.slane %v1861_v17, %v7017_v15  ;;  %v2174_v17 = vcombine.low %v7451_v20, %v7462_v37 }
 0x1e5   : > { %645 = vrot.lane.b32.xlu0 %v558_v6, %s6909_s29  ;;  %2585 = vrot.lane.b32.xlu1 %v2538_v51, %s6909_s29  ;;  %v7573_v6 = vrot.slane %v2106_v30, %v7017_v15  ;;  %v7588_v51 = vrot.slane %v1216_v48, %v7017_v15  ;;  %v2155_v47 = vcombine.high %v2121_v35, %v2137_v22 }
 0x1e6   : > { %v1264_v30 = vcombine.low %v1231_v29, %v1247_v61  ;;  %v1859_v5 = vrot.slane %v1845_v7, %v7017_v15 }
 0x1e7   : > { %v7530_v2 = vpop.permute.xlu0 %3052  ;;  %v7535_v16 = vpop.permute.xlu1 %3048  ;;  %v2139_v55 = vcombine.high %v7573_v6, %v7570_v4  ;;  %v1249_v31 = vcombine.high %v7588_v51, %v7583_v12  ;;  %v7667_v9 = vrot.slane %v2155_v47, %v7023_v26  ;;  %v2190_v47 = vcombine.low %v7448_v13, %v7456_v32 }
 0x1e8   : > { %v1893_v24 = vcombine.high %v1859_v5, %v1875_v58 }
 0x1e9   : > { %653 = vrot.lane.b32.xlu0 %v559_v11, %s6910_s30  ;;  %2593 = vrot.lane.b32.xlu1 %v2539_v18, %s6910_s30  ;;  %v2154_v18 = vcombine.low %v2121_v35, %v2137_v22  ;;  %v7621_v27 = vrot.slane %v2139_v55, %v7023_v26  ;;  %v7630_v54 = vrot.slane %v1249_v31, %v7023_v26 }
 0x1ea   : > { %v1265_v31 = vcombine.high %v1231_v29, %v1247_v61  ;;  %v7656_v22 = vrot.slane %v1264_v30, %v7023_v26  ;;  %v7670_v35 = vrot.slane %v1808_v53, %v7023_v26  ;;  %v1877_v61 = vcombine.high %v7651_v50, %v7648_v0 }
 0x1eb   : > { %v7544_v33 = vpop.permute.xlu0 %718  ;;  %v7553_v56 = vpop.permute.xlu1 %714  ;;  %v7645_v55 = vrot.slane %v2154_v18, %v7023_v26  ;;  %v1892_v30 = vcombine.low %v1859_v5, %v1875_v58 }
 0x1ec   : > { %10074 = vst [vmem:[#allocation14_spill] sm:$0xff] %v7670_v35  ;;  %v7677_v18 = vrot.slane %v1265_v31, %v7023_v26  ;;  %v1840_v53 = vcombine.high %v7670_v35, %v10076_v38  ;;  %v7694_v31 = vrot.slane %v1877_v61, %v7023_v26  ;;  %v7709_v61 = vrot.slane %v2190_v47, %v7017_v15 }
 0x1ed   : > { %1917 = vrot.lane.b32.xlu0 %v7547_v40, %s6913_s6  ;;  %907 = vrot.lane.b32.xlu1 %v7556_v62, %s6913_s6  ;;  %v7704_v35 = vrot.slane %v1892_v30, %v7023_v26 }
 0x1ef   : > { %v7575_v21 = vpop.permute.xlu0 %726  ;;  %v7590_v8 = vpop.permute.xlu1 %722 }
 0x1f1   : > { %1925 = vrot.lane.b32.xlu0 %v7567_v63, %s6911_s4  ;;  %915 = vrot.lane.b32.xlu1 %v7578_v52, %s6911_s4 }
 0x1f3   : > { %v7600_v25 = vpop.permute.xlu0 %1128  ;;  %v7609_v11 = vpop.permute.xlu1 %1124 }
 0x1f5   : > { %1933 = vrot.lane.b32.xlu0 %v7603_v39, %s6912_s5  ;;  %923 = vrot.lane.b32.xlu1 %v7612_v14, %s6912_s5 }
 0x1f7   : > { %v7618_v23 = vpop.permute.xlu0 %1136  ;;  %v7627_v48 = vpop.permute.xlu1 %1132 }
 0x1f9   : > { %2247 = vrot.lane.b32.xlu0 %v7621_v27, %s6913_s6  ;;  %1317 = vrot.lane.b32.xlu1 %v7630_v54, %s6913_s6 }
 0x1fb   : > { %v7642_v19 = vpop.permute.xlu0 %1587  ;;  %v7653_v10 = vpop.permute.xlu1 %2712 }
 0x1fc   : > { %10072 = vst [vmem:[#allocation12_spill] sm:$0xff] %v7642_v19  ;;  %v7714_v19 = vrot.slane %v2174_v17, %v7017_v15 }
 0x1fd   : > { %2255 = vrot.lane.b32.xlu0 %v7645_v55, %s6911_s4  ;;  %1325 = vrot.lane.b32.xlu1 %v7656_v22, %s6911_s4 }
 0x1fe   : > { %v2207_v5 = vcombine.high %v7714_v19, %v7709_v61 }
 0x1ff   : > { %v7664_v49 = vpop.permute.xlu0 %1595  ;;  %v7674_v29 = vpop.permute.xlu1 %2720 }
 0x200   : > { %10073 = vst [vmem:[#allocation13_spill] sm:$0xff] %v7664_v49  ;;  %v2191_v49 = vcombine.high %v7448_v13, %v7456_v32  ;;  %v1842_v32 = vcombine.high %v7567_v63, %v10076_v38  ;;  %v1843_v63 = vcombine.high %v7603_v39, %v10076_v38  ;;  %v7749_v17 = vrot.slane %v2207_v5, %v7023_v26 }
 0x201   : > { %2263 = vrot.lane.b32.xlu0 %v7667_v9, %s6912_s5  ;;  %1333 = vrot.lane.b32.xlu1 %v7677_v18, %s6912_s5  ;;  %v838_v39 = vcombine.low %v7517_v59, %v7514_v43  ;;  %v2750_v5 = vcombine.low %v7470_v44, %v7484_v60  ;;  %v2171_v43 = vcombine.high %v7621_v27, %v10076_v38 }
 0x202   : > { %v2172_v27 = vcombine.high %v7645_v55, %v10076_v38  ;;  %v738_v55 = vcombine.low %v7553_v56, %v7590_v8 }
 0x203   : > { %v7683_v45 = vpop.permute.xlu0 %1603  ;;  %v7691_v7 = vpop.permute.xlu1 %3042 }
 0x204   : > { %10075 = vst [vmem:[#allocation15_spill] sm:$0xff] %v7683_v45  ;;  %v1841_v45 = vcombine.high %v7547_v40, %v10076_v38  ;;  %v2138_v40 = vcombine.low %v7573_v6, %v7570_v4 }
 0x205   : > { %1913 = vrot.lane.b32.xlu0 %v1840_v53, %s6915_s8  ;;  %1945 = vrot.lane.b32.xlu1 %v7694_v31, %s6913_s6  ;;  %v2175_v53 = vcombine.high %v7451_v20, %v7462_v37  ;;  %v2205_v20 = vrot.slane %v2191_v49, %v7017_v15 }
 0x206   : > { %v7744_v6 = vrot.slane %v2138_v40, %v7023_v26 }
 0x207   : > { %v7699_v41 = vpop.permute.xlu0 %2716  ;;  %v7716_v58 = vpop.permute.xlu1 %3050  ;;  %v2189_v37 = vrot.slane %v2175_v53, %v7017_v15 }
 0x208   : > { %10077 = vst [vmem:[#allocation16_spill] sm:$0xff] %v7744_v6  ;;  %v2170_v53 = vcombine.high %v7744_v6, %v10076_v38 }
 0x209   : > { %1921 = vrot.lane.b32.xlu0 %v1841_v45, %s6914_s7  ;;  %1953 = vrot.lane.b32.xlu1 %v7704_v35, %s6911_s4  ;;  %v7734_v45 = vrot.slane %v1893_v24, %v7023_v26  ;;  %v2222_v49 = vcombine.low %v2189_v37, %v2205_v20  ;;  %v2223_v40 = vcombine.high %v2189_v37, %v2205_v20 }
 0x20a   : > { %v7782_v37 = vrot.slane %v838_v39, %v7023_v26 }
 0x20b   : > { %v7723_v13 = vpop.permute.xlu0 %2724  ;;  %v7731_v30 = vpop.permute.xlu1 %661  ;;  %v7763_v28 = vrot.slane %v2222_v49, %v7023_v26  ;;  %v7779_v20 = vrot.slane %v2223_v40, %v7023_v26  ;;  %v2758_v49 = vrot.slane %v2750_v5, %v7017_v15  ;;  %v2173_v40 = vcombine.high %v7667_v9, %v10076_v38 }
 0x20c   : > { %v870_v39 = vcombine.high %v7782_v37, %v10076_v38  ;;  %v755_v9 = vcombine.high %v7544_v33, %v7575_v21 }
 0x20d   : > { %1929 = vrot.lane.b32.xlu0 %v1842_v32, %s6909_s29  ;;  %1961 = vrot.lane.b32.xlu1 %v7734_v45, %s6912_s5 }
 0x20f   : > { %v7739_v4 = vpop.permute.xlu0 %3046  ;;  %v7746_v47 = vpop.permute.xlu1 %669 }
 0x211   : > { %1937 = vrot.lane.b32.xlu0 %v1843_v63, %s6910_s30  ;;  %2275 = vrot.lane.b32.xlu1 %v7749_v17, %s6913_s6  ;;  %v2734_v63 = vcombine.low %v7474_v46, %v7491_v57 }
 0x213   : > { %v7754_v24 = vpop.permute.xlu0 %3054  ;;  %v7760_v32 = vpop.permute.xlu1 %677 }
 0x215   : > { %2243 = vrot.lane.b32.xlu0 %v2170_v53, %s6915_s8  ;;  %2283 = vrot.lane.b32.xlu1 %v7763_v28, %s6911_s4  ;;  %v2742_v53 = vrot.slane %v2734_v63, %v7017_v15  ;;  %v754_v63 = vcombine.low %v7544_v33, %v7575_v21  ;;  %v1248_v33 = vcombine.low %v7588_v51, %v7583_v12 }
 0x216   : > { %v872_v21 = vcombine.high %v7578_v52, %v10076_v38  ;;  %v873_v52 = vcombine.high %v7612_v14, %v10076_v38 }
 0x217   : > { %v7772_v6 = vpop.permute.xlu0 %1583  ;;  %v7776_v59 = vpop.permute.xlu1 %1615  ;;  %v2766_v5 = vcombine.low %v2742_v53, %v2758_v49 }
 0x218   : > { %10078 = vst [vmem:[#allocation17_spill] sm:$0xff] %v7772_v6  ;;  %10079 = vst [vmem:[#allocation18_spill] sm:$0xff] %v7776_v59 }
 0x219   : > { %2251 = vrot.lane.b32.xlu0 %v2171_v43, %s6914_s7  ;;  %2291 = vrot.lane.b32.xlu1 %v7779_v20, %s6912_s5  ;;  %v2767_v43 = vcombine.high %v2742_v53, %v2758_v49  ;;  %v739_v49 = vcombine.high %v7553_v56, %v7590_v8  ;;  %v7818_v53 = vrot.slane %v754_v63, %v7017_v15 }
 0x21a   : > { %v769_v8 = vrot.slane %v755_v9, %v7017_v15  ;;  %v1164_v9 = vcombine.low %v7600_v25, %v7618_v23 }
 0x21b   : > { %v7789_v34 = vpop.permute.xlu0 %1591  ;;  %v7793_v59 = vpop.permute.xlu1 %1623  ;;  %v753_v63 = vrot.slane %v739_v49, %v7017_v15  ;;  %v1148_v49 = vcombine.low %v7609_v11, %v7627_v48 }
 0x21c   : > { %10080 = vst [vmem:[#allocation19_spill] sm:$0xff] %v7789_v34  ;;  %10081 = vst [vmem:[#allocation20_spill] sm:$0xff] %v7793_v59 }
 0x21d   : > { %2259 = vrot.lane.b32.xlu0 %v2172_v27, %s6909_s29  ;;  %903 = vrot.lane.b32.xlu1 %v870_v39, %s6915_s8  ;;  %v871_v27 = vcombine.high %v7556_v62, %v10076_v38  ;;  %v7821_v39 = vrot.slane %v738_v55, %v7017_v15  ;;  %v7826_v62 = vrot.slane %v2767_v43, %v7023_v26 }
 0x21e   : > { %v7853_v55 = vrot.slane %v1248_v33, %v7023_v26  ;;  %v787_v33 = vcombine.high %v753_v63, %v769_v8 }
 0x21f   : > { %v7805_v34 = vpop.permute.xlu0 %1599  ;;  %v7807_v59 = vpop.permute.xlu1 %1631 }
 0x220   : > { %10082 = vst [vmem:[#allocation21_spill] sm:$0xff] %v7805_v34  ;;  %10083 = vst [vmem:[#allocation22_spill] sm:$0xff] %v7807_v59  ;;  %v1280_v14 = vcombine.high %v7853_v55, %v10076_v38 }
 0x221   : > { %2267 = vrot.lane.b32.xlu0 %v2173_v40, %s6910_s30  ;;  %911 = vrot.lane.b32.xlu1 %v871_v27, %s6914_s7  ;;  %v7829_v40 = vrot.slane %v2766_v5, %v7023_v26  ;;  %v771_v5 = vcombine.high %v7821_v39, %v7818_v53  ;;  %v786_v27 = vcombine.low %v753_v63, %v769_v8 }
 0x222   : > { %v1281_v8 = vcombine.high %v7630_v54, %v10076_v38  ;;  %v801_v63 = vrot.slane %v787_v33, %v7023_v26  ;;  %v1282_v54 = vcombine.high %v7656_v22, %v10076_v38  ;;  %v1283_v33 = vcombine.high %v7677_v18, %v10076_v38 }
 0x223   : > { %v7823_v59 = vpop.permute.xlu0 %1607  ;;  %10085 = vst [vmem:[#allocation24_spill] sm:$0xff] %v7829_v40  ;;  %v7833_v56 = vpop.permute.xlu1 %657  ;;  %v2798_v12 = vcombine.high %v7829_v40, %v10076_v38  ;;  %v785_v40 = vrot.slane %v771_v5, %v7023_v26  ;;  %v1149_v5 = vcombine.high %v7609_v11, %v7627_v48 }
 0x224   : > { %10084 = vst [vmem:[#allocation23_spill] sm:$0xff] %v7823_v59  ;;  %v7874_v59 = vrot.slane %v1164_v9, %v7017_v15 }
 0x225   : > { %2875 = vrot.lane.b32.xlu0 %v7826_v62, %s6913_s6  ;;  %919 = vrot.lane.b32.xlu1 %v872_v21, %s6909_s29 }
 0x227   : > { %v7844_v43 = vpop.permute.xlu0 %2545  ;;  %v7848_v51 = vpop.permute.xlu1 %665 }
 0x228   : > { %10086 = vst [vmem:[#allocation25_spill] sm:$0xff] %v7844_v43 }
 0x229   : > { %2871 = vrot.lane.b32.xlu0 %v2798_v12, %s6915_s8  ;;  %927 = vrot.lane.b32.xlu1 %v873_v52, %s6910_s30  ;;  %v794_v12 = vrot.slane %v786_v27, %v7023_v26  ;;  %v1165_v52 = vcombine.high %v7600_v25, %v7618_v23  ;;  %v1163_v23 = vrot.slane %v1149_v5, %v7017_v15 }
 0x22a   : > { %v1876_v27 = vcombine.low %v7651_v50, %v7648_v0  ;;  %v770_v50 = vcombine.low %v7821_v39, %v7818_v53 }
 0x22b   : > { %v7861_v21 = vpop.permute.xlu0 %2553  ;;  %v7864_v43 = vpop.permute.xlu1 %673  ;;  %v1179_v25 = vrot.slane %v1165_v52, %v7017_v15 }
 0x22c   : > { %10087 = vst [vmem:[#allocation26_spill] sm:$0xff] %v7861_v21  ;;  %v7879_v21 = vrot.slane %v1148_v49, %v7017_v15  ;;  %v7912_v0 = vrot.slane %v1876_v27, %v7023_v26  ;;  %v7936_v39 = vrot.slane %v770_v50, %v7023_v26 }
 0x22d   : > { %879 = vrot.lane.b32.xlu0 %v785_v40, %s6913_s6  ;;  %1313 = vrot.lane.b32.xlu1 %v1280_v14, %s6915_s8  ;;  %v1196_v49 = vcombine.low %v1163_v23, %v1179_v25  ;;  %v1197_v22 = vcombine.high %v1163_v23, %v1179_v25  ;;  %v1909_v23 = vcombine.high %v7694_v31, %v10076_v38 }
 0x22e   : > { %v1181_v11 = vcombine.high %v7879_v21, %v7874_v59  ;;  %v1908_v18 = vcombine.high %v7912_v0, %v10076_v38 }
 0x22f   : > { %v7881_v34 = vpop.permute.xlu0 %2561  ;;  %v7883_v6 = vpop.permute.xlu1 %681  ;;  %v7933_v53 = vrot.slane %v1197_v22, %v7023_v26  ;;  %v2206_v22 = vcombine.low %v7714_v19, %v7709_v61 }
 0x230   : > { %10088 = vst [vmem:[#allocation27_spill] sm:$0xff] %v7881_v34  ;;  %v1195_v52 = vrot.slane %v1181_v11, %v7023_v26  ;;  %v7921_v11 = vrot.slane %v1196_v49, %v7023_v26  ;;  %v1911_v34 = vcombine.high %v7734_v45, %v10076_v38 }
 0x231   : > { %887 = vrot.lane.b32.xlu0 %v794_v12, %s6911_s4  ;;  %1321 = vrot.lane.b32.xlu1 %v1281_v8, %s6914_s7  ;;  %v7965_v19 = vrot.slane %v2206_v22, %v7023_v26 }
 0x233   : > { %v7893_v48 = vpop.permute.xlu0 %2541  ;;  %v7898_v9 = vpop.permute.xlu1 %1611 }
 0x234   : > { %10089 = vst [vmem:[#allocation28_spill] sm:$0xff] %v7893_v48 }
 0x235   : > { %895 = vrot.lane.b32.xlu0 %v801_v63, %s6912_s5  ;;  %1329 = vrot.lane.b32.xlu1 %v1282_v54, %s6909_s29 }
 0x237   : > { %v7904_v14 = vpop.permute.xlu0 %2549  ;;  %v7907_v5 = vpop.permute.xlu1 %1619 }
 0x238   : > { %10090 = vst [vmem:[#allocation29_spill] sm:$0xff] %v7904_v14 }
 0x239   : > { %1289 = vrot.lane.b32.xlu0 %v1195_v52, %s6913_s6  ;;  %1337 = vrot.lane.b32.xlu1 %v1283_v33, %s6910_s30  ;;  %v802_v33 = vcombine.high %v7936_v39, %v10076_v38 }
 0x23b   : > { %v7918_v8 = vpop.permute.xlu0 %2557  ;;  %v7923_v54 = vpop.permute.xlu1 %1627 }
 0x23c   : > { %10091 = vst [vmem:[#allocation30_spill] sm:$0xff] %v7918_v8 }
 0x23d   : > { %1297 = vrot.lane.b32.xlu0 %v7921_v11, %s6911_s4  ;;  %1941 = vrot.lane.b32.xlu1 %v1908_v18, %s6915_s8  ;;  %v1910_v18 = vcombine.high %v7704_v35, %v10076_v38  ;;  %v1180_v35 = vcombine.low %v7879_v21, %v7874_v59  ;;  %v2818_v59 = vcombine.low %v7699_v41, %v7723_v13 }
 0x23f   : > { %v7930_v27 = vpop.permute.xlu0 %2565  ;;  %v7938_v25 = vpop.permute.xlu1 %1635  ;;  %v7984_v22 = vrot.slane %v1180_v35, %v7023_v26  ;;  %v2819_v35 = vcombine.high %v7699_v41, %v7723_v13  ;;  %v1213_v41 = vcombine.high %v1195_v52, %v10076_v38  ;;  %v2735_v52 = vcombine.high %v7474_v46, %v7491_v57 }
 0x240   : > { %10092 = vst [vmem:[#allocation31_spill] sm:$0xff] %v7930_v27 }
 0x241   : > { %1305 = vrot.lane.b32.xlu0 %v7933_v53, %s6912_s5  ;;  %1949 = vrot.lane.b32.xlu1 %v1909_v23, %s6914_s7  ;;  %v803_v23 = vcombine.high %v785_v40, %v10076_v38  ;;  %v2833_v13 = vrot.slane %v2819_v35, %v7017_v15  ;;  %v1214_v35 = vcombine.high %v7921_v11, %v10076_v38 }
 0x242   : > { %v1215_v11 = vcombine.high %v7933_v53, %v10076_v38 }
 0x243   : > { %v7945_v49 = vpop.permute.xlu0 %633  ;;  %v7951_v50 = vpop.permute.xlu1 %2573 }
 0x244   : > { %10093 = vst [vmem:[#allocation32_spill] sm:$0xff] %v7951_v50 }
 0x245   : > { %875 = vrot.lane.b32.xlu0 %v802_v33, %s6915_s8  ;;  %1957 = vrot.lane.b32.xlu1 %v1910_v18, %s6909_s29  ;;  %v804_v33 = vcombine.high %v794_v12, %v10076_v38  ;;  %v2238_v18 = vcombine.high %v7965_v19, %v10076_v38  ;;  %v2239_v12 = vcombine.high %v7749_v17, %v10076_v38 }
 0x246   : > { %v2240_v17 = vcombine.high %v7763_v28, %v10076_v38 }
 0x247   : > { %v7957_v31 = vpop.permute.xlu0 %641  ;;  %v7960_v27 = vpop.permute.xlu1 %2581 }
 0x248   : > { %10094 = vst [vmem:[#allocation33_spill] sm:$0xff] %v7960_v27 }
 0x249   : > { %883 = vrot.lane.b32.xlu0 %v803_v23, %s6914_s7  ;;  %1965 = vrot.lane.b32.xlu1 %v1911_v34, %s6910_s30  ;;  %v805_v34 = vcombine.high %v801_v63, %v10076_v38  ;;  %v2802_v23 = vcombine.low %v7653_v10, %v7674_v29  ;;  %v1212_v63 = vcombine.high %v7984_v22, %v10076_v38 }
 0x24b   : > { %v7971_v61 = vpop.permute.xlu0 %649  ;;  %v7974_v40 = vpop.permute.xlu1 %2589 }
 0x24c   : > { %10095 = vst [vmem:[#allocation34_spill] sm:$0xff] %v7974_v40 }
 0x24d   : > { %891 = vrot.lane.b32.xlu0 %v804_v33, %s6909_s29  ;;  %2271 = vrot.lane.b32.xlu1 %v2238_v18, %s6915_s8  ;;  %v8003_v18 = vrot.slane %v2818_v59, %v7017_v15 }
 0x24f   : > { %v7980_v45 = vpop.permute.xlu0 %629  ;;  %v7988_v21 = vpop.permute.xlu1 %2569 }
 0x251   : > { %899 = vrot.lane.b32.xlu0 %v805_v34, %s6910_s30  ;;  %2279 = vrot.lane.b32.xlu1 %v2239_v12, %s6914_s7  ;;  %v2803_v34 = vcombine.high %v7653_v10, %v7674_v29  ;;  %v8013_v12 = vrot.slane %v2802_v23, %v7017_v15  ;;  %v2751_v29 = vcombine.high %v7470_v44, %v7484_v60 }
 0x252   : > { %v3132_v44 = vcombine.low %v7691_v7, %v7716_v58  ;;  %v2749_v60 = vrot.slane %v2735_v52, %v7017_v15 }
 0x253   : > { %v7996_v33 = vpop.permute.xlu0 %637  ;;  %v8005_v8 = vpop.permute.xlu1 %2577  ;;  %v2835_v59 = vcombine.high %v8013_v12, %v8003_v18  ;;  %v2817_v10 = vrot.slane %v2803_v34, %v7017_v15  ;;  %v2765_v46 = vrot.slane %v2751_v29, %v7017_v15  ;;  %v3133_v29 = vcombine.high %v7691_v7, %v7716_v58 }
 0x254   : > { %10096 = vst [vmem:[#allocation35_spill] sm:$0xff] %v8005_v8  ;;  %v8064_v52 = vrot.slane %v3132_v44, %v7017_v15 }
 0x255   : > { %1285 = vrot.lane.b32.xlu0 %v1212_v63, %s6915_s8  ;;  %2287 = vrot.lane.b32.xlu1 %v2240_v17, %s6909_s29  ;;  %v2241_v63 = vcombine.high %v7779_v20, %v10076_v38  ;;  %v2850_v17 = vcombine.low %v2817_v10, %v2833_v13  ;;  %v3148_v20 = vcombine.low %v7739_v4, %v7754_v24 }
 0x256   : > { %v2849_v34 = vrot.slane %v2835_v59, %v7023_v26  ;;  %v3149_v59 = vcombine.high %v7739_v4, %v7754_v24  ;;  %v2782_v53 = vcombine.low %v2749_v60, %v2765_v46  ;;  %v2799_v4 = vcombine.high %v7826_v62, %v10076_v38 }
 0x257   : > { %v8016_v40 = vpop.permute.xlu0 %645  ;;  %v8022_v28 = vpop.permute.xlu1 %2585  ;;  %v2858_v14 = vrot.slane %v2850_v17, %v7023_v26  ;;  %v8081_v58 = vrot.slane %v3133_v29, %v7017_v15  ;;  %v3080_v62 = vcombine.low %v7511_v42, %v7530_v2 }
 0x258   : > { %10097 = vst [vmem:[#allocation36_spill] sm:$0xff] %v8022_v28  ;;  %v8072_v24 = vrot.slane %v3149_v59, %v7017_v15  ;;  %v2783_v28 = vcombine.high %v2749_v60, %v2765_v46 }
 0x259   : > { %1293 = vrot.lane.b32.xlu0 %v1213_v41, %s6914_s7  ;;  %2295 = vrot.lane.b32.xlu1 %v2241_v63, %s6910_s30  ;;  %v2851_v63 = vcombine.high %v2817_v10, %v2833_v13  ;;  %v3088_v27 = vrot.slane %v3080_v62, %v7017_v15 }
 0x25a   : > { %v3180_v59 = vcombine.low %v8081_v58, %v8072_v24 }
 0x25b   : > { %v8033_v23 = vpop.permute.xlu0 %653  ;;  %v8039_v41 = vpop.permute.xlu1 %2593  ;;  %v2865_v7 = vrot.slane %v2851_v63, %v7023_v26  ;;  %v2834_v63 = vcombine.low %v8013_v12, %v8003_v18 }
 0x25c   : > { %10098 = vst [vmem:[#allocation37_spill] sm:$0xff] %v8039_v41  ;;  %v3188_v8 = vrot.slane %v3180_v59, %v7023_v26 }
 0x25d   : > { %1301 = vrot.lane.b32.xlu0 %v1214_v35, %s6909_s29  ;;  %2903 = vrot.lane.b32.xlu1 %v2849_v34, %s6913_s6  ;;  %v8055_v35 = vrot.slane %v3148_v20, %v7017_v15  ;;  %v3064_v20 = vcombine.low %v7519_v1, %v7535_v16  ;;  %v8109_v50 = vrot.slane %v2834_v63, %v7023_v26 }
 0x25f   : > { %v8048_v57 = vpop.permute.xlu0 %1917  ;;  %v8057_v41 = vpop.permute.xlu1 %907  ;;  %v3165_v10 = vcombine.high %v8064_v52, %v8055_v35  ;;  %v3072_v48 = vrot.slane %v3064_v20, %v7017_v15  ;;  %10099 = vst [vmem:[#allocation38_spill] sm:$0xff] %v8109_v50  ;;  %v2866_v20 = vcombine.high %v8109_v50, %v10076_v38  ;;  %v3081_v50 = vcombine.high %v7511_v42, %v7530_v2 }
 0x261   : > { %1309 = vrot.lane.b32.xlu0 %v1215_v11, %s6910_s30  ;;  %2911 = vrot.lane.b32.xlu1 %v2858_v14, %s6911_s4  ;;  %v2790_v11 = vrot.slane %v2782_v53, %v7023_v26  ;;  %v3096_v46 = vcombine.low %v3072_v48, %v3088_v27  ;;  %v3095_v42 = vrot.slane %v3081_v50, %v7017_v15 }
 0x263   : > { %v8067_v13 = vpop.permute.xlu0 %1925  ;;  %v8076_v17 = vpop.permute.xlu1 %915  ;;  %v2800_v18 = vcombine.high %v2790_v11, %v10076_v38  ;;  %v8126_v59 = vrot.slane %v3096_v46, %v7023_v26 }
 0x265   : > { %2879 = vrot.lane.b32.xlu0 %v2799_v4, %s6914_s7  ;;  %2919 = vrot.lane.b32.xlu1 %v2865_v7, %s6912_s5  ;;  %v3179_v4 = vrot.slane %v3165_v10, %v7023_v26  ;;  %v2797_v10 = vrot.slane %v2783_v28, %v7023_v26  ;;  %10102 = vst [vmem:[#allocation41_spill] sm:$0xff] %v8126_v59 }
 0x266   : > { %v2867_v28 = vcombine.high %v2849_v34, %v10076_v38  ;;  %v3128_v46 = vcombine.high %v8126_v59, %v10076_v38 }
 0x267   : > { %v8088_v44 = vpop.permute.xlu0 %1933  ;;  %v8095_v29 = vpop.permute.xlu1 %923  ;;  %v2801_v63 = vcombine.high %v2797_v10, %v10076_v38 }
 0x269   : > { %2883 = vrot.lane.b32.xlu0 %v2790_v11, %s6911_s4  ;;  %3233 = vrot.lane.b32.xlu1 %v3179_v4, %s6913_s6 }
 0x26b   : > { %v8102_v53 = vpop.permute.xlu0 %2247  ;;  %v8105_v12 = vpop.permute.xlu1 %1317 }
 0x26d   : > { %2887 = vrot.lane.b32.xlu0 %v2800_v18, %s6909_s29  ;;  %3241 = vrot.lane.b32.xlu1 %v3188_v8, %s6911_s4 }
 0x26f   : > { %v8113_v60 = vpop.permute.xlu0 %2255  ;;  %v8116_v62 = vpop.permute.xlu1 %1325 }
 0x270   : > { %10100 = vst [vmem:[#allocation39_spill] sm:$0xff] %v8113_v60 }
 0x271   : > { %2891 = vrot.lane.b32.xlu0 %v2797_v10, %s6912_s5  ;;  %2899 = vrot.lane.b32.xlu1 %v2866_v20, %s6915_s8  ;;  %v3065_v20 = vcombine.high %v7519_v1, %v7535_v16  ;;  %v3164_v10 = vcombine.low %v8064_v52, %v8055_v35 }
 0x273   : > { %v8122_v11 = vpop.permute.xlu0 %2263  ;;  %v8128_v18 = vpop.permute.xlu1 %1333  ;;  %v3079_v1 = vrot.slane %v3065_v20, %v7017_v15  ;;  %v8157_v35 = vrot.slane %v3164_v10, %v7023_v26  ;;  %v3197_v10 = vcombine.high %v3179_v4, %v10076_v38 }
 0x274   : > { %10101 = vst [vmem:[#allocation40_spill] sm:$0xff] %v8122_v11  ;;  %v3097_v11 = vcombine.high %v3072_v48, %v3088_v27  ;;  %v2869_v27 = vcombine.high %v2865_v7, %v10076_v38 }
 0x275   : > { %2895 = vrot.lane.b32.xlu0 %v2801_v63, %s6910_s30  ;;  %2907 = vrot.lane.b32.xlu1 %v2867_v28, %s6914_s7  ;;  %v2868_v63 = vcombine.high %v2858_v14, %v10076_v38  ;;  %10103 = vst [vmem:[#allocation42_spill] sm:$0xff] %v8157_v35  ;;  %v3112_v14 = vcombine.low %v3079_v1, %v3095_v42 }
 0x276   : > { %v3111_v16 = vrot.slane %v3097_v11, %v7023_v26  ;;  %v3196_v11 = vcombine.high %v8157_v35, %v10076_v38 }
 0x277   : > { %v8137_v60 = vpop.permute.xlu0 %1913  ;;  %v8143_v34 = vpop.permute.xlu1 %1945  ;;  %v3120_v20 = vrot.slane %v3112_v14, %v7023_v26  ;;  %v3198_v14 = vcombine.high %v3188_v8, %v10076_v38 }
 0x278   : > { %v3129_v50 = vcombine.high %v3111_v16, %v10076_v38 }
 0x279   : > { %3201 = vrot.lane.b32.xlu0 %v3128_v46, %s6915_s8  ;;  %2915 = vrot.lane.b32.xlu1 %v2868_v63, %s6909_s29  ;;  %v3113_v63 = vcombine.high %v3079_v1, %v3095_v42 }
 0x27b   : > { %v8150_v2 = vpop.permute.xlu0 %1921  ;;  %v8153_v48 = vpop.permute.xlu1 %1953 }
 0x27d   : > { %3205 = vrot.lane.b32.xlu0 %v3111_v16, %s6913_s6  ;;  %2923 = vrot.lane.b32.xlu1 %v2869_v27, %s6910_s30  ;;  %v3130_v27 = vcombine.high %v3120_v20, %v10076_v38 }
 0x27f   : > { %v8161_v52 = vpop.permute.xlu0 %1929  ;;  %v8164_v28 = vpop.permute.xlu1 %1961 }
 0x281   : > { %3209 = vrot.lane.b32.xlu0 %v3129_v50, %s6914_s7  ;;  %3229 = vrot.lane.b32.xlu1 %v3196_v11, %s6915_s8  ;;  %v3181_v50 = vcombine.high %v8081_v58, %v8072_v24 }
 0x283   : > { %v8170_v7 = vpop.permute.xlu0 %1937  ;;  %v8173_v46 = vpop.permute.xlu1 %2275  ;;  %v3195_v1 = vrot.slane %v3181_v50, %v7023_v26 }
 0x284   : > { %10104 = vst [vmem:[#allocation43_spill] sm:$0xff] %v8170_v7 }
 0x285   : > { %3213 = vrot.lane.b32.xlu0 %v3120_v20, %s6911_s4  ;;  %3237 = vrot.lane.b32.xlu1 %v3197_v10, %s6914_s7  ;;  %v3127_v10 = vrot.slane %v3113_v63, %v7023_v26  ;;  %v3199_v20 = vcombine.high %v3195_v1, %v10076_v38 }
 0x287   : > { %v8178_v16 = vpop.permute.xlu0 %2243  ;;  %v8183_v11 = vpop.permute.xlu1 %2283  ;;  %v3131_v8 = vcombine.high %v3127_v10, %v10076_v38 }
 0x289   : > { %3217 = vrot.lane.b32.xlu0 %v3130_v27, %s6909_s29  ;;  %3245 = vrot.lane.b32.xlu1 %v3198_v14, %s6909_s29 }
 0x28b   : > { %v8188_v4 = vpop.permute.xlu0 %2251  ;;  %v8191_v42 = vpop.permute.xlu1 %2291 }
 0x28c   : > { %10105 = vst [vmem:[#allocation44_spill] sm:$0xff] %v8188_v4  ;;  %10106 = vst [vmem:[#allocation45_spill] sm:$0xff] %v8191_v42 }
 0x28d   : > { %3221 = vrot.lane.b32.xlu0 %v3127_v10, %s6912_s5  ;;  %3249 = vrot.lane.b32.xlu1 %v3195_v1, %s6912_s5 }
 0x28f   : > { %v8196_v24 = vpop.permute.xlu0 %2259  ;;  %v904_v58 = vpop.permute.xlu1 %903 }
 0x290   : > { %10107 = vst [vmem:[#allocation46_spill] sm:$0xff] %v8196_v24  ;;  %v937_v27 = vsel %vm684_vm4, %v7782_v37, %v904_v58 }
 0x291   : > { %3225 = vrot.lane.b32.xlu0 %v3131_v8, %s6910_s30  ;;  %3253 = vrot.lane.b32.xlu1 %v3199_v20, %s6910_s30  ;;  %v938_v50 = vsel %vm686_vm5, %v937_v27, %v8057_v41 }
 0x293   : > { %v8204_v63 = vpop.permute.xlu0 %2267  ;;  %v912_v14 = vpop.permute.xlu1 %911 }
 0x294   : > { %10108 = vst [vmem:[#allocation47_spill] sm:$0xff] %v8204_v63  ;;  %v939_v10 = vsel %vm688_vm6, %v938_v50, %v912_v14 }
 0x295   : > { %v940_v37 = vsel %vm690_vm7, %v939_v10, %v8076_v17 }
 0x297   : > { %v8209_v26 = vpop.permute.xlu0 %2875  ;;  %v920_v1 = vpop.permute.xlu1 %919 }
 0x298   : > { %10109 = vst [vmem:[#allocation48_spill] sm:$0xff] %v8209_v26  ;;  %v941_v8 = vsel %vm692_vm8, %v940_v37, %v920_v1 }
 0x299   : > { %v942_v41 = vsel %vm694_vm9, %v941_v8, %v8095_v29 }
 0x29b   : > { %v8214_v58 = vpop.permute.xlu0 %2871  ;;  %v928_v20 = vpop.permute.xlu1 %927 }
 0x29c   : > { %10110 = vst [vmem:[#allocation49_spill] sm:$0xff] %v8214_v58  ;;  %v943_v27 = vsel %vm696_vm11, %v942_v41, %v928_v20  ;;  %v698_v41 = vsel %vm684_vm4, %v7335_v3, %v7833_v56 }
 0x29d   : > { %6655 = vmatprep.subr.msk.mxu0 %vm950_vm10, %v943_v27  ;;  %v685_v27 = vsel %vm684_vm4, %v7460_v36, %v7980_v45  ;;  %v699_v7 = vsel %vm686_vm5, %v698_v41, %v7731_v30  ;;  %v10112_v41 = vld [vmem:[#allocation8_spill] sm:$0xff] }
 0x29e   : > { %v700_v3 = vsel %vm688_vm6, %v699_v7, %v7848_v51  ;;  %v687_v56 = vsel %vm686_vm5, %v685_v27, %v7945_v49  ;;  %v10113_v27 = vld [vmem:[#allocation10_spill] sm:$0xff] }
 0x29f   : > { %v880_v50 = vpop.permute.xlu0 %879  ;;  %v1314_v14 = vpop.permute.xlu1 %1313  ;;  %v689_v36 = vsel %vm688_vm6, %v687_v56, %v7996_v33 }
 0x2a0   : > { %v1347_v24 = vsel %vm684_vm4, %v7853_v55, %v1314_v14  ;;  %v691_v33 = vsel %vm690_vm7, %v689_v36, %v7957_v31  ;;  %v6654_v14 = vld [vmem:[%s10036_s1 + $0x4] sm:$0xf] }
 0x2a1   : > { %v1348_v55 = vsel %vm686_vm5, %v1347_v24, %v8105_v12  ;;  %v693_v12 = vsel %vm692_vm8, %v691_v33, %v8016_v40  ;;  %v10114_v36 = vld [vmem:[#allocation12_spill] sm:$0xff] }
 0x2a3   : > { %v888_v15 = vpop.permute.xlu0 %887  ;;  %v1322_v17 = vpop.permute.xlu1 %1321 }
 0x2a4   : > { %v1349_v45 = vsel %vm688_vm6, %v1348_v55, %v1322_v17 }
 0x2a5   : > { %v1350_v7 = vsel %vm690_vm7, %v1349_v45, %v8116_v62  ;;  %v695_v62 = vsel %vm694_vm9, %v693_v12, %v7971_v61  ;;  %v10115_v45 = vld [vmem:[#allocation18_spill] sm:$0xff]  ;;  %v10117_v12 = vld [vmem:[#allocation13_spill] sm:$0xff] }
 0x2a7   : > { %v896_v10 = vpop.permute.xlu0 %895  ;;  %v1330_v59 = vpop.permute.xlu1 %1329 }
 0x2ab   : > { %v1290_v37 = vpop.permute.xlu0 %1289  ;;  %v1338_v1 = vpop.permute.xlu1 %1337 }
 0x2af   : > { %v8220_v35 = vpop.permute.xlu0 %1297  ;;  %v1942_v26 = vpop.permute.xlu1 %1941 }
 0x2b3   : > { %v8222_v58 = vpop.permute.xlu0 %1305  ;;  %v8224_v63 = vpop.permute.xlu1 %1949 }
 0x2b7   : > { %v876_v29 = vpop.permute.xlu0 %875  ;;  %v8228_v20 = vpop.permute.xlu1 %1957 }
 0x2b8   : > { %v930_v8 = vsel %vm684_vm4, %v7936_v39, %v876_v29 }
 0x2b9   : > { %v931_v42 = vsel %vm686_vm5, %v930_v8, %v880_v50 }
 0x2bb   : > { %v884_v4 = vpop.permute.xlu0 %883  ;;  %v8242_v29 = vpop.permute.xlu1 %1965 }
 0x2bc   : > { %v932_v39 = vsel %vm688_vm6, %v931_v42, %v884_v4  ;;  %v701_v4 = vsel %vm690_vm7, %v700_v3, %v7746_v47 }
 0x2bd   : > { %v933_v30 = vsel %vm690_vm7, %v932_v39, %v888_v15  ;;  %v702_v49 = vsel %vm692_vm8, %v701_v4, %v7864_v43  ;;  %v1351_v15 = vsel %vm692_vm8, %v1350_v7, %v1330_v59  ;;  %v697_v59 = vsel %vm696_vm11, %v695_v62, %v8033_v23  ;;  %v10111_v23 = vld [vmem:[#allocation17_spill] sm:$0xff] }
 0x2be   : > { %v703_v43 = vsel %vm694_vm9, %v702_v49, %v7760_v32  ;;  %v1645_v39 = vsel %vm684_vm4, %v10113_v27, %v7898_v9  ;;  %v10116_v9 = vld [vmem:[#allocation19_spill] sm:$0xff] }
 0x2bf   : > { %v892_v50 = vpop.permute.xlu0 %891  ;;  %v2272_v51 = vpop.permute.xlu1 %2271  ;;  %v704_v40 = vsel %vm696_vm11, %v703_v43, %v7883_v6 }
 0x2c0   : > { %v934_v42 = vsel %vm692_vm8, %v933_v30, %v892_v50  ;;  %v1646_v30 = vsel %vm686_vm5, %v1645_v39, %v10115_v45  ;;  %v2305_v62 = vsel %vm684_vm4, %v7965_v19, %v2272_v51 }
 0x2c1   : > { %v935_v47 = vsel %vm694_vm9, %v934_v42, %v896_v10  ;;  %v1352_v10 = vsel %vm694_vm9, %v1351_v15, %v8128_v18  ;;  %v1638_v18 = vsel %vm684_vm4, %v10112_v41, %v10111_v23  ;;  %v10118_v15 = vld [vmem:[#allocation20_spill] sm:$0xff]  ;;  %v10123_v23 = vld [vmem:[#allocation23_spill] sm:$0xff]  ;;  %v2306_v27 = vsel %vm686_vm5, %v2305_v62, %v8173_v46 }
 0x2c2   : > { %v1353_v32 = vsel %vm696_vm11, %v1352_v10, %v1338_v1  ;;  %v1975_v1 = vsel %vm684_vm4, %v7912_v0, %v1942_v26  ;;  %v1639_v55 = vsel %vm686_vm5, %v1638_v18, %v10114_v36  ;;  %v1647_v26 = vsel %vm688_vm6, %v1646_v30, %v7907_v5  ;;  %v10127_v30 = vld [vmem:[#allocation43_spill] sm:$0xff] }
 0x2c3   : > { %v900_v24 = vpop.permute.xlu0 %899  ;;  %v2280_v31 = vpop.permute.xlu1 %2279  ;;  %v1640_v42 = vsel %vm688_vm6, %v1639_v55, %v10116_v9  ;;  %v1976_v0 = vsel %vm686_vm5, %v1975_v1, %v8143_v34  ;;  %v1648_v5 = vsel %vm690_vm7, %v1647_v26, %v10118_v15  ;;  %v10129_v9 = vld [vmem:[#allocation45_spill] sm:$0xff]  ;;  %v10130_v26 = vld [vmem:[#allocation35_spill] sm:$0xff] }
 0x2c4   : > { %v936_v17 = vsel %vm696_vm11, %v935_v47, %v900_v24  ;;  %v1641_v7 = vsel %vm690_vm7, %v1640_v42, %v10117_v12  ;;  %v10119_v47 = vld [vmem:[#allocation21_spill] sm:$0xff]  ;;  %v10132_v12 = vld [vmem:[#allocation28_spill] sm:$0xff] }
 0x2c5   : > { %6656 = vmatpush1.msk.msra.mxu0 %vm950_vm10, %v936_v17 }
 0x2c6   : > { %6657 = vmatmul.mubr.msk.f32.vlgmr.msra.gmra.mrb[0].mxu0 %vm946_vm12, %v6654_v14  ;;  %6658 = vmatprep.subr.msk.mxu0 %vm950_vm10, %v704_v40  ;;  %v1642_v14 = vsel %vm692_vm8, %v1641_v7, %v10119_v47  ;;  %v10133_v7 = vld [vmem:[#allocation9_spill] sm:$0xff] }
 0x2c7   : > { %v1286_v8 = vpop.permute.xlu0 %1285  ;;  %6659 = vmatpush1.msk.msra.mxu0 %vm950_vm10, %v697_v59  ;;  %1101 = vmatprep.mubr.f32.mxu0 %v10076_v38  ;;  %v2288_v61 = vpop.permute.xlu1 %2287  ;;  %v2596_v15 = vsel %vm684_vm4, %v10133_v7, %v10132_v12 }
 0x2c8   : > { %v1340_v6 = vsel %vm684_vm4, %v7984_v22, %v1286_v8  ;;  %6662 = vmatprep.subr.msk.mxu0 %vm950_vm10, %v1353_v32  ;;  %v705_v22 = vld [vmem:[%s10036_s1] sm:$0xf]  ;;  %v10121_v32 = vld [vmem:[#allocation15_spill] sm:$0xff]  ;;  %v10122_v8 = vld [vmem:[#allocation22_spill] sm:$0xff] }
 0x2c9   : > { %v1341_v3 = vsel %vm686_vm5, %v1340_v6, %v1290_v37  ;;  %v1977_v37 = vsel %vm688_vm6, %v1976_v0, %v8224_v63  ;;  %v1649_v63 = vsel %vm692_vm8, %v1648_v5, %v7923_v54  ;;  %v6661_v54 = vld [vmem:[%s10036_s1 + $0x8] sm:$0xf] }
 0x2ca   : > { %v1978_v17 = vsel %vm690_vm7, %v1977_v37, %v8153_v48  ;;  %v1650_v48 = vsel %vm694_vm9, %v1649_v63, %v10122_v8  ;;  %v10134_v5 = vld [vmem:[#allocation33_spill] sm:$0xff] }
 0x2cb   : > { %v1294_v56 = vpop.permute.xlu0 %1293  ;;  %v2296_v4 = vpop.permute.xlu1 %2295  ;;  %v1979_v40 = vsel %vm692_vm8, %v1978_v17, %v8228_v20 }
 0x2cc   : > { %v1342_v50 = vsel %vm688_vm6, %v1341_v3, %v1294_v56  ;;  %v1980_v18 = vsel %vm694_vm9, %v1979_v40, %v8164_v28  ;;  %v10125_v3 = vld [vmem:[#allocation11_spill] sm:$0xff]  ;;  %v10137_v40 = vld [vmem:[#allocation25_spill] sm:$0xff] }
 0x2cd   : > { %v1343_v49 = vsel %vm690_vm7, %v1342_v50, %v8220_v35  ;;  %v10120_v35 = vld [vmem:[#allocation14_spill] sm:$0xff]  ;;  %v2603_v56 = vsel %vm684_vm4, %v10125_v3, %v7988_v21  ;;  %v2597_v62 = vsel %vm686_vm5, %v2596_v15, %v10137_v40 }
 0x2ce   : > { %6660 = vmatmul.mubr.msk.f32.vlgmr.msra.gmra.mrb[0].mxu0 %vm946_vm12, %v705_v22  ;;  %v1968_v43 = vsel %vm684_vm4, %v10120_v35, %v8137_v60  ;;  %v1643_v60 = vsel %vm694_vm9, %v1642_v14, %v10121_v32  ;;  %v10136_v14 = vld [vmem:[#allocation36_spill] sm:$0xff]  ;;  %v10151_v15 = vld [vmem:[#allocation42_spill] sm:$0xff] }
 0x2cf   : > { %v1302_v33 = vpop.permute.xlu0 %1301  ;;  %1429 = vmatprep.mubr.f32.mxu0 %v10076_v38  ;;  %v8324_v34 = vpop.permute.xlu1 %2903  ;;  %v1644_v19 = vsel %vm696_vm11, %v1643_v60, %v10123_v23  ;;  %v1969_v51 = vsel %vm686_vm5, %v1968_v43, %v8048_v57  ;;  %v2307_v57 = vsel %vm688_vm6, %v2306_v27, %v2280_v31  ;;  %v6669_v43 = vld [vmem:[%s10036_s1 + $0x10] sm:$0xf]  ;;  %v10140_v60 = vld [vmem:[#allocation29_spill] sm:$0xff]  ;;  %v10142_v23 = vld [vmem:[#allocation47_spill] sm:$0xff] }
 0x2d0   : > { %v1344_v24 = vsel %vm692_vm8, %v1343_v49, %v1302_v33  ;;  %v1970_v41 = vsel %vm688_vm6, %v1969_v51, %v8150_v2  ;;  %v2308_v1 = vsel %vm690_vm7, %v2307_v57, %v8183_v11  ;;  %v10126_v11 = vld [vmem:[#allocation32_spill] sm:$0xff]  ;;  %v10131_v49 = vld [vmem:[#allocation39_spill] sm:$0xff]  ;;  %v2598_v8 = vsel %vm688_vm6, %v2597_v62, %v10140_v60 }
 0x2d1   : > { %v1345_v59 = vsel %vm694_vm9, %v1344_v24, %v8222_v58  ;;  %v1651_v58 = vsel %vm696_vm11, %v1650_v48, %v7938_v25  ;;  %v1981_v25 = vsel %vm696_vm11, %v1980_v18, %v8242_v29  ;;  %v1971_v28 = vsel %vm690_vm7, %v1970_v41, %v8067_v13  ;;  %v10124_v29 = vld [vmem:[#allocation16_spill] sm:$0xff]  ;;  %v6665_v13 = vld [vmem:[%s10036_s1 + $0xc] sm:$0xf]  ;;  %v10141_v48 = vld [vmem:[#allocation34_spill] sm:$0xff] }
 0x2d2   : > { %v1972_v46 = vsel %vm692_vm8, %v1971_v28, %v8161_v52  ;;  %v2298_v31 = vsel %vm684_vm4, %v10124_v29, %v8178_v16  ;;  %v2309_v22 = vsel %vm692_vm8, %v2308_v1, %v2288_v61  ;;  %v2604_v45 = vsel %vm686_vm5, %v2603_v56, %v10126_v11  ;;  %v10128_v61 = vld [vmem:[#allocation44_spill] sm:$0xff]  ;;  %v6673_v1 = vld [vmem:[%s10036_s1 + $0x14] sm:$0xf]  ;;  %v10148_v11 = vld [vmem:[#allocation49_spill] sm:$0xff] }
 0x2d3   : > { %v1310_v10 = vpop.permute.xlu0 %1309  ;;  %v8349_v20 = vpop.permute.xlu1 %2911  ;;  %v1973_v52 = vsel %vm694_vm9, %v1972_v46, %v8088_v44  ;;  %v2299_v16 = vsel %vm686_vm5, %v2298_v31, %v8102_v53  ;;  %v2310_v42 = vsel %vm694_vm9, %v2309_v22, %v10129_v9  ;;  %v2605_v44 = vsel %vm688_vm6, %v2604_v45, %v10130_v26  ;;  %v10145_v46 = vld [vmem:[#allocation30_spill] sm:$0xff]  ;;  %v10146_v22 = vld [vmem:[#allocation27_spill] sm:$0xff]  ;;  %v10149_v45 = vld [vmem:[#allocation24_spill] sm:$0xff] }
 0x2d4   : > { %v1346_v6 = vsel %vm696_vm11, %v1345_v59, %v1310_v10  ;;  %v1974_v21 = vsel %vm696_vm11, %v1973_v52, %v10127_v30  ;;  %v2300_v50 = vsel %vm688_vm6, %v2299_v16, %v10128_v61  ;;  %v2311_v0 = vsel %vm696_vm11, %v2310_v42, %v2296_v4  ;;  %v10135_v4 = vld [vmem:[#allocation46_spill] sm:$0xff]  ;;  %v10138_v59 = vld [vmem:[#allocation40_spill] sm:$0xff]  ;;  %v10147_v52 = vld [vmem:[#allocation31_spill] sm:$0xff] }
 0x2d5   : > { %6663 = vmatpush1.msk.msra.mxu0 %vm950_vm10, %v1346_v6  ;;  %v2301_v33 = vsel %vm690_vm7, %v2300_v50, %v10131_v49  ;;  %v2606_v24 = vsel %vm690_vm7, %v2605_v44, %v10134_v5  ;;  %v2926_v30 = vsel %vm684_vm4, %v10149_v45, %v10148_v11  ;;  %v10150_v50 = vld [vmem:[#allocation48_spill] sm:$0xff]  ;;  %v6677_v49 = vld [vmem:[%s10036_s1 + $0x18] sm:$0xf] }
 0x2d6   : > { %6664 = vmatmul.mubr.msk.f32.vlgmr.msra.gmra.mrb[0].mxu0 %vm946_vm12, %v6661_v54  ;;  %6666 = vmatprep.subr.msk.mxu0 %vm950_vm10, %v1651_v58  ;;  %v2302_v47 = vsel %vm692_vm8, %v2301_v33, %v10135_v4  ;;  %v2607_v63 = vsel %vm692_vm8, %v2606_v24, %v10136_v14  ;;  %v10139_v54 = vld [vmem:[#allocation38_spill] sm:$0xff]  ;;  %v10143_v58 = vld [vmem:[#allocation37_spill] sm:$0xff]  ;;  %v2927_v9 = vsel %vm686_vm5, %v2926_v30, %v10150_v50 }
 0x2d7   : > { %v8369_v39 = vpop.permute.xlu0 %2879  ;;  %6667 = vmatpush1.msk.msra.mxu0 %vm950_vm10, %v1644_v19  ;;  %1727 = vmatprep.mubr.f32.mxu0 %v10076_v38  ;;  %v8373_v2 = vpop.permute.xlu1 %2919  ;;  %v2303_v10 = vsel %vm694_vm9, %v2302_v47, %v10138_v59  ;;  %v2608_v6 = vsel %vm694_vm9, %v2607_v63, %v10141_v48  ;;  %v10152_v47 = vld [vmem:[#allocation41_spill] sm:$0xff] }
 0x2d8   : > { %6670 = vmatprep.subr.msk.mxu0 %vm950_vm10, %v1981_v25  ;;  %v2304_v19 = vsel %vm696_vm11, %v2303_v10, %v10142_v23  ;;  %v2609_v51 = vsel %vm696_vm11, %v2608_v6, %v10143_v58  ;;  %v10144_v25 = vld [vmem:[#allocation26_spill] sm:$0xff]  ;;  %v2928_v26 = vsel %vm688_vm6, %v2927_v9, %v8369_v39 }
 0x2d9   : > { %v2599_v57 = vsel %vm690_vm7, %v2598_v8, %v10144_v25 }
 0x2da   : > { %v2600_v29 = vsel %vm692_vm8, %v2599_v57, %v10145_v46 }
 0x2db   : > { %v2884_v36 = vpop.permute.xlu0 %2883  ;;  %v8392_v55 = vpop.permute.xlu1 %3233 }
 0x2dc   : > { %v2929_v44 = vsel %vm690_vm7, %v2928_v26, %v2884_v36 }
 0x2de   : > { %6668 = vmatmul.mubr.msk.f32.vlgmr.msra.gmra.mrb[0].mxu0 %vm946_vm12, %v6665_v13 }
 0x2df   : > { %6671 = vmatpush1.msk.msra.mxu0 %vm950_vm10, %v1974_v21  ;;  %v2888_v53 = vpop.permute.xlu0 %2887  ;;  %2057 = vmatprep.mubr.f32.mxu0 %v10076_v38  ;;  %v8413_v37 = vpop.permute.xlu1 %3241 }
 0x2e0   : > { %6674 = vmatprep.subr.msk.mxu0 %vm950_vm10, %v2311_v0 }
 0x2e3   : > { %v2892_v35 = vpop.permute.xlu0 %2891  ;;  %v2900_v17 = vpop.permute.xlu1 %2899 }
 0x2e4   : > { %v2933_v32 = vsel %vm684_vm4, %v10139_v54, %v2900_v17 }
 0x2e5   : > { %v2934_v18 = vsel %vm686_vm5, %v2933_v32, %v8324_v34  ;;  %v2601_v34 = vsel %vm694_vm9, %v2600_v29, %v10146_v22 }
 0x2e6   : > { %6672 = vmatmul.mubr.msk.f32.vlgmr.msra.gmra.mrb[0].mxu0 %vm946_vm12, %v6669_v43  ;;  %v2602_v16 = vsel %vm696_vm11, %v2601_v34, %v10147_v52 }
 0x2e7   : > { %6675 = vmatpush1.msk.msra.mxu0 %vm950_vm10, %v2304_v19  ;;  %v2896_v41 = vpop.permute.xlu0 %2895  ;;  %2387 = vmatprep.mubr.f32.mxu0 %v10076_v38  ;;  %v2908_v27 = vpop.permute.xlu1 %2907  ;;  %v6685_v19 = vld [vmem:[%s10036_s1 + $0x20] sm:$0xf] }
 0x2e8   : > { %6678 = vmatprep.subr.msk.mxu0 %vm950_vm10, %v2609_v51  ;;  %v2935_v28 = vsel %vm688_vm6, %v2934_v18, %v2908_v27 }
 0x2e9   : > { %v2936_v3 = vsel %vm690_vm7, %v2935_v28, %v8349_v20 }
 0x2eb   : > { %v3202_v31 = vpop.permute.xlu0 %3201  ;;  %v2916_v56 = vpop.permute.xlu1 %2915 }
 0x2ec   : > { %v2937_v13 = vsel %vm692_vm8, %v2936_v3, %v2916_v56  ;;  %v3256_v14 = vsel %vm684_vm4, %v10152_v47, %v3202_v31 }
 0x2ed   : > { %v2938_v20 = vsel %vm694_vm9, %v2937_v13, %v8373_v2  ;;  %v2930_v2 = vsel %vm692_vm8, %v2929_v44, %v2888_v53  ;;  %v6681_v53 = vld [vmem:[%s10036_s1 + $0x1c] sm:$0xf] }
 0x2ee   : > { %6676 = vmatmul.mubr.msk.f32.vlgmr.msra.gmra.mrb[0].mxu0 %vm946_vm12, %v6673_v1  ;;  %v2931_v12 = vsel %vm694_vm9, %v2930_v2, %v2892_v35  ;;  %v10153_v2 = vld [vmem:[#allocation6_spill] sm:$0xff] }
 0x2ef   : > { %6679 = vmatpush1.msk.msra.mxu0 %vm950_vm10, %v2602_v16  ;;  %v3206_v21 = vpop.permute.xlu0 %3205  ;;  %2685 = vmatprep.mubr.f32.mxu0 %v10076_v38  ;;  %v2924_v61 = vpop.permute.xlu1 %2923  ;;  %v2932_v7 = vsel %vm696_vm11, %v2931_v12, %v2896_v41 }
 0x2f0   : > { %v2939_v42 = vsel %vm696_vm11, %v2938_v20, %v2924_v61  ;;  %v3257_v35 = vsel %vm686_vm5, %v3256_v14, %v3206_v21 }
 0x2f1   : > { %6682 = vmatprep.subr.msk.mxu0 %vm950_vm10, %v2939_v42 }
 0x2f3   : > { %v3210_v0 = vpop.permute.xlu0 %3209  ;;  %v3230_v33 = vpop.permute.xlu1 %3229 }
 0x2f4   : > { %v3263_v5 = vsel %vm684_vm4, %v10151_v15, %v3230_v33  ;;  %v3258_v40 = vsel %vm688_vm6, %v3257_v35, %v3210_v0 }
 0x2f5   : > { %v3264_v63 = vsel %vm686_vm5, %v3263_v5, %v8392_v55 }
 0x2f6   : > { %6680 = vmatmul.mubr.msk.f32.vlgmr.msra.gmra.mrb[0].mxu0 %vm946_vm12, %v6677_v49 }
 0x2f7   : > { %6683 = vmatpush1.msk.msra.mxu0 %vm950_vm10, %v2932_v7  ;;  %v3214_v39 = vpop.permute.xlu0 %3213  ;;  %3015 = vmatprep.mubr.f32.mxu0 %v10076_v38  ;;  %v3238_v36 = vpop.permute.xlu1 %3237 }
 0x2f8   : > { %v3265_v43 = vsel %vm688_vm6, %v3264_v63, %v3238_v36  ;;  %v3259_v59 = vsel %vm690_vm7, %v3258_v40, %v3214_v39 }
 0x2f9   : > { %v3266_v54 = vsel %vm690_vm7, %v3265_v43, %v8413_v37  ;;  %v10154_v43 = vld [vmem:[#allocation7_spill] sm:$0xff] }
 0x2fb   : > { %v3218_v24 = vpop.permute.xlu0 %3217  ;;  %v3246_v4 = vpop.permute.xlu1 %3245 }
 0x2fc   : > { %v3260_v10 = vsel %vm692_vm8, %v3259_v59, %v3218_v24  ;;  %v3267_v55 = vsel %vm692_vm8, %v3266_v54, %v3246_v4 }
 0x2fe   : > { %6684 = vmatmul.mubr.msk.f32.vlgmr.msra.gmra.mrb[0].mxu0 %vm946_vm12, %v6681_v53 }
 0x2ff   : > { %v3222_v17 = vpop.permute.xlu0 %3221  ;;  %3345 = vmatprep.mubr.f32.mxu0 %v10076_v38  ;;  %v3250_v62 = vpop.permute.xlu1 %3249 }
 0x300   : > { %v3261_v32 = vsel %vm694_vm9, %v3260_v10, %v3222_v17  ;;  %v3268_v8 = vsel %vm694_vm9, %v3267_v55, %v3250_v62 }
 0x303   : > { %v3226_v60 = vpop.permute.xlu0 %3225  ;;  %v3254_v6 = vpop.permute.xlu1 %3253 }
 0x304   : > { %v3262_v48 = vsel %vm696_vm11, %v3261_v32, %v3226_v60  ;;  %v3269_v23 = vsel %vm696_vm11, %v3268_v8, %v3254_v6 }
 0x305   : > { %6686 = vmatprep.subr.msk.mxu0 %vm950_vm10, %v3269_v23 }
 0x306   : > { %6687 = vmatpush1.msk.msra.mxu0 %vm950_vm10, %v3262_v48 }
 0x307   : > { %6688 = vmatmul.mubr.msk.f32.vlgmr.msra.gmra.mrb[0].mxu0 %vm946_vm12, %v6685_v19 }
 0x3da   : > { %v3347_v37 = vpop.f32.mrb[0].mxu0 }
 0x3db   : > { %v3354_v58 = vsel %vm950_vm10, %v3347_v37, 0.0  ;;  %v3359_v51 = vmul.f32 %v3347_v37, %v3347_v37  ;;  %v3349_v41 = vpop.f32.mrb[1].mxu0 }
 0x3dc   : > { %v3355_v18 = vsel %vm950_vm10, %v3349_v41, 0.0  ;;  %v3360_v27 = vmul.f32 %v3349_v41, %v3349_v41 }
 0x3dd   : > { %v3356_v25 = vadd.f32 %v3355_v18, %v3354_v58  ;;  %v3361_v57 = vsel %vm950_vm10, %v3359_v51, 0.0 }
 0x3de   : > { %v3362_v28 = vsel %vm950_vm10, %v3360_v27, 0.0 }
 0x3df   : > { %3357 = vadd.xlane.f32.xlu1 %v3356_v25  ;;  %v3363_v46 = vadd.f32 %v3362_v28, %v3361_v57 }
 0x3e1   : > { %3364 = vadd.xlane.f32.xlu0 %v3363_v46 }
 0x46c   : > { %v3358_v29 = vpop.xlane.xlu1 %3357 }
 0x46d   : > { %v3366_v31 = vmul.f32 0.00390625, %v3358_v29 }
 0x46e   : > { %v3365_v1 = vpop.xlane.xlu0 %3364 }
 0x46f   : > { %v3367_v3 = vmul.f32 0.00390625, %v3365_v1  ;;  %v3368_v56 = vmul.f32 %v3366_v31, %v3366_v31  ;;  %v3371_v52 = vsub.f32 %v3347_v37, %v3366_v31  ;;  %v3372_v30 = vsub.f32 %v3349_v41, %v3366_v31 }
 0x471   : > { %v3369_v22 = vsub.f32 %v3367_v3, %v3368_v56 }
 0x473   : > { %v3370_v34 = vmax.f32 %v3369_v22, 0.0 }
 0x475   : > { %v3373_v13 = vadd.f32 1e-05, %v3370_v34 }
 0x477   : > { %6840 = vrsqrt.f32 %v3373_v13 }
 0x481   : > { %v6841_v16 = vpop.eup %6840 }
 0x482   : > { %v3375_v11 = vmul.f32 %v6841_v16, %v3371_v52  ;;  %v3376_v21 = vmul.f32 %v6841_v16, %v3372_v30 }
 0x484   : > { %v3377_v45 = vmax.f32 %v3375_v11, 0.0  ;;  %v3378_v20 = vmax.f32 %v3376_v21, 0.0 }
 0x486   : > { %3383 = vrot.lane.b32.xlu1 %v3377_v45, %s6912_s5  ;;  %3380 = vrot.lane.b32.xlu0 %v3377_v45, %s6910_s30 }
 0x48a   : > { %3386 = vrot.lane.b32.xlu1 %v3377_v45, %s6909_s29  ;;  %3389 = vrot.lane.b32.xlu0 %v3377_v45, %s6911_s4 }
 0x48e   : > { %3392 = vrot.lane.b32.xlu1 %v3377_v45, %s6914_s7  ;;  %3395 = vrot.lane.b32.xlu0 %v3377_v45, %s6913_s6 }
 0x492   : > { %3398 = vrot.lane.b32.xlu1 %v3377_v45, %s6915_s8  ;;  %3402 = vrot.lane.b32.xlu0 %v3378_v20, %s6910_s30 }
 0x496   : > { %3405 = vrot.lane.b32.xlu1 %v3378_v20, %s6912_s5  ;;  %3408 = vrot.lane.b32.xlu0 %v3378_v20, %s6909_s29 }
 0x49a   : > { %3411 = vrot.lane.b32.xlu1 %v3378_v20, %s6911_s4  ;;  %3414 = vrot.lane.b32.xlu0 %v3378_v20, %s6914_s7 }
 0x49e   : > { %3417 = vrot.lane.b32.xlu1 %v3378_v20, %s6913_s6  ;;  %3420 = vrot.lane.b32.xlu0 %v3378_v20, %s6915_s8 }
 0x4f8   : > { %v3384_v61 = vpop.permute.xlu1 %3383  ;;  %v3381_v50 = vpop.permute.xlu0 %3380 }
 0x4f9   : > { %v3423_v49 = vcombine.low %v3377_v45, %v3384_v61 }
 0x4fb   : > { %v3430_v36 = vrot.slane %v3423_v49, %v10153_v2 }
 0x4fc   : > { %v3387_v9 = vpop.permute.xlu1 %3386  ;;  %v3390_v42 = vpop.permute.xlu0 %3389 }
 0x4fd   : > { %v3431_v26 = vcombine.low %v3381_v50, %v3387_v9 }
 0x4ff   : > { %v3438_v33 = vrot.slane %v3431_v26, %v10153_v2 }
 0x500   : > { %v3393_v44 = vpop.permute.xlu1 %3392  ;;  %v3396_v0 = vpop.permute.xlu0 %3395 }
 0x501   : > { %v3439_v12 = vcombine.low %v3390_v42, %v3396_v0  ;;  %v3455_v5 = vcombine.low %v3430_v36, %v3438_v33  ;;  %v3456_v35 = vcombine.high %v3430_v36, %v3438_v33 }
 0x503   : > { %v3446_v24 = vrot.slane %v3439_v12, %v10153_v2  ;;  %v3463_v17 = vrot.slane %v3455_v5, %v10154_v43  ;;  %v3470_v32 = vrot.slane %v3456_v35, %v10154_v43 }
 0x504   : > { %v3399_v7 = vpop.permute.xlu1 %3398  ;;  %v3403_v39 = vpop.permute.xlu0 %3402 }
 0x505   : > { %v3447_v15 = vcombine.low %v3393_v44, %v3399_v7 }
 0x507   : > { %v3454_v53 = vrot.slane %v3447_v15, %v10153_v2 }
 0x508   : > { %v3406_v4 = vpop.permute.xlu1 %3405  ;;  %v3409_v47 = vpop.permute.xlu0 %3408 }
 0x509   : > { %v3471_v14 = vcombine.low %v3446_v24, %v3454_v53  ;;  %v3472_v63 = vcombine.high %v3446_v24, %v3454_v53  ;;  %v3491_v37 = vcombine.low %v3378_v20, %v3406_v4  ;;  %v3499_v58 = vcombine.low %v3403_v39, %v3409_v47 }
 0x50b   : > { %v3479_v40 = vrot.slane %v3471_v14, %v10154_v43  ;;  %v3486_v10 = vrot.slane %v3472_v63, %v10154_v43  ;;  %v3498_v18 = vrot.slane %v3491_v37, %v10153_v2  ;;  %v3506_v27 = vrot.slane %v3499_v58, %v10153_v2 }
 0x50c   : > { %v3412_v62 = vpop.permute.xlu1 %3411  ;;  %v3415_v59 = vpop.permute.xlu0 %3414 }
 0x50d   : > { %v3488_v54 = vcombine.high %v3463_v17, %v3479_v40  ;;  %v3487_v55 = vcombine.low %v3463_v17, %v3479_v40  ;;  %v3490_v60 = vcombine.high %v3470_v32, %v3486_v10  ;;  %v3489_v8 = vcombine.low %v3470_v32, %v3486_v10 }
 0x50e   : > { %v3523_v57 = vcombine.low %v3498_v18, %v3506_v27  ;;  %v3524_v29 = vcombine.high %v3498_v18, %v3506_v27 }
 0x50f   : > { %3571 = vrot.lane.b32.xlu0 %v3488_v54, %s6918_s9  ;;  %3567 = vrot.lane.b32.xlu1 %v3487_v55, %s6918_s9 }
 0x510   : > { %v3418_v48 = vpop.permute.xlu1 %3417  ;;  %v3421_v6 = vpop.permute.xlu0 %3420  ;;  %v3531_v31 = vrot.slane %v3523_v57, %v10154_v43  ;;  %v3538_v22 = vrot.slane %v3524_v29, %v10154_v43 }
 0x511   : > { %v3507_v23 = vcombine.low %v3412_v62, %v3418_v48  ;;  %v3515_v19 = vcombine.low %v3415_v59, %v3421_v6 }
 0x513   : > { %3579 = vrot.lane.b32.xlu0 %v3490_v60, %s6918_s9  ;;  %3575 = vrot.lane.b32.xlu1 %v3489_v8, %s6918_s9  ;;  %v3514_v51 = vrot.slane %v3507_v23, %v10153_v2  ;;  %v3522_v41 = vrot.slane %v3515_v19, %v10153_v2 }
 0x515   : > { %v3539_v25 = vcombine.low %v3514_v51, %v3522_v41  ;;  %v3540_v28 = vcombine.high %v3514_v51, %v3522_v41 }
 0x517   : > { %3603 = vrot.lane.b32.xlu0 %v3488_v54, %s6919_s10  ;;  %3599 = vrot.lane.b32.xlu1 %v3487_v55, %s6919_s10  ;;  %v3547_v46 = vrot.slane %v3539_v25, %v10154_v43  ;;  %v3554_v1 = vrot.slane %v3540_v28, %v10154_v43 }
 0x519   : > { %v3556_v3 = vcombine.high %v3531_v31, %v3547_v46  ;;  %v3555_v56 = vcombine.low %v3531_v31, %v3547_v46  ;;  %v3558_v34 = vcombine.high %v3538_v22, %v3554_v1  ;;  %v3557_v13 = vcombine.low %v3538_v22, %v3554_v1 }
 0x51b   : > { %3611 = vrot.lane.b32.xlu0 %v3490_v60, %s6919_s10  ;;  %3607 = vrot.lane.b32.xlu1 %v3489_v8, %s6919_s10 }
 0x51f   : > { %3635 = vrot.lane.b32.xlu0 %v3488_v54, %s6920_s11  ;;  %3631 = vrot.lane.b32.xlu1 %v3487_v55, %s6920_s11 }
 0x523   : > { %3643 = vrot.lane.b32.xlu0 %v3490_v60, %s6920_s11  ;;  %3639 = vrot.lane.b32.xlu1 %v3489_v8, %s6920_s11 }
 0x527   : > { %3573 = vrot.lane.b32.xlu0 %v3556_v3, %s6918_s9  ;;  %3569 = vrot.lane.b32.xlu1 %v3555_v56, %s6918_s9 }
 0x52b   : > { %3581 = vrot.lane.b32.xlu0 %v3558_v34, %s6918_s9  ;;  %3577 = vrot.lane.b32.xlu1 %v3557_v13, %s6918_s9 }
 0x52f   : > { %3605 = vrot.lane.b32.xlu0 %v3556_v3, %s6919_s10  ;;  %3601 = vrot.lane.b32.xlu1 %v3555_v56, %s6919_s10 }
 0x533   : > { %3613 = vrot.lane.b32.xlu0 %v3558_v34, %s6919_s10  ;;  %3609 = vrot.lane.b32.xlu1 %v3557_v13, %s6919_s10 }
 0x537   : > { %3637 = vrot.lane.b32.xlu0 %v3556_v3, %s6920_s11  ;;  %3633 = vrot.lane.b32.xlu1 %v3555_v56, %s6920_s11 }
 0x53b   : > { %3645 = vrot.lane.b32.xlu0 %v3558_v34, %s6920_s11  ;;  %3641 = vrot.lane.b32.xlu1 %v3557_v13, %s6920_s11 }
 0x581   : > { %v3568_v52 = vpop.permute.xlu1 %3567  ;;  %v3572_v16 = vpop.permute.xlu0 %3571 }
 0x582   : > { %3591 = vst.msk [vmem:[#allocation2 + $0x1] sm:$0xff] %vm392_vm0, %v3568_v52  ;;  %3593 = vst.msk [vmem:[#allocation2 + $0x19] sm:$0xff] %vm392_vm0, %v3572_v16 }
 0x585   : > { %v3576_v11 = vpop.permute.xlu1 %3575  ;;  %v3580_v45 = vpop.permute.xlu0 %3579 }
 0x586   : > { %3595 = vst.msk [vmem:[#allocation2 + $0x31] sm:$0xff] %vm392_vm0, %v3576_v11  ;;  %3597 = vst.msk [vmem:[#allocation2 + $0x49] sm:$0xff] %vm392_vm0, %v3580_v45 }
 0x589   : > { %v3600_v30 = vpop.permute.xlu1 %3599  ;;  %v3604_v21 = vpop.permute.xlu0 %3603 }
 0x58a   : > { %3623 = vst.msk [vmem:[#allocation2 + $0x1] sm:$0xff] %vm425_vm1, %v3600_v30  ;;  %3625 = vst.msk [vmem:[#allocation2 + $0x19] sm:$0xff] %vm425_vm1, %v3604_v21 }
 0x58d   : > { %v3608_v20 = vpop.permute.xlu1 %3607  ;;  %v3612_v61 = vpop.permute.xlu0 %3611 }
 0x58e   : > { %3627 = vst.msk [vmem:[#allocation2 + $0x31] sm:$0xff] %vm425_vm1, %v3608_v20  ;;  %3629 = vst.msk [vmem:[#allocation2 + $0x49] sm:$0xff] %vm425_vm1, %v3612_v61 }
 0x591   : > { %v3632_v50 = vpop.permute.xlu1 %3631  ;;  %v3636_v9 = vpop.permute.xlu0 %3635 }
 0x592   : > { %3655 = vst.msk [vmem:[#allocation2 + $0x1] sm:$0xff] %vm458_vm2, %v3632_v50  ;;  %3657 = vst.msk [vmem:[#allocation2 + $0x19] sm:$0xff] %vm458_vm2, %v3636_v9 }
 0x595   : > { %v3640_v42 = vpop.permute.xlu1 %3639  ;;  %v3644_v26 = vpop.permute.xlu0 %3643 }
 0x596   : > { %3659 = vst.msk [vmem:[#allocation2 + $0x31] sm:$0xff] %vm458_vm2, %v3640_v42  ;;  %3661 = vst.msk [vmem:[#allocation2 + $0x49] sm:$0xff] %vm458_vm2, %v3644_v26 }
 0x599   : > { %v3570_v44 = vpop.permute.xlu1 %3569  ;;  %v3574_v0 = vpop.permute.xlu0 %3573  ;;  %v3663_v49 = vld [vmem:[#allocation2 + $0x2] sm:$0x1]  ;;  %v3664_v33 = vld [vmem:[#allocation2 + $0x1a] sm:$0x1] }
 0x59a   : > { %3592 = vst.msk [vmem:[#allocation2 + $0x9] sm:$0xff] %vm392_vm0, %v3570_v44  ;;  %3594 = vst.msk [vmem:[#allocation2 + $0x21] sm:$0xff] %vm392_vm0, %v3574_v0  ;;  %v8591_v12 = vld [vmem:[#allocation2 + $0x1] sm:$0xff]  ;;  %v8593_v7 = vld [vmem:[#allocation2 + $0x19] sm:$0xff] }
 0x59b   : > { %3667 = vst.msk [vmem:[#allocation2] sm:$0x1] %vm471_vm3, %v3663_v49  ;;  %3668 = vst.msk [vmem:[#allocation2 + $0x18] sm:$0x1] %vm471_vm3, %v3664_v33 }
 0x59d   : > { %v3578_v39 = vpop.permute.xlu1 %3577  ;;  %v3582_v36 = vpop.permute.xlu0 %3581  ;;  %v8595_v15 = vld [vmem:[#allocation2 + $0x31] sm:$0xff]  ;;  %v8597_v5 = vld [vmem:[#allocation2 + $0x49] sm:$0xff] }
 0x59e   : > { %v3665_v24 = vld [vmem:[#allocation2 + $0x32] sm:$0x1]  ;;  %3596 = vst.msk [vmem:[#allocation2 + $0x39] sm:$0xff] %vm392_vm0, %v3578_v39  ;;  %3598 = vst.msk [vmem:[#allocation2 + $0x51] sm:$0xff] %vm392_vm0, %v3582_v36  ;;  %v3666_v53 = vld [vmem:[#allocation2 + $0x4a] sm:$0x1]  ;;  %v4632_v4 = vcombine.low %v8591_v12, %v8595_v15  ;;  %v4648_v47 = vcombine.low %v8593_v7, %v8597_v5  ;;  %v4633_v14 = vcombine.high %v8591_v12, %v8595_v15 }
 0x59f   : > { %3669 = vst.msk [vmem:[#allocation2 + $0x30] sm:$0x1] %vm471_vm3, %v3665_v24  ;;  %v4649_v63 = vcombine.high %v8593_v7, %v8597_v5  ;;  %3670 = vst.msk [vmem:[#allocation2 + $0x48] sm:$0x1] %vm471_vm3, %v3666_v53 }
 0x5a0   : > { %v8612_v35 = vrot.slane %v4632_v4, %v10153_v2  ;;  %v8615_v17 = vrot.slane %v4648_v47, %v10153_v2  ;;  %v8618_v40 = vrot.slane %v4633_v14, %v10153_v2 }
 0x5a1   : > { %v8621_v62 = vrot.slane %v4649_v63, %v10153_v2  ;;  %v3602_v59 = vpop.permute.xlu1 %3601  ;;  %v3606_v10 = vpop.permute.xlu0 %3605 }
 0x5a2   : > { %3624 = vst.msk [vmem:[#allocation2 + $0x9] sm:$0xff] %vm425_vm1, %v3602_v59  ;;  %3626 = vst.msk [vmem:[#allocation2 + $0x21] sm:$0xff] %vm425_vm1, %v3606_v10  ;;  %v4665_v54 = vcombine.high %v8612_v35, %v8615_v17  ;;  %v4664_v60 = vcombine.low %v8612_v35, %v8615_v17 }
 0x5a3   : > { %v4680_v55 = vcombine.low %v8618_v40, %v8621_v62  ;;  %v4681_v32 = vcombine.high %v8618_v40, %v8621_v62 }
 0x5a5   : > { %v3610_v8 = vpop.permute.xlu1 %3609  ;;  %v3614_v48 = vpop.permute.xlu0 %3613 }
 0x5a6   : > { %3628 = vst.msk [vmem:[#allocation2 + $0x39] sm:$0xff] %vm425_vm1, %v3610_v8  ;;  %3630 = vst.msk [vmem:[#allocation2 + $0x51] sm:$0xff] %vm425_vm1, %v3614_v48 }
 0x5a9   : > { %v3634_v6 = vpop.permute.xlu1 %3633  ;;  %v3638_v23 = vpop.permute.xlu0 %3637 }
 0x5aa   : > { %3656 = vst.msk [vmem:[#allocation2 + $0x9] sm:$0xff] %vm458_vm2, %v3634_v6  ;;  %3658 = vst.msk [vmem:[#allocation2 + $0x21] sm:$0xff] %vm458_vm2, %v3638_v23 }
 0x5ad   : > { %v3642_v19 = vpop.permute.xlu1 %3641  ;;  %v3646_v37 = vpop.permute.xlu0 %3645 }
 0x5ae   : > { %3660 = vst.msk [vmem:[#allocation2 + $0x39] sm:$0xff] %vm458_vm2, %v3642_v19  ;;  %3662 = vst.msk [vmem:[#allocation2 + $0x51] sm:$0xff] %vm458_vm2, %v3646_v37 }
 0x5b1   : > { %v3680_v58 = vld [vmem:[#allocation2 + $0x8] sm:$0xff]  ;;  %v3682_v51 = vld [vmem:[#allocation2 + $0x20] sm:$0xff] }
 0x5b2   : > { %3904 = vrot.lane.b32.xlu1 %v3680_v58, %s6919_s10  ;;  %3908 = vrot.lane.b32.xlu0 %v3682_v51, %s6919_s10  ;;  %v3671_v41 = vld [vmem:[#allocation2 + $0xf] sm:$0x1]  ;;  %v3672_v18 = vld [vmem:[#allocation2 + $0x27] sm:$0x1]  ;;  %v5882_v19 = vld [vmem:[#allocation2 + $0x1a] sm:$0xff] }
 0x5b3   : > { %3675 = vst.msk [vmem:[#allocation2 + $0x11] sm:$0x1] %vm471_vm3, %v3671_v41  ;;  %3676 = vst.msk [vmem:[#allocation2 + $0x29] sm:$0x1] %vm471_vm3, %v3672_v18  ;;  %v4923_v31 = vld [vmem:[#allocation2 + $0x9] sm:$0xff]  ;;  %v4925_v1 = vld [vmem:[#allocation2 + $0x21] sm:$0xff]  ;;  %v4679_v18 = vrot.slane %v4665_v54, %v10154_v43 }
 0x5b4   : > { %v5880_v23 = vld [vmem:[#allocation2 + $0x2] sm:$0xff] }
 0x5b5   : > { %v3684_v27 = vld [vmem:[#allocation2 + $0x38] sm:$0xff]  ;;  %v3686_v25 = vld [vmem:[#allocation2 + $0x50] sm:$0xff] }
 0x5b6   : > { %v4927_v57 = vld [vmem:[#allocation2 + $0x39] sm:$0xff]  ;;  %3912 = vrot.lane.b32.xlu1 %v3684_v27, %s6919_s10  ;;  %v3755_v28 = vcombine.low %v3680_v58, %v3684_v27  ;;  %v3756_v46 = vcombine.high %v3680_v58, %v3684_v27  ;;  %3916 = vrot.lane.b32.xlu0 %v3686_v25, %s6919_s10  ;;  %v3771_v29 = vcombine.low %v3682_v51, %v3686_v25  ;;  %v4929_v3 = vld [vmem:[#allocation2 + $0x51] sm:$0xff] }
 0x5b7   : > { %v3772_v56 = vcombine.high %v3682_v51, %v3686_v25  ;;  %v3673_v22 = vld [vmem:[#allocation2 + $0x3f] sm:$0x1]  ;;  %v3674_v34 = vld [vmem:[#allocation2 + $0x57] sm:$0x1]  ;;  %v4700_v13 = vcombine.low %v4923_v31, %v4927_v57  ;;  %v4716_v52 = vcombine.low %v4925_v1, %v4929_v3  ;;  %v4701_v44 = vcombine.high %v4923_v31, %v4927_v57 }
 0x5b8   : > { %v8646_v16 = vrot.slane %v3755_v28, %v10153_v2  ;;  %v8649_v11 = vrot.slane %v3756_v46, %v10153_v2  ;;  %v8652_v45 = vrot.slane %v3771_v29, %v10153_v2  ;;  %3677 = vst.msk [vmem:[#allocation2 + $0x41] sm:$0x1] %vm471_vm3, %v3673_v22  ;;  %3678 = vst.msk [vmem:[#allocation2 + $0x59] sm:$0x1] %vm471_vm3, %v3674_v34  ;;  %v5884_v37 = vld [vmem:[#allocation2 + $0x32] sm:$0xff] }
 0x5b9   : > { %v8657_v30 = vrot.slane %v3772_v56, %v10153_v2  ;;  %v8660_v21 = vrot.slane %v4700_v13, %v10153_v2  ;;  %v8663_v20 = vrot.slane %v4716_v52, %v10153_v2  ;;  %v4717_v0 = vcombine.high %v4925_v1, %v4929_v3 }
 0x5ba   : > { %v3787_v61 = vcombine.low %v8646_v16, %v8652_v45  ;;  %4312 = vrot.lane.b32.xlu1 %v3680_v58, %s6922_s17  ;;  %4316 = vrot.lane.b32.xlu0 %v3682_v51, %s6922_s17  ;;  %v3788_v50 = vcombine.high %v8646_v16, %v8652_v45  ;;  %v8678_v49 = vrot.slane %v4701_v44, %v10153_v2  ;;  %v8697_v47 = vld [vmem:[#allocation2 + $0xa] sm:$0xff]  ;;  %v8699_v14 = vld [vmem:[#allocation2 + $0x22] sm:$0xff] }
 0x5bb   : > { %v3803_v9 = vcombine.low %v8649_v11, %v8657_v30  ;;  %v3804_v42 = vcombine.high %v8649_v11, %v8657_v30  ;;  %v4733_v26 = vcombine.high %v8660_v21, %v8663_v20  ;;  %v8683_v33 = vrot.slane %v4717_v0, %v10153_v2  ;;  %v5886_v58 = vld [vmem:[#allocation2 + $0x4a] sm:$0xff] }
 0x5bc   : > { %v4732_v24 = vcombine.low %v8660_v21, %v8663_v20  ;;  %v5590_v51 = vcombine.low %v5880_v23, %v5884_v37  ;;  %v3802_v41 = vrot.slane %v3788_v50, %v10154_v43  ;;  %v5591_v54 = vcombine.high %v5880_v23, %v5884_v37 }
 0x5bd   : > { %v4748_v39 = vcombine.low %v8678_v49, %v8683_v33  ;;  %v4749_v36 = vcombine.high %v8678_v49, %v8683_v33  ;;  %v3811_v28 = vrot.slane %v3803_v9, %v10154_v43  ;;  %v5607_v29 = vcombine.high %v5882_v19, %v5886_v58 }
 0x5be   : > { %4320 = vrot.lane.b32.xlu1 %v3684_v27, %s6922_s17  ;;  %4324 = vrot.lane.b32.xlu0 %v3686_v25, %s6922_s17  ;;  %v5606_v27 = vcombine.low %v5882_v19, %v5886_v58  ;;  %v4688_v25 = vrot.slane %v4680_v55, %v10154_v43  ;;  %v4695_v55 = vrot.slane %v4681_v32, %v10154_v43 }
 0x5bf   : > { %v8693_v53 = vld [vmem:[#allocation2 + $0x3a] sm:$0xff]  ;;  %v8695_v4 = vld [vmem:[#allocation2 + $0x52] sm:$0xff]  ;;  %v5621_v56 = vrot.slane %v5607_v29, %v10153_v2  ;;  %v4747_v40 = vrot.slane %v4733_v26, %v10154_v43  ;;  %v4756_v22 = vrot.slane %v4748_v39, %v10154_v43  ;;  %v8841_v30 = vrot.slane %v4749_v36, %v10154_v43 }
 0x5c0   : > { %v5659_v63 = vcombine.high %v8697_v47, %v8693_v53  ;;  %v5675_v59 = vcombine.high %v8699_v14, %v8695_v4  ;;  %v5614_v46 = vrot.slane %v5606_v27, %v10153_v2  ;;  %v8850_v9 = vrot.slane %v3787_v61, %v10154_v43 }
 0x5c1   : > { %v4697_v61 = vcombine.high %v4679_v18, %v10076_v38  ;;  %v3821_v33 = vcombine.high %v3811_v28, %v10076_v38  ;;  %v4698_v39 = vcombine.high %v4688_v25, %v10076_v38 }
 0x5c2   : > { %4940 = vrot.lane.b32.xlu1 %v4923_v31, %s6919_s10  ;;  %4944 = vrot.lane.b32.xlu0 %v4925_v1, %s6919_s10  ;;  %v8708_v10 = vrot.slane %v5659_v63, %v10153_v2  ;;  %v8711_v8 = vrot.slane %v5675_v59, %v10153_v2  ;;  %10155 = vst [vmem:[#allocation17_spill] sm:$0xff] %v8850_v9 }
 0x5c3   : > { %v3819_v16 = vcombine.high %v8850_v9, %v10076_v38 }
 0x5c4   : > { %v5706_v48 = vcombine.low %v8708_v10, %v8711_v8  ;;  %v5707_v6 = vcombine.high %v8708_v10, %v8711_v8 }
 0x5c6   : > { %4948 = vrot.lane.b32.xlu1 %v4927_v57, %s6919_s10  ;;  %4952 = vrot.lane.b32.xlu0 %v4929_v3, %s6919_s10 }
 0x5ca   : > { %4938 = vrot.lane.b32.xlu1 %v8591_v12, %s6919_s10  ;;  %4942 = vrot.lane.b32.xlu0 %v8593_v7, %s6919_s10 }
 0x5ce   : > { %4946 = vrot.lane.b32.xlu1 %v8595_v15, %s6919_s10  ;;  %4950 = vrot.lane.b32.xlu0 %v8597_v5, %s6919_s10 }
 0x5d2   : > { %5270 = vrot.lane.b32.xlu1 %v4923_v31, %s6922_s17  ;;  %5274 = vrot.lane.b32.xlu0 %v4925_v1, %s6922_s17  ;;  %v3818_v31 = vrot.slane %v3804_v42, %v10154_v43  ;;  %v8856_v42 = vrot.slane %v4664_v60, %v10154_v43  ;;  %v3820_v60 = vcombine.high %v3802_v41, %v10076_v38 }
 0x5d4   : > { %10156 = vst [vmem:[#allocation8_spill] sm:$0xff] %v8856_v42  ;;  %v4696_v45 = vcombine.high %v8856_v42, %v10076_v38 }
 0x5d6   : > { %5278 = vrot.lane.b32.xlu1 %v4927_v57, %s6922_s17  ;;  %5282 = vrot.lane.b32.xlu0 %v4929_v3, %s6922_s17  ;;  %v5598_v57 = vrot.slane %v5590_v51, %v10153_v2  ;;  %v5605_v3 = vrot.slane %v5591_v54, %v10153_v2  ;;  %v5674_v54 = vcombine.low %v8699_v14, %v8695_v4 }
 0x5d8   : > { %v5623_v1 = vcombine.high %v5598_v57, %v5614_v46  ;;  %v5638_v32 = vcombine.low %v5605_v3, %v5621_v56  ;;  %v5639_v13 = vcombine.high %v5605_v3, %v5621_v56  ;;  %v5622_v36 = vcombine.low %v5598_v57, %v5614_v46 }
 0x5d9   : > { %v4765_v57 = vcombine.high %v4747_v40, %v10076_v38  ;;  %v5658_v46 = vcombine.low %v8697_v47, %v8693_v53  ;;  %v5682_v56 = vrot.slane %v5674_v54, %v10153_v2 }
 0x5da   : > { %5268 = vrot.lane.b32.xlu1 %v8591_v12, %s6922_s17  ;;  %5272 = vrot.lane.b32.xlu0 %v8593_v7, %s6922_s17  ;;  %v8745_v12 = vld [vmem:[#allocation2] sm:$0xff]  ;;  %v8747_v7 = vld [vmem:[#allocation2 + $0x18] sm:$0xff]  ;;  %v5637_v62 = vrot.slane %v5623_v1, %v10154_v43  ;;  %v5646_v34 = vrot.slane %v5638_v32, %v10154_v43  ;;  %v8844_v50 = vrot.slane %v5639_v13, %v10154_v43 }
 0x5de   : > { %5276 = vrot.lane.b32.xlu1 %v8595_v15, %s6922_s17  ;;  %5280 = vrot.lane.b32.xlu0 %v8597_v5, %s6922_s17  ;;  %v8753_v15 = vld [vmem:[#allocation2 + $0x30] sm:$0xff]  ;;  %v8755_v5 = vld [vmem:[#allocation2 + $0x48] sm:$0xff] }
 0x5df   : > { %v3687_v21 = vcombine.low %v8745_v12, %v8753_v15  ;;  %v3703_v20 = vcombine.low %v8747_v7, %v8755_v5  ;;  %v3688_v29 = vcombine.high %v8745_v12, %v8753_v15 }
 0x5e1   : > { %v3711_v1 = vrot.slane %v3703_v20, %v10153_v2 }
 0x5e2   : > { %5896 = vrot.lane.b32.xlu1 %v5880_v23, %s6919_s10  ;;  %5900 = vrot.lane.b32.xlu0 %v5882_v19, %s6919_s10 }
 0x5e6   : > { %5904 = vrot.lane.b32.xlu1 %v5884_v37, %s6919_s10  ;;  %5908 = vrot.lane.b32.xlu0 %v5886_v58, %s6919_s10 }
 0x5ea   : > { %6226 = vrot.lane.b32.xlu1 %v5880_v23, %s6922_s17  ;;  %6230 = vrot.lane.b32.xlu0 %v5882_v19, %s6922_s17  ;;  %v3822_v23 = vcombine.high %v3818_v31, %v10076_v38  ;;  %v4699_v19 = vcombine.high %v4695_v55, %v10076_v38 }
 0x5ee   : > { %6234 = vrot.lane.b32.xlu1 %v5884_v37, %s6922_s17  ;;  %6238 = vrot.lane.b32.xlu0 %v5886_v58, %s6922_s17  ;;  %v8898_v37 = vrot.slane %v4732_v24, %v10154_v43  ;;  %v8901_v58 = vrot.slane %v5622_v36, %v10154_v43 }
 0x5f0   : > { %10157 = vst [vmem:[#allocation10_spill] sm:$0xff] %v8898_v37  ;;  %10158 = vst [vmem:[#allocation12_spill] sm:$0xff] %v8901_v58  ;;  %v5654_v27 = vcombine.high %v8901_v58, %v10076_v38 }
 0x5f2   : > { %3902 = vrot.lane.b32.xlu1 %v8745_v12, %s6919_s10  ;;  %3906 = vrot.lane.b32.xlu0 %v8747_v7, %s6919_s10 }
 0x5f6   : > { %3910 = vrot.lane.b32.xlu1 %v8753_v15, %s6919_s10  ;;  %3914 = vrot.lane.b32.xlu0 %v8755_v5, %s6919_s10 }
 0x5fa   : > { %4310 = vrot.lane.b32.xlu1 %v8745_v12, %s6922_s17  ;;  %4314 = vrot.lane.b32.xlu0 %v8747_v7, %s6922_s17  ;;  %v3702_v12 = vrot.slane %v3688_v29, %v10153_v2 }
 0x5fe   : > { %4318 = vrot.lane.b32.xlu1 %v8753_v15, %s6922_s17  ;;  %4322 = vrot.lane.b32.xlu0 %v8755_v5, %s6922_s17 }
 0x602   : > { %5898 = vrot.lane.b32.xlu1 %v8697_v47, %s6919_s10  ;;  %5902 = vrot.lane.b32.xlu0 %v8699_v14, %s6919_s10 }
 0x606   : > { %5906 = vrot.lane.b32.xlu1 %v8693_v53, %s6919_s10  ;;  %5910 = vrot.lane.b32.xlu0 %v8695_v4, %s6919_s10 }
 0x60a   : > { %6228 = vrot.lane.b32.xlu1 %v8697_v47, %s6922_s17  ;;  %6232 = vrot.lane.b32.xlu0 %v8699_v14, %s6922_s17  ;;  %v5656_v47 = vcombine.high %v5646_v34, %v10076_v38  ;;  %v5666_v14 = vrot.slane %v5658_v46, %v10153_v2 }
 0x60e   : > { %6236 = vrot.lane.b32.xlu1 %v8693_v53, %s6922_s17  ;;  %6240 = vrot.lane.b32.xlu0 %v8695_v4, %s6922_s17  ;;  %v4766_v4 = vcombine.high %v4756_v22, %v10076_v38 }
 0x612   : > { %3856 = vrot.lane.b32.xlu1 %v3802_v41, %s6913_s6  ;;  %4773 = vrot.lane.b32.xlu0 %v4679_v18, %s6913_s6  ;;  %v4764_v18 = vcombine.high %v8898_v37, %v10076_v38 }
 0x616   : > { %3864 = vrot.lane.b32.xlu1 %v3811_v28, %s6911_s4  ;;  %4781 = vrot.lane.b32.xlu0 %v4688_v25, %s6911_s4  ;;  %v5655_v28 = vcombine.high %v5637_v62, %v10076_v38 }
 0x61a   : > { %3872 = vrot.lane.b32.xlu1 %v3818_v31, %s6912_s5  ;;  %4789 = vrot.lane.b32.xlu0 %v4695_v55, %s6912_s5  ;;  %v3695_v55 = vrot.slane %v3687_v21, %v10153_v2  ;;  %v3704_v31 = vcombine.high %v8747_v7, %v8755_v5  ;;  %v5721_v21 = vrot.slane %v5707_v6, %v10154_v43 }
 0x61c   : > { %v3718_v7 = vrot.slane %v3704_v31, %v10153_v2  ;;  %v3720_v32 = vcombine.high %v3695_v55, %v3711_v1 }
 0x61e   : > { %4801 = vrot.lane.b32.xlu1 %v4747_v40, %s6913_s6  ;;  %5731 = vrot.lane.b32.xlu0 %v5637_v62, %s6913_s6  ;;  %v4767_v40 = vcombine.high %v8841_v30, %v10076_v38  ;;  %v5657_v62 = vcombine.high %v8844_v50, %v10076_v38  ;;  %v3736_v36 = vcombine.high %v3702_v12, %v3718_v7 }
 0x622   : > { %4809 = vrot.lane.b32.xlu1 %v4756_v22, %s6911_s4  ;;  %5739 = vrot.lane.b32.xlu0 %v5646_v34, %s6911_s4  ;;  %v5691_v22 = vcombine.high %v5666_v14, %v5682_v56 }
 0x624   : > { %v8833_v52 = vpop.permute.xlu1 %3904  ;;  %v8835_v11 = vpop.permute.xlu0 %3908 }
 0x626   : > { %4817 = vrot.lane.b32.xlu1 %v8841_v30, %s6912_s5  ;;  %5747 = vrot.lane.b32.xlu0 %v8844_v50, %s6912_s5  ;;  %v3719_v30 = vcombine.low %v3695_v55, %v3711_v1 }
 0x628   : > { %v8862_v26 = vpop.permute.xlu1 %3912  ;;  %v8864_v44 = vpop.permute.xlu0 %3916  ;;  %v8988_v20 = vrot.slane %v3719_v30, %v10154_v43 }
 0x629   : > { %v3994_v54 = vcombine.low %v8833_v52, %v8862_v26  ;;  %v4010_v29 = vcombine.low %v8835_v11, %v8864_v44 }
 0x62a   : > { %3852 = vrot.lane.b32.xlu1 %v3819_v16, %s6915_s8  ;;  %4769 = vrot.lane.b32.xlu0 %v4696_v45, %s6915_s8  ;;  %v3734_v16 = vrot.slane %v3720_v32, %v10154_v43  ;;  %v5705_v45 = vrot.slane %v5691_v22, %v10154_v43  ;;  %v3751_v46 = vcombine.high %v8988_v20, %v10076_v38 }
 0x62c   : > { %v8872_v35 = vpop.permute.xlu1 %4312  ;;  %v8874_v17 = vpop.permute.xlu0 %4316  ;;  %v3752_v8 = vcombine.high %v3734_v16, %v10076_v38  ;;  %v5723_v6 = vcombine.high %v5705_v45, %v10076_v38 }
 0x62e   : > { %3860 = vrot.lane.b32.xlu1 %v3820_v60, %s6914_s7  ;;  %4777 = vrot.lane.b32.xlu0 %v4697_v61, %s6914_s7  ;;  %v3735_v60 = vcombine.low %v3702_v12, %v3718_v7 }
 0x630   : > { %v8880_v0 = vpop.permute.xlu1 %4320  ;;  %v8882_v49 = vpop.permute.xlu0 %4324 }
 0x632   : > { %3868 = vrot.lane.b32.xlu1 %v3821_v33, %s6909_s29  ;;  %4785 = vrot.lane.b32.xlu0 %v4698_v39, %s6909_s29  ;;  %v3743_v33 = vrot.slane %v3735_v60, %v10154_v43  ;;  %v5714_v39 = vrot.slane %v5706_v48, %v10154_v43 }
 0x634   : > { %v8888_v63 = vpop.permute.xlu1 %4940  ;;  %v8890_v59 = vpop.permute.xlu0 %4944  ;;  %v3753_v7 = vcombine.high %v3743_v33, %v10076_v38 }
 0x636   : > { %3876 = vrot.lane.b32.xlu1 %v3822_v23, %s6910_s30  ;;  %4793 = vrot.lane.b32.xlu0 %v4699_v19, %s6910_s30  ;;  %v5690_v23 = vcombine.low %v5666_v14, %v5682_v56  ;;  %v4011_v14 = vcombine.high %v8835_v11, %v8864_v44 }
 0x638   : > { %v8905_v51 = vpop.permute.xlu1 %4948  ;;  %v8907_v41 = vpop.permute.xlu0 %4952  ;;  %v8991_v48 = vrot.slane %v5690_v23, %v10154_v43  ;;  %v4418_v23 = vcombine.low %v8874_v17, %v8882_v49 }
 0x63a   : > { %4797 = vrot.lane.b32.xlu1 %v4764_v18, %s6915_s8  ;;  %5727 = vrot.lane.b32.xlu0 %v5654_v27, %s6915_s8  ;;  %v3750_v27 = vrot.slane %v3736_v36, %v10154_v43  ;;  %v5722_v10 = vcombine.high %v8991_v48, %v10076_v38  ;;  %v4402_v36 = vcombine.low %v8872_v35, %v8880_v0 }
 0x63c   : > { %v8919_v24 = vpop.permute.xlu1 %4938  ;;  %v8921_v25 = vpop.permute.xlu0 %4942  ;;  %v3754_v30 = vcombine.high %v3750_v27, %v10076_v38 }
 0x63e   : > { %4805 = vrot.lane.b32.xlu1 %v4765_v57, %s6914_s7  ;;  %5735 = vrot.lane.b32.xlu0 %v5655_v28, %s6914_s7 }
 0x640   : > { %v8937_v3 = vpop.permute.xlu1 %4946  ;;  %v8939_v53 = vpop.permute.xlu0 %4950 }
 0x641   : > { %v4962_v55 = vcombine.low %v8919_v24, %v8937_v3  ;;  %v4978_v31 = vcombine.low %v8921_v25, %v8939_v53  ;;  %v4963_v56 = vcombine.high %v8919_v24, %v8937_v3  ;;  %v4979_v12 = vcombine.high %v8921_v25, %v8939_v53 }
 0x642   : > { %4813 = vrot.lane.b32.xlu1 %v4766_v4, %s6909_s29  ;;  %5743 = vrot.lane.b32.xlu0 %v5656_v47, %s6909_s29  ;;  %v3995_v47 = vcombine.high %v8833_v52, %v8862_v26  ;;  %v9035_v52 = vrot.slane %v4010_v29, %v10153_v2  ;;  %v4025_v3 = vrot.slane %v4011_v14, %v10153_v2 }
 0x643   : > { %v9038_v11 = vrot.slane %v4962_v55, %v10153_v2  ;;  %v9041_v26 = vrot.slane %v4978_v31, %v10153_v2  ;;  %v4977_v53 = vrot.slane %v4963_v56, %v10153_v2  ;;  %v4993_v32 = vrot.slane %v4979_v12, %v10153_v2 }
 0x644   : > { %v8949_v15 = vpop.permute.xlu1 %5270  ;;  %v8951_v5 = vpop.permute.xlu0 %5274  ;;  %v4009_v25 = vrot.slane %v3995_v47, %v10153_v2  ;;  %v4403_v55 = vcombine.high %v8872_v35, %v8880_v0  ;;  %v4419_v31 = vcombine.high %v8874_v17, %v8882_v49  ;;  %v9095_v14 = vrot.slane %v4402_v36, %v10153_v2 }
 0x645   : > { %v9098_v56 = vrot.slane %v4418_v23, %v10153_v2  ;;  %v5011_v12 = vcombine.high %v4977_v53, %v4993_v32  ;;  %v5046_v36 = vcombine.low %v8890_v59, %v8907_v41 }
 0x646   : > { %4821 = vrot.lane.b32.xlu1 %v4767_v40, %s6910_s30  ;;  %5751 = vrot.lane.b32.xlu0 %v5657_v62, %s6910_s30  ;;  %v5724_v40 = vcombine.high %v5714_v39, %v10076_v38  ;;  %v9032_v62 = vrot.slane %v3994_v54, %v10153_v2  ;;  %v4043_v29 = vcombine.high %v4009_v25, %v4025_v3 }
 0x648   : > { %v8959_v34 = vpop.permute.xlu1 %5278  ;;  %v8961_v13 = vpop.permute.xlu0 %5282  ;;  %v4027_v22 = vcombine.high %v9032_v62, %v9035_v52 }
 0x64a   : > { %3828 = vrot.lane.b32.xlu0 %v3734_v16, %s6913_s6  ;;  %5759 = vrot.lane.b32.xlu1 %v5705_v45, %s6913_s6  ;;  %v4995_v16 = vcombine.high %v9038_v11, %v9041_v26 }
 0x64c   : > { %v8967_v50 = vpop.permute.xlu1 %5268  ;;  %v8969_v61 = vpop.permute.xlu0 %5272  ;;  %v9081_v54 = vrot.slane %v4995_v16, %v10154_v43 }
 0x64e   : > { %3836 = vrot.lane.b32.xlu0 %v3743_v33, %s6911_s4  ;;  %5767 = vrot.lane.b32.xlu1 %v5714_v39, %s6911_s4  ;;  %v5725_v33 = vcombine.high %v5721_v21, %v10076_v38  ;;  %v4042_v39 = vcombine.low %v4009_v25, %v4025_v3  ;;  %v4417_v3 = vrot.slane %v4403_v55, %v10153_v2 }
 0x650   : > { %v8978_v19 = vpop.permute.xlu1 %5276  ;;  %v8980_v18 = vpop.permute.xlu0 %5280  ;;  %v9092_v47 = vrot.slane %v4042_v39, %v10154_v43  ;;  %v5030_v39 = vcombine.low %v8888_v63, %v8905_v51 }
 0x651   : > { %v5293_v17 = vcombine.high %v8967_v50, %v8978_v19  ;;  %v5309_v49 = vcombine.high %v8969_v61, %v8980_v18 }
 0x652   : > { %3844 = vrot.lane.b32.xlu0 %v3750_v27, %s6912_s5  ;;  %5775 = vrot.lane.b32.xlu1 %v5721_v21, %s6912_s5  ;;  %v5308_v27 = vcombine.low %v8969_v61, %v8980_v18  ;;  %v9126_v61 = vrot.slane %v4043_v29, %v10154_v43 }
 0x653   : > { %v5323_v18 = vrot.slane %v5309_v49, %v10153_v2  ;;  %v5031_v49 = vcombine.high %v8888_v63, %v8905_v51 }
 0x654   : > { %v8995_v57 = vpop.permute.xlu1 %5896  ;;  %v8997_v28 = vpop.permute.xlu0 %5900 }
 0x656   : > { %3824 = vrot.lane.b32.xlu0 %v3751_v46, %s6915_s8  ;;  %5755 = vrot.lane.b32.xlu1 %v5722_v10, %s6915_s8  ;;  %v5010_v46 = vcombine.low %v4977_v53, %v4993_v32  ;;  %v5292_v10 = vcombine.low %v8967_v50, %v8978_v19  ;;  %v4433_v53 = vrot.slane %v4419_v31, %v10153_v2 }
 0x657   : > { %v4435_v50 = vcombine.high %v9095_v14, %v9098_v56  ;;  %v5307_v19 = vrot.slane %v5293_v17, %v10153_v2 }
 0x658   : > { %v9015_v1 = vpop.permute.xlu1 %5904  ;;  %v9017_v4 = vpop.permute.xlu0 %5908  ;;  %v9101_v35 = vrot.slane %v5010_v46, %v10154_v43  ;;  %v9106_v0 = vrot.slane %v5292_v10, %v10153_v2 }
 0x659   : > { %v9148_v23 = vrot.slane %v4435_v50, %v10154_v43  ;;  %v5340_v46 = vcombine.low %v5307_v19, %v5323_v18  ;;  %v5920_v10 = vcombine.low %v8995_v57, %v9015_v1  ;;  %v9171_v50 = vrot.slane %v5030_v39, %v10153_v2 }
 0x65a   : > { %3832 = vrot.lane.b32.xlu0 %v3752_v8, %s6914_s7  ;;  %5763 = vrot.lane.b32.xlu1 %v5723_v6, %s6914_s7  ;;  %v9078_v6 = vrot.slane %v4027_v22, %v10154_v43 }
 0x65b   : > { %v9179_v58 = vrot.slane %v5920_v10, %v10153_v2  ;;  %v9189_v63 = vrot.slane %v5340_v46, %v10154_v43 }
 0x65c   : > { %v9043_v44 = vpop.permute.xlu1 %6226  ;;  %v9045_v24 = vpop.permute.xlu0 %6230 }
 0x65d   : > { %10159 = vst [vmem:[#allocation18_spill] sm:$0xff] %v9043_v44  ;;  %10160 = vst [vmem:[#allocation19_spill] sm:$0xff] %v9045_v24  ;;  %v5361_v24 = vcombine.high %v8949_v15, %v8959_v34 }
 0x65e   : > { %3840 = vrot.lane.b32.xlu0 %v3753_v7, %s6909_s29  ;;  %5771 = vrot.lane.b32.xlu1 %v5724_v40, %s6909_s29  ;;  %v9111_v7 = vrot.slane %v5308_v27, %v10153_v2  ;;  %v5936_v27 = vcombine.low %v8997_v28, %v9017_v4 }
 0x660   : > { %v9057_v45 = vpop.permute.xlu1 %6234  ;;  %v9059_v60 = vpop.permute.xlu0 %6238  ;;  %v5325_v32 = vcombine.high %v9106_v0, %v9111_v7  ;;  %v9182_v42 = vrot.slane %v5936_v27, %v10153_v2  ;;  %v5360_v27 = vcombine.low %v8949_v15, %v8959_v34 }
 0x661   : > { %10161 = vst [vmem:[#allocation13_spill] sm:$0xff] %v9057_v45  ;;  %10162 = vst [vmem:[#allocation20_spill] sm:$0xff] %v9059_v60 }
 0x662   : > { %3848 = vrot.lane.b32.xlu0 %v3754_v30, %s6910_s30  ;;  %5779 = vrot.lane.b32.xlu1 %v5725_v33, %s6910_s30  ;;  %v9137_v30 = vrot.slane %v5011_v12, %v10154_v43  ;;  %v4450_v33 = vcombine.low %v4417_v3, %v4433_v53  ;;  %v9159_v31 = vrot.slane %v5325_v32, %v10154_v43 }
 0x663   : > { %v4451_v12 = vcombine.high %v4417_v3, %v4433_v53  ;;  %v5047_v32 = vcombine.high %v8890_v59, %v8907_v41  ;;  %v9176_v3 = vrot.slane %v5046_v36, %v10153_v2  ;;  %v5341_v53 = vcombine.high %v5307_v19, %v5323_v18 }
 0x664   : > { %v9073_v8 = vpop.permute.xlu1 %3902  ;;  %v9075_v21 = vpop.permute.xlu0 %3906  ;;  %v9166_v17 = vrot.slane %v4450_v33, %v10154_v43  ;;  %v5045_v59 = vrot.slane %v5031_v49, %v10153_v2  ;;  %v4994_v19 = vcombine.low %v9038_v11, %v9041_v26  ;;  %v5953_v18 = vcombine.high %v9179_v58, %v9182_v42 }
 0x665   : > { %v5061_v51 = vrot.slane %v5047_v32, %v10153_v2  ;;  %v5063_v41 = vcombine.high %v9171_v50, %v9176_v3  ;;  %v9208_v46 = vrot.slane %v4451_v12, %v10154_v43  ;;  %v9211_v10 = vrot.slane %v5341_v53, %v10154_v43 }
 0x666   : > { %4095 = vrot.lane.b32.xlu1 %v9078_v6, %s6913_s6  ;;  %5103 = vrot.lane.b32.xlu0 %v9081_v54, %s6913_s6  ;;  %v5376_v12 = vcombine.low %v8951_v5, %v8961_v13  ;;  %v9229_v53 = vrot.slane %v5953_v18, %v10154_v43  ;;  %v9232_v9 = vrot.slane %v4994_v19, %v10154_v43 }
 0x667   : > { %v5078_v11 = vcombine.low %v5045_v59, %v5061_v51  ;;  %v9218_v26 = vrot.slane %v5063_v41, %v10154_v43  ;;  %v5079_v41 = vcombine.high %v5045_v59, %v5061_v51  ;;  %v9244_v44 = vrot.slane %v5360_v27, %v10153_v2 }
 0x668   : > { %v9113_v40 = vpop.permute.xlu1 %3910  ;;  %v9115_v25 = vpop.permute.xlu0 %3914  ;;  %v5377_v19 = vcombine.high %v8951_v5, %v8961_v13  ;;  %v9249_v18 = vrot.slane %v5376_v12, %v10153_v2  ;;  %v5026_v59 = vcombine.high %v9232_v9, %v10076_v38  ;;  %v5375_v5 = vrot.slane %v5361_v24, %v10153_v2 }
 0x669   : > { %v9241_v60 = vrot.slane %v5078_v11, %v10154_v43  ;;  %v9261_v15 = vrot.slane %v5079_v41, %v10154_v43  ;;  %v5027_v27 = vcombine.high %v9081_v54, %v10076_v38  ;;  %v5324_v24 = vcombine.low %v9106_v0, %v9111_v7 }
 0x66a   : > { %4103 = vrot.lane.b32.xlu1 %v9092_v47, %s6911_s4  ;;  %5111 = vrot.lane.b32.xlu0 %v9101_v35, %s6911_s4  ;;  %v5391_v34 = vrot.slane %v5377_v19, %v10153_v2  ;;  %v5393_v13 = vcombine.high %v9244_v44, %v9249_v18  ;;  %v4026_v54 = vcombine.low %v9032_v62, %v9035_v52 }
 0x66c   : > { %v9132_v22 = vpop.permute.xlu1 %4310  ;;  %v9134_v16 = vpop.permute.xlu0 %4314  ;;  %v5408_v12 = vcombine.low %v5375_v5, %v5391_v34 }
 0x66e   : > { %4111 = vrot.lane.b32.xlu1 %v9126_v61, %s6912_s5  ;;  %5119 = vrot.lane.b32.xlu0 %v9137_v30, %s6912_s5 }
 0x670   : > { %v9154_v29 = vpop.permute.xlu1 %4318  ;;  %v9156_v55 = vpop.permute.xlu0 %4322 }
 0x672   : > { %4503 = vrot.lane.b32.xlu1 %v9148_v23, %s6913_s6  ;;  %5433 = vrot.lane.b32.xlu0 %v9159_v31, %s6913_s6 }
 0x674   : > { %v9184_v33 = vpop.permute.xlu1 %5898  ;;  %v9186_v37 = vpop.permute.xlu0 %5902 }
 0x676   : > { %4511 = vrot.lane.b32.xlu1 %v9166_v17, %s6911_s4  ;;  %5441 = vrot.lane.b32.xlu0 %v9189_v63, %s6911_s4 }
 0x678   : > { %v9203_v39 = vpop.permute.xlu1 %5906  ;;  %v9205_v36 = vpop.permute.xlu0 %5910 }
 0x67a   : > { %4519 = vrot.lane.b32.xlu1 %v9208_v46, %s6912_s5  ;;  %5449 = vrot.lane.b32.xlu0 %v9211_v10, %s6912_s5 }
 0x67c   : > { %v9224_v49 = vpop.permute.xlu1 %6228  ;;  %v9226_v32 = vpop.permute.xlu0 %6232 }
 0x67d   : > { %10163 = vst [vmem:[#allocation21_spill] sm:$0xff] %v9226_v32 }
 0x67e   : > { %5131 = vrot.lane.b32.xlu1 %v9218_v26, %s6913_s6  ;;  %6061 = vrot.lane.b32.xlu0 %v9229_v53, %s6913_s6 }
 0x680   : > { %v9251_v45 = vpop.permute.xlu1 %6236  ;;  %v9253_v32 = vpop.permute.xlu0 %6240 }
 0x682   : > { %5139 = vrot.lane.b32.xlu1 %v9241_v60, %s6911_s4  ;;  %5099 = vrot.lane.b32.xlu0 %v5026_v59, %s6915_s8  ;;  %v9283_v59 = vrot.slane %v5393_v13, %v10154_v43  ;;  %v5029_v13 = vcombine.high %v9137_v30, %v10076_v38  ;;  %v9317_v30 = vrot.slane %v4026_v54, %v10154_v43 }
 0x683   : > { %v4059_v54 = vcombine.high %v9078_v6, %v10076_v38  ;;  %v3943_v6 = vcombine.high %v9075_v21, %v9115_v25 }
 0x684   : > { %v9267_v51 = vpop.permute.xlu1 %3856  ;;  %v9269_v11 = vpop.permute.xlu0 %4773 }
 0x685   : > { %10164 = vst [vmem:[#allocation14_spill] sm:$0xff] %v9269_v11  ;;  %v5028_v11 = vcombine.high %v9101_v35, %v10076_v38  ;;  %v9302_v35 = vrot.slane %v5324_v24, %v10154_v43  ;;  %v4058_v24 = vcombine.high %v9317_v30, %v10076_v38 }
 0x686   : > { %5147 = vrot.lane.b32.xlu1 %v9261_v15, %s6912_s5  ;;  %5107 = vrot.lane.b32.xlu0 %v5027_v27, %s6914_s7  ;;  %v5409_v27 = vcombine.high %v5375_v5, %v5391_v34 }
 0x687   : > { %v5356_v34 = vcombine.high %v9302_v35, %v10076_v38 }
 0x688   : > { %v9278_v41 = vpop.permute.xlu1 %3864  ;;  %v9280_v19 = vpop.permute.xlu0 %4781  ;;  %v9312_v5 = vrot.slane %v5409_v27, %v10154_v43  ;;  %v5357_v27 = vcombine.high %v9159_v31, %v10076_v38  ;;  %v5358_v31 = vcombine.high %v9189_v63, %v10076_v38 }
 0x689   : > { %10165 = vst [vmem:[#allocation15_spill] sm:$0xff] %v9280_v19  ;;  %v9297_v19 = vrot.slane %v5408_v12, %v10154_v43 }
 0x68a   : > { %5461 = vrot.lane.b32.xlu1 %v9283_v59, %s6913_s6  ;;  %5115 = vrot.lane.b32.xlu0 %v5028_v11, %s6909_s29 }
 0x68c   : > { %v9292_v0 = vpop.permute.xlu1 %3872  ;;  %v9294_v7 = vpop.permute.xlu0 %4789 }
 0x68d   : > { %10166 = vst [vmem:[#allocation22_spill] sm:$0xff] %v9294_v7 }
 0x68e   : > { %5469 = vrot.lane.b32.xlu1 %v9297_v19, %s6911_s4  ;;  %5123 = vrot.lane.b32.xlu0 %v5029_v13, %s6910_s30  ;;  %v5952_v13 = vcombine.low %v9179_v58, %v9182_v42  ;;  %v4434_v42 = vcombine.low %v9095_v14, %v9098_v56  ;;  %v3927_v58 = vcombine.high %v9073_v8, %v9113_v40 }
 0x68f   : > { %v5359_v14 = vcombine.high %v9211_v10, %v10076_v38  ;;  %v4061_v10 = vcombine.high %v9126_v61, %v10076_v38 }
 0x690   : > { %v9307_v62 = vpop.permute.xlu1 %4801  ;;  %v9309_v52 = vpop.permute.xlu0 %5731 }
 0x691   : > { %10167 = vst [vmem:[#allocation23_spill] sm:$0xff] %v9309_v52 }
 0x692   : > { %5477 = vrot.lane.b32.xlu1 %v9312_v5, %s6912_s5  ;;  %5429 = vrot.lane.b32.xlu0 %v5356_v34, %s6915_s8  ;;  %v3926_v34 = vcombine.low %v9073_v8, %v9113_v40  ;;  %v9369_v8 = vrot.slane %v5952_v13, %v10154_v43  ;;  %v9386_v13 = vrot.slane %v4434_v42, %v10154_v43 }
 0x694   : > { %v9322_v11 = vpop.permute.xlu1 %4809  ;;  %v9324_v12 = vpop.permute.xlu0 %5739 }
 0x695   : > { %10168 = vst [vmem:[#allocation16_spill] sm:$0xff] %v9322_v11  ;;  %10169 = vst [vmem:[#allocation11_spill] sm:$0xff] %v9324_v12  ;;  %v3942_v12 = vcombine.low %v9075_v21, %v9115_v25  ;;  %v3941_v21 = vrot.slane %v3927_v58, %v10153_v2  ;;  %v4334_v58 = vcombine.low %v9132_v22, %v9154_v29 }
 0x696   : > { %4091 = vrot.lane.b32.xlu1 %v4058_v24, %s6915_s8  ;;  %5437 = vrot.lane.b32.xlu0 %v5357_v27, %s6914_s7  ;;  %v4060_v24 = vcombine.high %v9092_v47, %v10076_v38  ;;  %v9357_v27 = vrot.slane %v3926_v34, %v10153_v2  ;;  %v3957_v47 = vrot.slane %v3943_v6, %v10153_v2 }
 0x697   : > { %v9360_v63 = vrot.slane %v3942_v12, %v10153_v2  ;;  %v5984_v12 = vcombine.high %v9369_v8, %v10076_v38  ;;  %v4350_v6 = vcombine.low %v9134_v16, %v9156_v55  ;;  %v4351_v11 = vcombine.high %v9134_v16, %v9156_v55 }
 0x698   : > { %v9340_v52 = vpop.permute.xlu1 %4817  ;;  %v9342_v7 = vpop.permute.xlu0 %5747  ;;  %v3974_v34 = vcombine.low %v3941_v21, %v3957_v47 }
 0x699   : > { %10170 = vst [vmem:[#allocation32_spill] sm:$0xff] %v9340_v52  ;;  %10171 = vst [vmem:[#allocation43_spill] sm:$0xff] %v9342_v7  ;;  %v3959_v56 = vcombine.high %v9357_v27, %v9360_v63  ;;  %v4335_v52 = vcombine.high %v9132_v22, %v9154_v29  ;;  %v4468_v22 = vcombine.high %v9166_v17, %v10076_v38 }
 0x69a   : > { %4099 = vrot.lane.b32.xlu1 %v4059_v54, %s6914_s7  ;;  %5445 = vrot.lane.b32.xlu0 %v5358_v31, %s6909_s29  ;;  %v3982_v7 = vrot.slane %v3974_v34, %v10154_v43  ;;  %v4365_v16 = vrot.slane %v4351_v11, %v10153_v2  ;;  %v4469_v17 = vcombine.high %v9208_v46, %v10076_v38 }
 0x69b   : > { %v3973_v42 = vrot.slane %v3959_v56, %v10154_v43  ;;  %v4358_v56 = vrot.slane %v4350_v6, %v10153_v2  ;;  %v4349_v29 = vrot.slane %v4335_v52, %v10153_v2  ;;  %v3958_v6 = vcombine.low %v9357_v27, %v9360_v63 }
 0x69c   : > { %v9362_v54 = vpop.permute.xlu1 %3852  ;;  %v9364_v31 = vpop.permute.xlu0 %4769  ;;  %v5095_v27 = vcombine.high %v9218_v26, %v10076_v38 }
 0x69e   : > { %4107 = vrot.lane.b32.xlu1 %v4060_v24, %s6909_s29  ;;  %5453 = vrot.lane.b32.xlu0 %v5359_v14, %s6910_s30  ;;  %v4466_v14 = vcombine.high %v9386_v13, %v10076_v38 }
 0x6a0   : > { %v9377_v40 = vpop.permute.xlu1 %3860  ;;  %v9379_v25 = vpop.permute.xlu0 %4777 }
 0x6a1   : > { %10172 = vst [vmem:[#allocation44_spill] sm:$0xff] %v9379_v25 }
 0x6a2   : > { %4115 = vrot.lane.b32.xlu1 %v4061_v10, %s6910_s30  ;;  %6057 = vrot.lane.b32.xlu0 %v5984_v12, %s6915_s8  ;;  %v3975_v10 = vcombine.high %v3941_v21, %v3957_v47  ;;  %v4467_v12 = vcombine.high %v9148_v23, %v10076_v38  ;;  %v5062_v23 = vcombine.low %v9171_v50, %v9176_v3 }
 0x6a4   : > { %v9394_v24 = vpop.permute.xlu1 %3868  ;;  %v9396_v61 = vpop.permute.xlu0 %4785  ;;  %v3989_v34 = vrot.slane %v3975_v10, %v10154_v43  ;;  %v9441_v11 = vrot.slane %v5062_v23, %v10154_v43  ;;  %v4383_v10 = vcombine.high %v4349_v29, %v4365_v16 }
 0x6a5   : > { %10173 = vst [vmem:[#allocation45_spill] sm:$0xff] %v9396_v61  ;;  %v4342_v61 = vrot.slane %v4334_v58, %v10153_v2  ;;  %v4382_v58 = vcombine.low %v4349_v29, %v4365_v16  ;;  %v9470_v29 = vrot.slane %v3958_v6, %v10154_v43  ;;  %v5392_v16 = vcombine.low %v9244_v44, %v9249_v18 }
 0x6a6   : > { %4499 = vrot.lane.b32.xlu1 %v4466_v14, %s6915_s8  ;;  %4067 = vrot.lane.b32.xlu0 %v3973_v42, %s6913_s6  ;;  %v5094_v46 = vcombine.high %v9441_v11, %v10076_v38  ;;  %v9467_v63 = vrot.slane %v4383_v10, %v10154_v43 }
 0x6a7   : > { %v4367_v55 = vcombine.high %v4342_v61, %v4358_v56  ;;  %v3990_v26 = vcombine.high %v9470_v29, %v10076_v38  ;;  %v9487_v44 = vrot.slane %v5392_v16, %v10154_v43  ;;  %v5425_v16 = vcombine.high %v9283_v59, %v10076_v38 }
 0x6a8   : > { %v9412_v25 = vpop.permute.xlu1 %3876  ;;  %v9414_v14 = vpop.permute.xlu0 %4793  ;;  %v5426_v59 = vcombine.high %v9297_v19, %v10076_v38 }
 0x6a9   : > { %v9438_v52 = vrot.slane %v4367_v55, %v10154_v43  ;;  %v9455_v55 = vrot.slane %v4382_v58, %v10154_v43 }
 0x6aa   : > { %4507 = vrot.lane.b32.xlu1 %v4467_v12, %s6914_s7  ;;  %4075 = vrot.lane.b32.xlu0 %v3982_v7, %s6911_s4 }
 0x6ac   : > { %v9424_v21 = vpop.permute.xlu1 %4797  ;;  %v9426_v47 = vpop.permute.xlu0 %5727 }
 0x6ad   : > { %10174 = vst [vmem:[#allocation35_spill] sm:$0xff] %v9426_v47 }
 0x6ae   : > { %4515 = vrot.lane.b32.xlu1 %v4468_v22, %s6909_s29  ;;  %4083 = vrot.lane.b32.xlu0 %v3989_v34, %s6912_s5 }
 0x6b0   : > { %v9431_v50 = vpop.permute.xlu1 %4805  ;;  %v9433_v3 = vpop.permute.xlu0 %5735 }
 0x6b1   : > { %10175 = vst [vmem:[#allocation39_spill] sm:$0xff] %v9433_v3 }
 0x6b2   : > { %4523 = vrot.lane.b32.xlu1 %v4469_v17, %s6910_s30  ;;  %4475 = vrot.lane.b32.xlu0 %v9438_v52, %s6913_s6 }
 0x6b4   : > { %v9448_v12 = vpop.permute.xlu1 %4813  ;;  %v9450_v22 = vpop.permute.xlu0 %5743 }
 0x6b5   : > { %10176 = vst [vmem:[#allocation28_spill] sm:$0xff] %v9450_v22  ;;  %v3991_v22 = vcombine.high %v3973_v42, %v10076_v38  ;;  %v5988_v42 = vcombine.low %v9184_v33, %v9203_v39 }
 0x6b6   : > { %5127 = vrot.lane.b32.xlu1 %v5094_v46, %s6915_s8  ;;  %4483 = vrot.lane.b32.xlu0 %v9455_v55, %s6911_s4 }
 0x6b8   : > { %v9460_v23 = vpop.permute.xlu1 %4821  ;;  %v9462_v17 = vpop.permute.xlu0 %5751 }
 0x6b9   : > { %10177 = vst [vmem:[#allocation9_spill] sm:$0xff] %v9462_v17  ;;  %v5096_v17 = vcombine.high %v9241_v60, %v10076_v38  ;;  %v4366_v60 = vcombine.low %v4342_v61, %v4358_v56  ;;  %v6004_v61 = vcombine.low %v9186_v37, %v9205_v36 }
 0x6ba   : > { %5135 = vrot.lane.b32.xlu1 %v5095_v27, %s6914_s7  ;;  %4491 = vrot.lane.b32.xlu0 %v9467_v63, %s6912_s5  ;;  %v5097_v27 = vcombine.high %v9261_v15, %v10076_v38 }
 0x6bb   : > { %v9497_v15 = vrot.slane %v4366_v60, %v10154_v43 }
 0x6bc   : > { %v5760_v58 = vpop.permute.xlu1 %5759  ;;  %v3829_v46 = vpop.permute.xlu0 %3828 }
 0x6be   : > { %5143 = vrot.lane.b32.xlu1 %v5096_v17, %s6909_s29  ;;  %4063 = vrot.lane.b32.xlu0 %v3990_v26, %s6915_s8  ;;  %v5424_v17 = vcombine.high %v9487_v44, %v10076_v38  ;;  %v3992_v26 = vcombine.high %v3982_v7, %v10076_v38  ;;  %v3993_v7 = vcombine.high %v3989_v34, %v10076_v38 }
 0x6bf   : > { %v4398_v34 = vcombine.high %v9497_v15, %v10076_v38 }
 0x6c0   : > { %v5768_v6 = vpop.permute.xlu1 %5767  ;;  %v3837_v10 = vpop.permute.xlu0 %3836 }
 0x6c2   : > { %5151 = vrot.lane.b32.xlu1 %v5097_v27, %s6910_s30  ;;  %4071 = vrot.lane.b32.xlu0 %v3991_v22, %s6914_s7 }
 0x6c4   : > { %v5776_v18 = vpop.permute.xlu1 %5775  ;;  %v3845_v3 = vpop.permute.xlu0 %3844 }
 0x6c6   : > { %5457 = vrot.lane.b32.xlu1 %v5424_v17, %s6915_s8  ;;  %4079 = vrot.lane.b32.xlu0 %v3992_v26, %s6909_s29  ;;  %v5989_v17 = vcombine.high %v9184_v33, %v9203_v39  ;;  %v6005_v26 = vcombine.high %v9186_v37, %v9205_v36 }
 0x6c8   : > { %v5756_v56 = vpop.permute.xlu1 %5755  ;;  %v3825_v22 = vpop.permute.xlu0 %3824 }
 0x6c9   : > { %v5789_v27 = vsel %vm684_vm4, %v8991_v48, %v5756_v56  ;;  %v3879_v60 = vsel %vm684_vm4, %v8988_v20, %v3825_v22  ;;  %v9521_v48 = vrot.slane %v5988_v42, %v10153_v2  ;;  %v9524_v20 = vrot.slane %v6004_v61, %v10153_v2 }
 0x6ca   : > { %5465 = vrot.lane.b32.xlu1 %v5425_v16, %s6914_s7  ;;  %4087 = vrot.lane.b32.xlu0 %v3993_v7, %s6910_s30  ;;  %v5790_v56 = vsel %vm686_vm5, %v5789_v27, %v5760_v58  ;;  %v3880_v33 = vsel %vm686_vm5, %v3879_v60, %v3829_v46  ;;  %v6003_v61 = vrot.slane %v5989_v17, %v10153_v2 }
 0x6cb   : > { %v6019_v58 = vrot.slane %v6005_v26, %v10153_v2  ;;  %v6021_v46 = vcombine.high %v9521_v48, %v9524_v20  ;;  %v5427_v27 = vcombine.high %v9312_v5, %v10076_v38  ;;  %v4399_v60 = vcombine.high %v9438_v52, %v10076_v38 }
 0x6cc   : > { %v5764_v22 = vpop.permute.xlu1 %5763  ;;  %v3833_v39 = vpop.permute.xlu0 %3832  ;;  %v5937_v5 = vcombine.high %v8997_v28, %v9017_v4  ;;  %v6318_v52 = vcombine.low %v9224_v49, %v9251_v45 }
 0x6cd   : > { %v5791_v37 = vsel %vm688_vm6, %v5790_v56, %v5764_v22  ;;  %v3881_v36 = vsel %vm688_vm6, %v3880_v33, %v3833_v39  ;;  %v10178_v56 = vld [vmem:[#allocation21_spill] sm:$0xff] }
 0x6ce   : > { %5473 = vrot.lane.b32.xlu1 %v5426_v59, %s6909_s29  ;;  %4471 = vrot.lane.b32.xlu0 %v4398_v34, %s6915_s8  ;;  %v5792_v19 = vsel %vm690_vm7, %v5791_v37, %v5768_v6  ;;  %v3882_v42 = vsel %vm690_vm7, %v3881_v36, %v3837_v10  ;;  %v5921_v10 = vcombine.high %v8995_v57, %v9015_v1 }
 0x6cf   : > { %v6036_v34 = vcombine.low %v6003_v61, %v6019_v58  ;;  %v6334_v22 = vcombine.low %v10178_v56, %v9253_v32  ;;  %v9557_v1 = vrot.slane %v6021_v46, %v10154_v43  ;;  %v5951_v39 = vrot.slane %v5937_v5, %v10153_v2  ;;  %v10183_v5 = vld [vmem:[#allocation19_spill] sm:$0xff] }
 0x6d0   : > { %v5772_v16 = vpop.permute.xlu1 %5771  ;;  %v3841_v7 = vpop.permute.xlu0 %3840  ;;  %v5935_v4 = vrot.slane %v5921_v10, %v10153_v2  ;;  %v6037_v37 = vcombine.high %v6003_v61, %v6019_v58  ;;  %v6335_v46 = vcombine.high %v10178_v56, %v9253_v32  ;;  %v10181_v10 = vld [vmem:[#allocation18_spill] sm:$0xff] }
 0x6d1   : > { %v5793_v59 = vsel %vm692_vm8, %v5792_v19, %v5772_v16  ;;  %v3883_v6 = vsel %vm692_vm8, %v3882_v42, %v3841_v7  ;;  %v9573_v36 = vrot.slane %v6036_v34, %v10154_v43  ;;  %v6319_v19 = vcombine.high %v9224_v49, %v9251_v45 }
 0x6d2   : > { %5481 = vrot.lane.b32.xlu1 %v5427_v27, %s6910_s30  ;;  %4479 = vrot.lane.b32.xlu0 %v4399_v60, %s6914_s7  ;;  %v5794_v17 = vsel %vm694_vm9, %v5793_v59, %v5776_v18  ;;  %v3884_v26 = vsel %vm694_vm9, %v3883_v6, %v3845_v3  ;;  %v4400_v18 = vcombine.high %v9455_v55, %v10076_v38  ;;  %v10180_v6 = vld [vmem:[#allocation13_spill] sm:$0xff] }
 0x6d3   : > { %v4401_v55 = vcombine.high %v9467_v63, %v10076_v38  ;;  %v9580_v42 = vrot.slane %v6318_v52, %v10153_v2  ;;  %v9585_v16 = vrot.slane %v6334_v22, %v10153_v2  ;;  %v5968_v63 = vcombine.low %v5935_v4, %v5951_v39 }
 0x6d4   : > { %v5780_v33 = vpop.permute.xlu1 %5779  ;;  %v3849_v57 = vpop.permute.xlu0 %3848  ;;  %v5985_v45 = vcombine.high %v9229_v53, %v10076_v38  ;;  %v6333_v49 = vrot.slane %v6319_v19, %v10153_v2  ;;  %v6349_v32 = vrot.slane %v6335_v46, %v10153_v2  ;;  %v6051_v59 = vrot.slane %v6037_v37, %v10154_v43 }
 0x6d5   : > { %v9562_v3 = vsel %vm696_vm11, %v5794_v17, %v5780_v33  ;;  %v9565_v28 = vsel %vm696_vm11, %v3884_v26, %v3849_v57  ;;  %v6351_v58 = vcombine.high %v9580_v42, %v9585_v16  ;;  %v6250_v53 = vcombine.low %v10181_v10, %v10180_v6  ;;  %v10182_v26 = vld [vmem:[#allocation20_spill] sm:$0xff] }
 0x6d6   : > { %10179 = vst [vmem:[#allocation33_spill] sm:$0xff] %v9562_v3  ;;  %6089 = vrot.lane.b32.xlu1 %v9557_v1, %s6913_s6  ;;  %4487 = vrot.lane.b32.xlu0 %v4400_v18, %s6909_s29  ;;  %v5976_v17 = vrot.slane %v5968_v63, %v10154_v43  ;;  %v6266_v34 = vcombine.low %v10183_v5, %v10182_v26 }
 0x6d7   : > { %v6366_v52 = vcombine.low %v6333_v49, %v6349_v32  ;;  %v9617_v33 = vrot.slane %v6351_v58, %v10154_v43  ;;  %v5969_v57 = vcombine.high %v5935_v4, %v5951_v39  ;;  %v6258_v18 = vrot.slane %v6250_v53, %v10153_v2 }
 0x6d8   : > { %v9587_v7 = vpop.permute.xlu1 %4095  ;;  %v9589_v61 = vpop.permute.xlu0 %5103  ;;  %v5986_v37 = vcombine.high %v5976_v17, %v10076_v38  ;;  %v6020_v19 = vcombine.low %v9521_v48, %v9524_v20  ;;  %v6367_v46 = vcombine.high %v6333_v49, %v6349_v32 }
 0x6d9   : > { %v9632_v58 = vrot.slane %v6366_v52, %v10154_v43  ;;  %v5983_v20 = vrot.slane %v5969_v57, %v10154_v43  ;;  %v6251_v57 = vcombine.high %v10181_v10, %v10180_v6 }
 0x6da   : > { %6097 = vrot.lane.b32.xlu1 %v9573_v36, %s6911_s4  ;;  %4495 = vrot.lane.b32.xlu0 %v4401_v55, %s6910_s30  ;;  %v6274_v55 = vrot.slane %v6266_v34, %v10153_v2  ;;  %v9642_v48 = vrot.slane %v6367_v46, %v10154_v43  ;;  %v9646_v49 = vrot.slane %v6020_v19, %v10154_v43 }
 0x6db   : > { %v5987_v52 = vcombine.high %v5983_v20, %v10076_v38  ;;  %v6267_v19 = vcombine.high %v10183_v5, %v10182_v26  ;;  %v6265_v6 = vrot.slane %v6251_v57, %v10153_v2  ;;  %v6350_v26 = vcombine.low %v9580_v42, %v9585_v16 }
 0x6dc   : > { %v9600_v27 = vpop.permute.xlu1 %4103  ;;  %v9602_v60 = vpop.permute.xlu0 %5111  ;;  %v6282_v4 = vcombine.low %v6258_v18, %v6274_v55  ;;  %v6052_v34 = vcombine.high %v9646_v49, %v10076_v38  ;;  %v6283_v46 = vcombine.high %v6258_v18, %v6274_v55  ;;  %v6055_v57 = vcombine.high %v6051_v59, %v10076_v38 }
 0x6dd   : > { %v6281_v10 = vrot.slane %v6267_v19, %v10153_v2  ;;  %v9697_v19 = vrot.slane %v6350_v26, %v10154_v43 }
 0x6de   : > { %6105 = vrot.lane.b32.xlu1 %v6051_v59, %s6912_s5  ;;  %6065 = vrot.lane.b32.xlu0 %v5985_v45, %s6914_s7  ;;  %v6297_v55 = vrot.slane %v6283_v46, %v10154_v43 }
 0x6df   : > { %v6382_v59 = vcombine.high %v9697_v19, %v10076_v38 }
 0x6e0   : > { %v9612_v56 = vpop.permute.xlu1 %4111  ;;  %v9614_v22 = vpop.permute.xlu0 %5119 }
 0x6e2   : > { %6419 = vrot.lane.b32.xlu1 %v9617_v33, %s6913_s6  ;;  %6069 = vrot.lane.b32.xlu0 %v5976_v17, %s6911_s4 }
 0x6e4   : > { %v9627_v63 = vpop.permute.xlu1 %4503  ;;  %v9629_v45 = vpop.permute.xlu0 %5433 }
 0x6e6   : > { %6427 = vrot.lane.b32.xlu1 %v9632_v58, %s6911_s4  ;;  %6073 = vrot.lane.b32.xlu0 %v5986_v37, %s6909_s29  ;;  %v9659_v37 = vrot.slane %v6282_v4, %v10154_v43 }
 0x6e8   : > { %v9637_v39 = vpop.permute.xlu1 %4511  ;;  %v9639_v53 = vpop.permute.xlu0 %5441  ;;  %v6314_v4 = vcombine.high %v9659_v37, %v10076_v38 }
 0x6ea   : > { %6435 = vrot.lane.b32.xlu1 %v9642_v48, %s6912_s5  ;;  %6077 = vrot.lane.b32.xlu0 %v5983_v20, %s6912_s5  ;;  %v6053_v20 = vcombine.high %v9557_v1, %v10076_v38  ;;  %v6054_v1 = vcombine.high %v9573_v36, %v10076_v38  ;;  %v6315_v36 = vcombine.high %v6297_v55, %v10076_v38 }
 0x6ec   : > { %v9651_v32 = vpop.permute.xlu1 %4519  ;;  %v9653_v17 = vpop.permute.xlu0 %5449 }
 0x6ee   : > { %6085 = vrot.lane.b32.xlu1 %v6052_v34, %s6915_s8  ;;  %6081 = vrot.lane.b32.xlu0 %v5987_v52, %s6910_s30  ;;  %v6298_v52 = vcombine.low %v6265_v6, %v6281_v10 }
 0x6f0   : > { %v9667_v3 = vpop.permute.xlu1 %5131  ;;  %v9669_v47 = vpop.permute.xlu0 %6061 }
 0x6f2   : > { %6093 = vrot.lane.b32.xlu1 %v6053_v20, %s6914_s7  ;;  %6387 = vrot.lane.b32.xlu0 %v6314_v4, %s6915_s8  ;;  %v6306_v4 = vrot.slane %v6298_v52, %v10154_v43 }
 0x6f4   : > { %v9681_v5 = vpop.permute.xlu1 %5139  ;;  %v5100_v18 = vpop.permute.xlu0 %5099 }
 0x6f5   : > { %v5154_v34 = vsel %vm684_vm4, %v9232_v9, %v5100_v18 }
 0x6f6   : > { %6101 = vrot.lane.b32.xlu1 %v6054_v1, %s6909_s29  ;;  %6391 = vrot.lane.b32.xlu0 %v6297_v55, %s6913_s6  ;;  %v5155_v2 = vsel %vm686_vm5, %v5154_v34, %v9589_v61  ;;  %v6299_v1 = vcombine.high %v6265_v6, %v6281_v10  ;;  %v6383_v34 = vcombine.high %v9617_v33, %v10076_v38 }
 0x6f8   : > { %v9692_v42 = vpop.permute.xlu1 %5147  ;;  %v5108_v16 = vpop.permute.xlu0 %5107  ;;  %v6313_v6 = vrot.slane %v6299_v1, %v10154_v43 }
 0x6f9   : > { %v5156_v9 = vsel %vm688_vm6, %v5155_v2, %v5108_v16  ;;  %v6316_v2 = vcombine.high %v6306_v4, %v10076_v38 }
 0x6fa   : > { %6109 = vrot.lane.b32.xlu1 %v6055_v57, %s6910_s30  ;;  %6395 = vrot.lane.b32.xlu0 %v6315_v36, %s6914_s7  ;;  %v5157_v61 = vsel %vm690_vm7, %v5156_v9, %v9602_v60 }
 0x6fc   : > { %v9704_v46 = vpop.permute.xlu1 %5461  ;;  %v5116_v20 = vpop.permute.xlu0 %5115 }
 0x6fd   : > { %v5158_v26 = vsel %vm692_vm8, %v5157_v61, %v5116_v20  ;;  %v6385_v61 = vcombine.high %v9642_v48, %v10076_v38  ;;  %v6317_v20 = vcombine.high %v6313_v6, %v10076_v38 }
 0x6fe   : > { %6415 = vrot.lane.b32.xlu1 %v6382_v59, %s6915_s8  ;;  %6399 = vrot.lane.b32.xlu0 %v6306_v4, %s6911_s4  ;;  %v5159_v18 = vsel %vm694_vm9, %v5158_v26, %v9614_v22  ;;  %v6384_v22 = vcombine.high %v9632_v58, %v10076_v38 }
 0x700   : > { %v9714_v55 = vpop.permute.xlu1 %5469  ;;  %v5124_v60 = vpop.permute.xlu0 %5123 }
 0x701   : > { %v9720_v52 = vsel %vm696_vm11, %v5159_v18, %v5124_v60 }
 0x702   : > { %6423 = vrot.lane.b32.xlu1 %v6383_v34, %s6914_s7  ;;  %6403 = vrot.lane.b32.xlu0 %v6316_v2, %s6909_s29 }
 0x704   : > { %v9724_v16 = vpop.permute.xlu1 %5477  ;;  %v5430_v57 = vpop.permute.xlu0 %5429 }
 0x705   : > { %v5484_v33 = vsel %vm684_vm4, %v9302_v35, %v5430_v57 }
 0x706   : > { %6431 = vrot.lane.b32.xlu1 %v6384_v22, %s6909_s29  ;;  %6407 = vrot.lane.b32.xlu0 %v6313_v6, %s6912_s5  ;;  %v5485_v10 = vsel %vm686_vm5, %v5484_v33, %v9629_v45  ;;  %s6730_s5 = sshll.u32 %s6965_s16, 7  ;;  %s6923_s16 = smov [#allocation3]  }
 0x707   : > { %s9993_s10 = scalar_lea.hbm %s10038_s3, %s6730_s5 }
 0x708   : > { %v4092_v36 = vpop.permute.xlu1 %4091  ;;  %v5438_v9 = vpop.permute.xlu0 %5437 }
 0x709   : > { %v4125_v43 = vsel %vm684_vm4, %v9317_v30, %v4092_v36  ;;  %v5486_v58 = vsel %vm688_vm6, %v5485_v10, %v5438_v9 }
 0x70a   : > { %6439 = vrot.lane.b32.xlu1 %v6385_v61, %s6910_s30  ;;  %6411 = vrot.lane.b32.xlu0 %v6317_v20, %s6910_s30  ;;  %v5487_v35 = vsel %vm690_vm7, %v5486_v58, %v9639_v53  ;;  %v4126_v45 = vsel %vm686_vm5, %v4125_v43, %v9587_v7  ;;  %s161_s30 = sand.u32 1, %s6899_s13  }
 0x70b   : > { %s6647_s4 = sshll.u32 %s161_s30, 3  ;;  %s6570_s11 = scalar_lea.sflag [#allocation4], %s161_s30 }
 0x70c   : > { %v4100_v59 = vpop.permute.xlu1 %4099  ;;  %v5446_v4 = vpop.permute.xlu0 %5445  ;;  %s163_s6 = scalar_lea.vmem [#allocation3], %s6647_s4 }
 0x70d   : > { %v4127_v48 = vsel %vm688_vm6, %v4126_v45, %v4100_v59  ;;  %v5488_v26 = vsel %vm692_vm8, %v5487_v35, %v5446_v4  ;;  %s6584_s7 = sshll.u32 %s163_s6, 4  ;;  %s9995_s7 = int_to_ptr.vmem [resolvable:$true] %s6584_s7 }
 0x70e   : > { %v5489_v30 = vsel %vm694_vm9, %v5488_v26, %v9653_v17  ;;  %v4128_v18 = vsel %vm690_vm7, %v4127_v48, %v9600_v27  ;;  %s6845_s17 = scalar_lea.vmem %s9995_s7, 128 }
 0x70f   : > { %p6846_p11 = scmp.ne.s32.totalorder %s9995_s7, %s6845_s17 }
 0x710   : > { %v4108_v1 = vpop.permute.xlu1 %4107  ;;  %v5454_v60 = vpop.permute.xlu0 %5453 }
 0x711   : > { %v4129_v34 = vsel %vm692_vm8, %v4128_v18, %v4108_v1  ;;  %v9755_v53 = vsel %vm696_vm11, %v5489_v30, %v5454_v60  ;;  %p6847_p12 = pnand %p6846_p11, %p6982_p5 }
 0x712   : > { %v4130_v57 = vsel %vm694_vm9, %v4129_v34, %v9612_v56 }
 0x713   : > { %p6848_p13 = pneg %p6847_p12 }
 0x714   : > { %v4116_v7 = vpop.permute.xlu1 %4115  ;;  %v6058_v2 = vpop.permute.xlu0 %6057 }
 0x715   : > { %v6112_v22 = vsel %vm684_vm4, %v9369_v8, %v6058_v2  ;;  %v4131_v17 = vsel %vm696_vm11, %v4130_v57, %v4116_v7 }
 0x716   : > { %6690 = vmatprep.subr.msk.mxu1 %vm950_vm10, %v4131_v17  ;;  %v9765_v27 = vsel %vm686_vm5, %v6112_v22, %v9669_v47 }
 0x718   : > { %v4500_v6 = vpop.permute.xlu1 %4499  ;;  %v4068_v33 = vpop.permute.xlu0 %4067 }
 0x719   : > { %v4533_v10 = vsel %vm684_vm4, %v9386_v13, %v4500_v6 }
 0x71a   : > { %v4534_v36 = vsel %vm686_vm5, %v4533_v10, %v9627_v63 }
 0x71c   : > { %v4508_v56 = vpop.permute.xlu1 %4507  ;;  %v4076_v9 = vpop.permute.xlu0 %4075 }
 0x71d   : > { %v4535_v8 = vsel %vm688_vm6, %v4534_v36, %v4508_v56 }
 0x71e   : > { %v4536_v61 = vsel %vm690_vm7, %v4535_v8, %v9637_v39 }
 0x720   : > { %v4516_v20 = vpop.permute.xlu1 %4515  ;;  %v4084_v43 = vpop.permute.xlu0 %4083 }
 0x721   : > { %v4537_v47 = vsel %vm692_vm8, %v4536_v61, %v4516_v20 }
 0x722   : > { %v4538_v58 = vsel %vm694_vm9, %v4537_v47, %v9651_v32 }
 0x724   : > { %v4524_v35 = vpop.permute.xlu1 %4523  ;;  %v4476_v45 = vpop.permute.xlu0 %4475 }
 0x725   : > { %v4539_v20 = vsel %vm696_vm11, %v4538_v58, %v4524_v35  ;;  %v10186_v35 = vld [vmem:[#allocation8_spill] sm:$0xff] }
 0x728   : > { %v5128_v13 = vpop.permute.xlu1 %5127  ;;  %v4484_v59 = vpop.permute.xlu0 %4483 }
 0x729   : > { %v5161_v63 = vsel %vm684_vm4, %v9441_v11, %v5128_v13  ;;  %v10184_v11 = vld [vmem:[#allocation17_spill] sm:$0xff] }
 0x72a   : > { %v5162_v4 = vsel %vm686_vm5, %v5161_v63, %v9667_v3  ;;  %v3886_v34 = vsel %vm684_vm4, %v10184_v11, %v9362_v54 }
 0x72b   : > { %v3887_v57 = vsel %vm686_vm5, %v3886_v34, %v9267_v51 }
 0x72c   : > { %v5136_v48 = vpop.permute.xlu1 %5135  ;;  %v9781_v26 = vpop.permute.xlu0 %4491 }
 0x72d   : > { %v5163_v39 = vsel %vm688_vm6, %v5162_v4, %v5136_v48 }
 0x72e   : > { %v5164_v30 = vsel %vm690_vm7, %v5163_v39, %v9681_v5 }
 0x730   : > { %v5144_v18 = vpop.permute.xlu1 %5143  ;;  %v4064_v32 = vpop.permute.xlu0 %4063 }
 0x731   : > { %v5165_v1 = vsel %vm692_vm8, %v5164_v30, %v5144_v18  ;;  %v4118_v60 = vsel %vm684_vm4, %v9470_v29, %v4064_v32  ;;  %v3888_v29 = vsel %vm688_vm6, %v3887_v57, %v9377_v40  ;;  %v10187_v30 = vld [vmem:[#allocation14_spill] sm:$0xff]  ;;  %v10191_v57 = vld [vmem:[#allocation45_spill] sm:$0xff] }
 0x732   : > { %v9794_v3 = vsel %vm694_vm9, %v5165_v1, %v9692_v42  ;;  %v4119_v2 = vsel %vm686_vm5, %v4118_v60, %v4068_v33  ;;  %v3889_v42 = vsel %vm690_vm7, %v3888_v29, %v9278_v41 }
 0x733   : > { %v3890_v51 = vsel %vm692_vm8, %v3889_v42, %v9394_v24 }
 0x734   : > { %v9796_v7 = vpop.permute.xlu1 %5151  ;;  %v4072_v5 = vpop.permute.xlu0 %4071  ;;  %v3891_v41 = vsel %vm694_vm9, %v3890_v51, %v9292_v0 }
 0x735   : > { %v4120_v22 = vsel %vm688_vm6, %v4119_v2, %v4072_v5  ;;  %v3892_v24 = vsel %vm696_vm11, %v3891_v41, %v9412_v25  ;;  %v10190_v2 = vld [vmem:[#allocation15_spill] sm:$0xff] }
 0x736   : > { %v4121_v54 = vsel %vm690_vm7, %v4120_v22, %v4076_v9  ;;  %v6689_v9 = vld [vmem:[%s10037_s2 + $0x4] sm:$0xf]  ;;  %v10194_v41 = vld [vmem:[#allocation35_spill] sm:$0xff] }
 0x738   : > { %v5458_v17 = vpop.permute.xlu1 %5457  ;;  %v4080_v6 = vpop.permute.xlu0 %4079 }
 0x739   : > { %v5491_v10 = vsel %vm684_vm4, %v9487_v44, %v5458_v17  ;;  %v4122_v33 = vsel %vm692_vm8, %v4121_v54, %v4080_v6  ;;  %v6696_v54 = vld [vmem:[%s10037_s2 + $0x8] sm:$0xf]  ;;  %v10192_v6 = vld [vmem:[#allocation32_spill] sm:$0xff] }
 0x73a   : > { %v5492_v36 = vsel %vm686_vm5, %v5491_v10, %v9704_v46  ;;  %v4123_v8 = vsel %vm694_vm9, %v4122_v33, %v4084_v43  ;;  %v10193_v33 = vld [vmem:[#allocation22_spill] sm:$0xff] }
 0x73c   : > { %v5466_v56 = vpop.permute.xlu1 %5465  ;;  %v4088_v40 = vpop.permute.xlu0 %4087 }
 0x73d   : > { %v5493_v44 = vsel %vm688_vm6, %v5492_v36, %v5466_v56  ;;  %v4124_v61 = vsel %vm696_vm11, %v4123_v8, %v4088_v40  ;;  %v5167_v36 = vsel %vm696_vm11, %v9794_v3, %v9796_v7 }
 0x73e   : > { %6691 = vmatpush1.msk.msra.mxu1 %vm950_vm10, %v4124_v61  ;;  %v5494_v46 = vsel %vm690_vm7, %v5493_v44, %v9714_v55  ;;  %v10185_v55 = vld [vmem:[#allocation10_spill] sm:$0xff]  ;;  %v10195_v44 = vld [vmem:[#allocation12_spill] sm:$0xff] }
 0x73f   : > { %6692 = vmatmul.mubr.msk.f32.vlgmr.msra.gmra.mrb[0].mxu1 %vm946_vm12, %v6689_v9  ;;  %6693 = vmatprep.subr.msk.mxu1 %vm950_vm10, %v3892_v24  ;;  %v4831_v13 = vsel %vm684_vm4, %v10185_v55, %v9424_v21  ;;  %v5782_v61 = vsel %vm684_vm4, %v10195_v44, %v10194_v41 }
 0x740   : > { %v5474_v43 = vpop.permute.xlu1 %5473  ;;  %6694 = vmatpush1.msk.msra.mxu1 %vm950_vm10, %v9565_v28  ;;  %v4472_v0 = vpop.permute.xlu0 %4471  ;;  %4287 = vmatprep.mubr.f32.mxu1 %v10076_v38  ;;  %v4824_v28 = vsel %vm684_vm4, %v10186_v35, %v9364_v31  ;;  %v4832_v39 = vsel %vm686_vm5, %v4831_v13, %v9307_v62  ;;  %v10188_v31 = vld [vmem:[#allocation44_spill] sm:$0xff]  ;;  %v10199_v35 = vld [vmem:[#allocation11_spill] sm:$0xff] }
 0x741   : > { %v5495_v25 = vsel %vm692_vm8, %v5494_v46, %v5474_v43  ;;  %v4526_v47 = vsel %vm684_vm4, %v9497_v15, %v4472_v0  ;;  %6697 = vmatprep.subr.msk.mxu1 %vm950_vm10, %v4539_v20  ;;  %v3893_v15 = vld [vmem:[%s10037_s2] sm:$0xf]  ;;  %v4833_v18 = vsel %vm688_vm6, %v4832_v39, %v9431_v50  ;;  %v6704_v20 = vld [vmem:[%s10037_s2 + $0x10] sm:$0xf]  ;;  %v10196_v43 = vld [vmem:[#allocation23_spill] sm:$0xff] }
 0x742   : > { %v5496_v58 = vsel %vm694_vm9, %v5495_v25, %v9724_v16  ;;  %v4527_v4 = vsel %vm686_vm5, %v4526_v47, %v4476_v45  ;;  %v4825_v16 = vsel %vm686_vm5, %v4824_v28, %v10187_v30  ;;  %v10189_v62 = vld [vmem:[#allocation16_spill] sm:$0xff]  ;;  %v10197_v0 = vld [vmem:[#allocation39_spill] sm:$0xff]  ;;  %v6708_v39 = vld [vmem:[%s10037_s2 + $0x14] sm:$0xf] }
 0x743   : > { %v4826_v32 = vsel %vm688_vm6, %v4825_v16, %v10188_v31  ;;  %v4834_v11 = vsel %vm690_vm7, %v4833_v18, %v10189_v62  ;;  %v10202_v16 = vld [vmem:[#allocation9_spill] sm:$0xff] }
 0x744   : > { %v5482_v63 = vpop.permute.xlu1 %5481  ;;  %v4480_v48 = vpop.permute.xlu0 %4479  ;;  %v4827_v5 = vsel %vm690_vm7, %v4826_v32, %v10190_v2  ;;  %v4835_v50 = vsel %vm692_vm8, %v4834_v11, %v9448_v12 }
 0x745   : > { %v4528_v21 = vsel %vm688_vm6, %v4527_v4, %v4480_v48  ;;  %v4828_v22 = vsel %vm692_vm8, %v4827_v5, %v10191_v57  ;;  %v4836_v42 = vsel %vm694_vm9, %v4835_v50, %v10192_v6  ;;  %v5497_v9 = vsel %vm696_vm11, %v5496_v58, %v5482_v63  ;;  %v10198_v58 = vld [vmem:[#allocation33_spill] sm:$0xff]  ;;  %v10200_v63 = vld [vmem:[#allocation28_spill] sm:$0xff]  ;;  %v6712_v5 = vld [vmem:[%s10037_s2 + $0x18] sm:$0xf] }
 0x746   : > { %v4529_v1 = vsel %vm690_vm7, %v4528_v21, %v4484_v59  ;;  %v4829_v12 = vsel %vm694_vm9, %v4828_v22, %v10193_v33  ;;  %v4837_v51 = vsel %vm696_vm11, %v4836_v42, %v9460_v23 }
 0x747   : > { %6695 = vmatmul.mubr.msk.f32.vlgmr.msra.gmra.mrb[0].mxu1 %vm946_vm12, %v3893_v15 }
 0x748   : > { %v6090_v45 = vpop.permute.xlu1 %6089  ;;  %v4488_v60 = vpop.permute.xlu0 %4487  ;;  %4615 = vmatprep.mubr.f32.mxu1 %v10076_v38 }
 0x749   : > { %v4530_v34 = vsel %vm692_vm8, %v4529_v1, %v4488_v60 }
 0x74a   : > { %v4531_v59 = vsel %vm694_vm9, %v4530_v34, %v9781_v26  ;;  %v4830_v26 = vsel %vm696_vm11, %v4829_v12, %v9414_v14  ;;  %v6700_v14 = vld [vmem:[%s10037_s2 + $0xc] sm:$0xf] }
 0x74c   : > { %v6098_v29 = vpop.permute.xlu1 %6097  ;;  %v4496_v17 = vpop.permute.xlu0 %4495 }
 0x74d   : > { %v4532_v10 = vsel %vm696_vm11, %v4531_v59, %v4496_v17 }
 0x74e   : > { %6698 = vmatpush1.msk.msra.mxu1 %vm950_vm10, %v4532_v10  ;;  %v6716_v10 = vld [vmem:[%s10037_s2 + $0x1c] sm:$0xf] }
 0x74f   : > { %6699 = vmatmul.mubr.msk.f32.vlgmr.msra.gmra.mrb[0].mxu1 %vm946_vm12, %v6696_v54  ;;  %6701 = vmatprep.subr.msk.mxu1 %vm950_vm10, %v4837_v51 }
 0x750   : > { %v6106_v56 = vpop.permute.xlu1 %6105  ;;  %6702 = vmatpush1.msk.msra.mxu1 %vm950_vm10, %v4830_v26  ;;  %v6066_v40 = vpop.permute.xlu0 %6065  ;;  %4913 = vmatprep.mubr.f32.mxu1 %v10076_v38 }
 0x751   : > { %6705 = vmatprep.subr.msk.mxu1 %vm950_vm10, %v5167_v36  ;;  %v6114_v60 = vsel %vm688_vm6, %v9765_v27, %v6066_v40 }
 0x754   : > { %v6420_v23 = vpop.permute.xlu1 %6419  ;;  %v6070_v8 = vpop.permute.xlu0 %6069 }
 0x755   : > { %v6115_v62 = vsel %vm690_vm7, %v6114_v60, %v6070_v8 }
 0x757   : > { %6703 = vmatmul.mubr.msk.f32.vlgmr.msra.gmra.mrb[0].mxu1 %vm946_vm12, %v6700_v14 }
 0x758   : > { %6706 = vmatpush1.msk.msra.mxu1 %vm950_vm10, %v9720_v52  ;;  %v6428_v3 = vpop.permute.xlu1 %6427  ;;  %v6074_v7 = vpop.permute.xlu0 %6073  ;;  %5243 = vmatprep.mubr.f32.mxu1 %v10076_v38  ;;  %v5783_v52 = vsel %vm686_vm5, %v5782_v61, %v10196_v43 }
 0x759   : > { %6709 = vmatprep.subr.msk.mxu1 %vm950_vm10, %v5497_v9  ;;  %v5784_v25 = vsel %vm688_vm6, %v5783_v52, %v10197_v0  ;;  %v6116_v50 = vsel %vm692_vm8, %v6115_v62, %v6074_v7 }
 0x75a   : > { %v5785_v28 = vsel %vm690_vm7, %v5784_v25, %v10199_v35 }
 0x75b   : > { %v5786_v4 = vsel %vm692_vm8, %v5785_v28, %v10200_v63 }
 0x75c   : > { %v9905_v24 = vpop.permute.xlu1 %6435  ;;  %v6078_v46 = vpop.permute.xlu0 %6077 }
 0x75d   : > { %v6117_v22 = vsel %vm694_vm9, %v6116_v50, %v6078_v46 }
 0x75f   : > { %6707 = vmatmul.mubr.msk.f32.vlgmr.msra.gmra.mrb[0].mxu1 %vm946_vm12, %v6704_v20 }
 0x760   : > { %6710 = vmatpush1.msk.msra.mxu1 %vm950_vm10, %v9755_v53  ;;  %v6086_v47 = vpop.permute.xlu1 %6085  ;;  %v6082_v55 = vpop.permute.xlu0 %6081  ;;  %5573 = vmatprep.mubr.f32.mxu1 %v10076_v38 }
 0x761   : > { %v6119_v13 = vsel %vm684_vm4, %v9646_v49, %v6086_v47  ;;  %6713 = vmatprep.subr.msk.mxu1 %vm950_vm10, %v10198_v58  ;;  %v10201_v49 = vld [vmem:[#allocation43_spill] sm:$0xff]  ;;  %v6118_v27 = vsel %vm696_vm11, %v6117_v22, %v6082_v55 }
 0x762   : > { %v6120_v48 = vsel %vm686_vm5, %v6119_v13, %v6090_v45  ;;  %v5787_v30 = vsel %vm694_vm9, %v5786_v4, %v10201_v49 }
 0x763   : > { %v5788_v18 = vsel %vm696_vm11, %v5787_v30, %v10202_v16  ;;  %v6844_v16 = vld [vmem:[%s6997_s28] sm:$0xff]  ;;  %s6849_s28 = sshll.u32 %s6923_s16, 4  ;;  %s6850_s28 = int_to_ptr.vmem [resolvable:$false] %s6849_s28 }
 0x764   : > { %v6094_v15 = vpop.permute.xlu1 %6093  ;;  %v6388_v53 = vpop.permute.xlu0 %6387  ;;  %s6851_s19 = scalar_lea.vmem %s6850_s28, 256  ;;  %p6852_p0 = scmp.lt.s32.totalorder %s9995_s7, %s6850_s28 }
 0x765   : > { %v6121_v21 = vsel %vm688_vm6, %v6120_v48, %v6094_v15  ;;  %v6442_v12 = vsel %vm684_vm4, %v9659_v37, %v6388_v53  ;;  %p6853_p1 = scmp.lt.s32.totalorder %s6851_s19, %s6845_s17 }
 0x766   : > { %v6122_v31 = vsel %vm690_vm7, %v6121_v21, %v6098_v29 }
 0x767   : > { %6711 = vmatmul.mubr.msk.f32.vlgmr.msra.gmra.mrb[0].mxu1 %vm946_vm12, %v6708_v39  ;;  %p6854_p2 = por %p6853_p1, %p6852_p0 }
 0x768   : > { %6714 = vmatpush1.msk.msra.mxu1 %vm950_vm10, %v5788_v18  ;;  %v6102_v32 = vpop.permute.xlu1 %6101  ;;  %v6392_v45 = vpop.permute.xlu0 %6391  ;;  %5871 = vmatprep.mubr.f32.mxu1 %v10076_v38 }
 0x769   : > { %v6123_v1 = vsel %vm692_vm8, %v6122_v31, %v6102_v32  ;;  %v6443_v51 = vsel %vm686_vm5, %v6442_v12, %v6392_v45  ;;  %p6855_p3 = pnand %p6854_p2, %p6848_p13 }
 0x76a   : > { %v6124_v11 = vsel %vm694_vm9, %v6123_v1, %v6106_v56 }
 0x76c   : > { %v6110_v34 = vpop.permute.xlu1 %6109  ;;  %v6396_v2 = vpop.permute.xlu0 %6395 }
 0x76d   : > { %v6125_v57 = vsel %vm696_vm11, %v6124_v11, %v6110_v34  ;;  %v6444_v56 = vsel %vm688_vm6, %v6443_v51, %v6396_v2 }
 0x76e   : > { %6717 = vmatprep.subr.msk.mxu1 %vm950_vm10, %v6125_v57 }
 0x76f   : > { %6715 = vmatmul.mubr.msk.f32.vlgmr.msra.gmra.mrb[0].mxu1 %vm946_vm12, %v6712_v5 }
 0x770   : > { %6718 = vmatpush1.msk.msra.mxu1 %vm950_vm10, %v6118_v27  ;;  %v6416_v29 = vpop.permute.xlu1 %6415  ;;  %v6400_v59 = vpop.permute.xlu0 %6399  ;;  %6201 = vmatprep.mubr.f32.mxu1 %v10076_v38 }
 0x771   : > { %v6449_v17 = vsel %vm684_vm4, %v9697_v19, %v6416_v29 }
 0x772   : > { %v6450_v54 = vsel %vm686_vm5, %v6449_v17, %v6420_v23  ;;  %v6445_v23 = vsel %vm690_vm7, %v6444_v56, %v6400_v59 }
 0x774   : > { %v6424_v6 = vpop.permute.xlu1 %6423  ;;  %v6404_v42 = vpop.permute.xlu0 %6403 }
 0x775   : > { %v6451_v33 = vsel %vm688_vm6, %v6450_v54, %v6424_v6  ;;  %v6446_v8 = vsel %vm692_vm8, %v6445_v23, %v6404_v42 }
 0x776   : > { %v6452_v26 = vsel %vm690_vm7, %v6451_v33, %v6428_v3 }
 0x777   : > { %6719 = vmatmul.mubr.msk.f32.vlgmr.msra.gmra.mrb[0].mxu1 %vm946_vm12, %v6716_v10 }
 0x778   : > { %v6432_v19 = vpop.permute.xlu1 %6431  ;;  %v6408_v36 = vpop.permute.xlu0 %6407  ;;  %6531 = vmatprep.mubr.f32.mxu1 %v10076_v38  ;;  %v6720_v38 = vld [vmem:[%s10037_s2 + $0x20] sm:$0xf] }
 0x779   : > { %v6453_v40 = vsel %vm692_vm8, %v6452_v26, %v6432_v19  ;;  %v6447_v37 = vsel %vm694_vm9, %v6446_v8, %v6408_v36 }
 0x77a   : > { %v6454_v14 = vsel %vm694_vm9, %v6453_v40, %v9905_v24 }
 0x77c   : > { %v6440_v9 = vpop.permute.xlu1 %6439  ;;  %v6412_v7 = vpop.permute.xlu0 %6411 }
 0x77d   : > { %v6455_v3 = vsel %vm696_vm11, %v6454_v14, %v6440_v9  ;;  %v6448_v41 = vsel %vm696_vm11, %v6447_v37, %v6412_v7 }
 0x77e   : > { %6721 = vmatprep.subr.msk.mxu1 %vm950_vm10, %v6455_v3 }
 0x77f   : > { %6722 = vmatpush1.msk.msra.mxu1 %vm950_vm10, %v6448_v41 }
 0x780   : > { %6723 = vmatmul.mubr.msk.f32.vlgmr.msra.gmra.mrb[0].mxu1 %vm946_vm12, %v6720_v38 }
 0x853   : > { %v6533_v44 = vpop.f32.mrb[0].mxu1 }
 0x854   : > { %v6540_v61 = vsel %vm950_vm10, %v6533_v44, 0.0  ;;  %v6545_v24 = vmul.f32 %v6533_v44, %v6533_v44  ;;  %v6535_v46 = vpop.f32.mrb[1].mxu1 }
 0x855   : > { %v6541_v20 = vsel %vm950_vm10, %v6535_v46, 0.0  ;;  %v6546_v43 = vmul.f32 %v6535_v46, %v6535_v46 }
 0x856   : > { %v6542_v52 = vadd.f32 %v6541_v20, %v6540_v61  ;;  %v6547_v0 = vsel %vm950_vm10, %v6545_v24, 0.0 }
 0x857   : > { %v6548_v25 = vsel %vm950_vm10, %v6546_v43, 0.0 }
 0x858   : > { %6543 = vadd.xlane.f32.xlu1 %v6542_v52  ;;  %v6549_v47 = vadd.f32 %v6548_v25, %v6547_v0 }
 0x85a   : > { %6550 = vadd.xlane.f32.xlu0 %v6549_v47 }
 0x8e5   : > { %v6544_v55 = vpop.xlane.xlu1 %6543 }
 0x8e6   : > { %v6552_v13 = vmul.f32 0.00390625, %v6544_v55 }
 0x8e7   : > { %v6551_v58 = vpop.xlane.xlu0 %6550 }
 0x8e8   : > { %v6553_v35 = vmul.f32 0.00390625, %v6551_v58  ;;  %v6554_v28 = vmul.f32 %v6552_v13, %v6552_v13  ;;  %v6557_v15 = vsub.f32 %v6533_v44, %v6552_v13  ;;  %v6558_v53 = vsub.f32 %v6535_v46, %v6552_v13 }
 0x8ea   : > { %v6555_v63 = vsub.f32 %v6553_v35, %v6554_v28 }
 0x8ec   : > { %v6556_v4 = vmax.f32 %v6555_v63, 0.0 }
 0x8ee   : > { %v6559_v48 = vadd.f32 1e-05, %v6556_v4 }
 0x8f0   : > { %6842 = vrsqrt.f32 %v6559_v48 }
 0x8fa   : > { %v6843_v39 = vpop.eup %6842 }
 0x8fb   : > { %v6561_v21 = vmul.f32 %v6843_v39, %v6557_v15  ;;  %v6562_v49 = vmul.f32 %v6843_v39, %v6558_v53 }
 0x8fd   : > { %v6565_v30 = vcombine.low %v6561_v21, %v6562_v49 }
 0x8ff   : > { %v6567_v18 = vadd.f32 %v6844_v16, %v6565_v30 }
 0x901   : > { %6568 = vst [vmem:[%s163_s6] sm:$0xff] %v6567_v18 }
 0x902   : > { %6858 = shalt.err (!%p6855_p3)
}
 0x903   : > { %s6859_s20 = scalar_lea.hbm %s9993_s10, 128  ;;  %s6863_s26 = scalar_lea.hbm %s10038_s3, 256 }
 0x904   : > { %p6860_p4 = scmp.ne.s32.totalorder %s9993_s10, %s6859_s20  ;;  %p6864_p9 = scmp.lt.u32.totalorder %s9993_s10, %s10038_s3 }
 0x905   : > { %p6865_p10 = scmp.lt.u32.totalorder %s6863_s26, %s6859_s20  ;;  %p6867_p12 = scmp.lt.u32.totalorder %s6859_s20, %s9993_s10 }
 0x906   : > { %p6861_p7 = pnand %p6860_p4, %p6982_p5 }
 0x907   : > { %p6866_p11 = por %p6865_p10, %p6864_p9 }
 0x908   : > { %p6862_p8 = pneg %p6861_p7 }
 0x909   : > { %p6868_p13 = por %p6867_p12, %p6866_p11 }
 0x90b   : > { %p6869_p0 = pnand %p6868_p13, %p6862_p8 }
 0x90d   : > { %6872 = shalt.err (!%p6869_p0)
}
 0x90e   : > { %6763 = dma.vmem_to_hbm [thread:$0]  (%p6982_p5), %s9995_s7, 128, %s9993_s10, %s6570_s11  }
 0x90f PF: > { %p6769_p1 = scmp.ge.s32.totalorder %s6907_s15, 2  ;;  %s6596_s30 = sand.u32 1, %s6895_s12  }
 0x910   : > { %s6597_s4 = scalar_lea.sflag [#allocation4], %s6596_s30 }
 0x911   : > { %p6766_p2 = pnand %p6769_p1, %p6986_p6 }
 0x913   : > { %6890 = dma.done.wait (!%p6766_p2), %s6597_s4, 128  }
 0x914   : > { %6892 = vsyncadd (!%p6766_p2), %s6597_s4, 4294967168  ;;  %p13_p3 = scmp.ge.s32.totalorder %s6969_s18, 4   ;;  %s10203_s12 = smov %s6899_s13 }
 0x915   : > { %s10204_s13 = smov %s6903_s14  ;;  %s10205_s14 = smov %s6980_s21 }
 0x916   : > { %s10206_s15 = smov %s6969_s18  ;;  %15 = sbr.rel (!%p13_p3) target bundleno = 3 (0x3), region = 83 }
 0x91d   :  { %6602 = vsyncpa [#allocation4], 1 }
 0x91e   :  { %6604 = vsyncpa [#allocation4 + $0x1], 1 }

</bundles_post_ra>
